<compile_context>
chip_gen: v5e
topology: v5e:2x2
jax: 0.10.0
libtpu: 0.0.40
codegen_flags: <defaults>
</compile_context>

<pallas_src>
import functools

import jax
import jax.numpy as jnp
from jax import lax
from jax.experimental import pallas as pl
from jax.experimental.pallas import tpu as pltpu

_LPAD = 16  # left halo width of the conv1->conv2 scratch (bf16 packed-tile aligned)


def _basic_block_kernel(xpad_ref,        # (1, H+2, W+2, Cinp) f32  zero-padded input
                        w1_ref,          # (9*Cinp, Pp) bf16        conv1, tap-major
                        s1_ref, b1_ref,  # (1, Pp) f32              folded BN1
                        w2_ref,          # (9*Pp, Pp)   bf16        conv2, tap-major
                        s2_ref, b2_ref,  # (1, Pp) f32              folded BN2
                        *rest,
                        Ho, Wo, Cinp, Pp, stride, has_projection):
  if has_projection:
    wsc_ref, ssc_ref, bsc_ref, out_ref, mid_ref = rest
  else:
    out_ref, mid_ref = rest

  M = Ho * Wo
  f32 = jnp.float32
  bf16 = jnp.bfloat16

  def win_ds(start, size):
    return pl.ds(start, size, stride) if stride > 1 else pl.ds(start, size)

  # ---- conv1: 3x3 / stride s / pad 1 as ONE wide-K (K = 9*Cinp) MXU matmul.
  # Each tap is cast to bf16 BEFORE the concat so the (M, 9*Cinp) im2col slab
  # is assembled directly in bf16 (half the copy bytes / VMEM of an f32 slab).
  taps = []
  for k in range(9):
    dy, dx = k // 3, k % 3
    taps.append(xpad_ref[:, win_ds(dy, Ho), win_ds(dx, Wo), :].astype(bf16))
  col1 = jnp.concatenate(taps, axis=-1).reshape(M, 9 * Cinp)
  acc1 = jnp.dot(col1, w1_ref[...], preferred_element_type=f32)
  out1 = jnp.maximum(acc1 * s1_ref[...] + b1_ref[...], 0.0)        # BN1 + ReLU (f32)

  # ---- stage the conv1 output into a bf16 padded scratch.  The interior
  # starts at column _LPAD (packed-tile-aligned sublane offset) so the big
  # store is a full-width vst; only the 1-wide halo ring is zeroed.
  # (Halo is re-zeroed every step on purpose: a program_id==0 guard is unsafe
  # under v7x megacore splitting of the "parallel" batch axis.)
  zrow = jnp.zeros((1, Wo + 2, Pp), mid_ref.dtype)
  zcol = jnp.zeros((Ho + 2, 1, Pp), mid_ref.dtype)
  mid_ref[pl.ds(0, 1), pl.ds(_LPAD - 1, Wo + 2), :] = zrow
  mid_ref[pl.ds(Ho + 1, 1), pl.ds(_LPAD - 1, Wo + 2), :] = zrow
  mid_ref[:, pl.ds(_LPAD - 1, 1), :] = zcol
  mid_ref[:, pl.ds(_LPAD + Wo, 1), :] = zcol
  mid_ref[pl.ds(1, Ho), pl.ds(_LPAD, Wo), :] = out1.reshape(Ho, Wo, Pp).astype(bf16)

  # ---- conv2: 3x3 / stride 1 / pad 1 as ONE wide-K (K = 9*Pp) MXU matmul ----
  taps2 = []
  for k in range(9):
    dy, dx = k // 3, k % 3
    taps2.append(mid_ref[pl.ds(dy, Ho), pl.ds(_LPAD - 1 + dx, Wo), :])  # bf16
  col2 = jnp.concatenate(taps2, axis=-1).reshape(M, 9 * Pp)
  acc2 = jnp.dot(col2, w2_ref[...], preferred_element_type=f32)
  out2 = acc2 * s2_ref[...] + b2_ref[...]                           # BN2 (f32)

  # ---- shortcut: derived from the already-resident padded input (no second
  # HBM input stream).  Identity stays f32; projection is a 1x1 conv on MXU.
  xsc = xpad_ref[:, win_ds(1, Ho), win_ds(1, Wo), :].reshape(M, Cinp)
  if has_projection:
    sc = jnp.dot(xsc.astype(bf16), wsc_ref[...], preferred_element_type=f32)
    sc = sc * ssc_ref[...] + bsc_ref[...]
  else:
    sc = xsc                                                        # f32 identity add

  # ---- residual add + final ReLU ----
  out = jnp.maximum(out2 + sc, 0.0)
  out_ref[...] = out.reshape(1, Ho, Wo, Pp).astype(out_ref.dtype)


def _round_up(v, m):
  return (v + m - 1) // m * m


def _pad_last(a, to):
  if a.shape[-1] == to:
    return a
  return jnp.pad(a, [(0, 0)] * (a.ndim - 1) + [(0, to - a.shape[-1])])


def _fold_bn(gamma, beta, mean, var, eps=1e-5):
  scale = gamma / jnp.sqrt(var + eps)
  bias = beta - mean * scale
  return scale.astype(jnp.float32), bias.astype(jnp.float32)


def _vmem_limit_bytes():
  # v7x: 64 MiB physical per TC -> ~48 MiB budget; v5e/v6e: 128 MiB -> 96 MiB.
  try:
    cap = int(pltpu.get_tpu_info().vmem_capacity_bytes)
    return int(min(cap * 3 // 4, 96 * 1024 * 1024))
  except Exception:
    return 64 * 1024 * 1024


def basic_block_forward(x_nchw, params, stride):
  """x_nchw: (N, Cin, H, W) float32, PyTorch layout. Returns (N, P, Ho, Wo)."""
  N, Cin, H, W = x_nchw.shape
  P = params["w1"].shape[0]
  Ho = (H + 2 - 3) // stride + 1
  Wo = (W + 2 - 3) // stride + 1
  Cinp = _round_up(Cin, 128)            # lane-dense channels
  Pp = _round_up(P, 128)
  has_projection = "wsc" in params
  if not has_projection:
    assert stride == 1 and Cin == P, "identity shortcut needs stride==1 and Cin==P"

  x = jnp.transpose(x_nchw, (0, 2, 3, 1)).astype(jnp.float32)      # -> NHWC
  xc = _pad_last(x, Cinp)                                          # channel pad
  xpad = jnp.pad(xc, ((0, 0), (1, 1), (1, 1), (0, 0)))             # spatial pad, f32

  # conv weights: torch (Cout, Cin, kh, kw) -> tap-major (kh*kw*Cin_pad, Cout_pad)
  w1 = jnp.transpose(params["w1"], (2, 3, 1, 0))
  w1 = jnp.pad(w1, ((0, 0), (0, 0), (0, Cinp - Cin), (0, Pp - P)))
  w1 = w1.reshape(9 * Cinp, Pp).astype(jnp.bfloat16)
  w2 = jnp.transpose(params["w2"], (2, 3, 1, 0))
  w2 = jnp.pad(w2, ((0, 0), (0, 0), (0, Pp - P), (0, Pp - P)))
  w2 = w2.reshape(9 * Pp, Pp).astype(jnp.bfloat16)

  s1, b1 = _fold_bn(*params["bn1"])
  s2, b2 = _fold_bn(*params["bn2"])
  s1 = _pad_last(s1[None, :], Pp); b1 = _pad_last(b1[None, :], Pp)
  s2 = _pad_last(s2[None, :], Pp); b2 = _pad_last(b2[None, :], Pp)

  rep2 = lambda n: (0, 0)            # grid-invariant weights / BN params
  args = [xpad, w1, s1, b1, w2, s2, b2]
  in_specs = [
      pl.BlockSpec((1, H + 2, W + 2, Cinp), lambda n: (n, 0, 0, 0)),
      pl.BlockSpec((9 * Cinp, Pp), rep2),
      pl.BlockSpec((1, Pp), rep2), pl.BlockSpec((1, Pp), rep2),
      pl.BlockSpec((9 * Pp, Pp), rep2),
      pl.BlockSpec((1, Pp), rep2), pl.BlockSpec((1, Pp), rep2),
  ]
  if has_projection:
    wsc = jnp.transpose(params["wsc"][:, :, 0, 0], (1, 0))         # (Cin, P)
    wsc = jnp.pad(wsc, ((0, Cinp - Cin), (0, Pp - P))).astype(jnp.bfloat16)
    ssc, bsc = _fold_bn(*params["bnsc"])
    ssc = _pad_last(ssc[None, :], Pp); bsc = _pad_last(bsc[None, :], Pp)
    args += [wsc, ssc, bsc]
    in_specs += [pl.BlockSpec((Cinp, Pp), rep2),
                 pl.BlockSpec((1, Pp), rep2), pl.BlockSpec((1, Pp), rep2)]

  kern = functools.partial(_basic_block_kernel, Ho=Ho, Wo=Wo, Cinp=Cinp, Pp=Pp,
                           stride=stride, has_projection=has_projection)

  flops = 2 * N * Ho * Wo * (9 * Cinp * Pp + 9 * Pp * Pp
                             + (Cinp * Pp if has_projection else 0))
  bytes_accessed = sum(int(a.size) * a.dtype.itemsize for a in args) \
      + N * Ho * Wo * Pp * 4

  grid_spec = pltpu.PrefetchScalarGridSpec(
      num_scalar_prefetch=0,
      grid=(N,),
      in_specs=in_specs,
      out_specs=pl.BlockSpec((1, Ho, Wo, Pp), lambda n: (n, 0, 0, 0)),
      scratch_shapes=[pltpu.VMEM((Ho + 2, _LPAD + Wo + 1, Pp), jnp.bfloat16)],
  )
  out_nhwc = pl.pallas_call(
      kern,
      out_shape=jax.ShapeDtypeStruct((N, Ho, Wo, Pp), jnp.float32),
      grid_spec=grid_spec,
      compiler_params=pltpu.CompilerParams(
          dimension_semantics=("parallel",),
          vmem_limit_bytes=_vmem_limit_bytes()),
      cost_estimate=pl.CostEstimate(flops=int(flops), transcendentals=0,
                                    bytes_accessed=int(bytes_accessed)),
  )(*args)
  return jnp.transpose(out_nhwc[:, :, :, :P], (0, 3, 1, 2))        # slice pad, -> NCHW


def reference_forward(x_nchw, params, stride):
  """Pure-JAX reference with the same bf16-operand / f32-accumulate numerics."""
  x = jnp.transpose(x_nchw, (0, 2, 3, 1)).astype(jnp.float32)

  def conv(v, w_t, s, pad):
    w = jnp.transpose(w_t, (2, 3, 1, 0)).astype(jnp.bfloat16)      # HWIO
    return lax.conv_general_dilated(
        v.astype(jnp.bfloat16), w, (s, s), ((pad, pad), (pad, pad)),
        dimension_numbers=("NHWC", "HWIO", "NHWC"),
        preferred_element_type=jnp.float32)

  def bn(v, p):
    scale, bias = _fold_bn(*p)
    return v * scale.reshape(1, 1, 1, -1) + bias.reshape(1, 1, 1, -1)

  out = jax.nn.relu(bn(conv(x, params["w1"], stride, 1), params["bn1"]))
  out = bn(conv(out, params["w2"], 1, 1), params["bn2"])
  if "wsc" in params:
    sc = bn(conv(x, params["wsc"], stride, 0), params["bnsc"])
  else:
    sc = x
  return jnp.transpose(jax.nn.relu(out + sc), (0, 3, 1, 2))


if __name__ == "__main__":
  key = jax.random.PRNGKey(0)

  def bn_params(k, c):
    k1, k2, k3, k4 = jax.random.split(k, 4)
    gamma = 1.0 + 0.1 * jax.random.normal(k1, (c,), jnp.float32)
    beta = 0.1 * jax.random.normal(k2, (c,), jnp.float32)
    mean = 0.1 * jax.random.normal(k3, (c,), jnp.float32)
    var = jnp.abs(1.0 + 0.1 * jax.random.normal(k4, (c,), jnp.float32))
    return (gamma, beta, mean, var)

  def make_params(k, in_planes, planes, stride):
    ks = jax.random.split(k, 6)
    p = {
        "w1": 0.1 * jax.random.normal(ks[0], (planes, in_planes, 3, 3), jnp.float32),
        "bn1": bn_params(ks[1], planes),
        "w2": 0.1 * jax.random.normal(ks[2], (planes, planes, 3, 3), jnp.float32),
        "bn2": bn_params(ks[3], planes),
    }
    if stride != 1 or in_planes != planes:
      p["wsc"] = 0.1 * jax.random.normal(ks[4], (planes, in_planes, 1, 1), jnp.float32)
      p["bnsc"] = bn_params(ks[5], planes)
    return p

  cases = [
      # (N, in_planes, planes, H, W, stride)
      (2, 4, 8, 16, 16, 2),       # projection shortcut (stride 2 + channel change)
      (2, 8, 8, 8, 8, 1),         # identity shortcut
      (1, 128, 128, 8, 8, 1),     # lane-exact channels, identity shortcut
      (1, 128, 128, 16, 16, 2),   # lane-exact channels, projection / stride 2
  ]
  for idx, (N, cin, cout, H, W, stride) in enumerate(cases):
    kp, kx = jax.random.split(jax.random.fold_in(key, idx))
    params = make_params(kp, cin, cout, stride)
    x = jax.random.normal(kx, (N, cin, H, W), jnp.float32)

    out = jax.block_until_ready(basic_block_forward(x, params, stride))
    ref = reference_forward(x, params, stride)
    assert out.shape == ref.shape, (out.shape, ref.shape)
    err = float(jnp.max(jnp.abs(out - ref)))
    assert err < 2e-2, f"case {idx}: max abs err {err}"

  print("KERNEL_OK")
</pallas_src>

<mosaic_0001>
module attributes {stable_mosaic.version = 11 : i64} {
  func.func @_basic_block_kernel(%arg0: i32, %arg1: memref<1x18x18x128xf32, #tpu.memory_space<vmem>>, %arg2: memref<1152x128xbf16, #tpu.memory_space<vmem>>, %arg3: memref<1x128xf32, #tpu.memory_space<vmem>>, %arg4: memref<1x128xf32, #tpu.memory_space<vmem>>, %arg5: memref<1152x128xbf16, #tpu.memory_space<vmem>>, %arg6: memref<1x128xf32, #tpu.memory_space<vmem>>, %arg7: memref<1x128xf32, #tpu.memory_space<vmem>>, %arg8: memref<128x128xbf16, #tpu.memory_space<vmem>>, %arg9: memref<1x128xf32, #tpu.memory_space<vmem>>, %arg10: memref<1x128xf32, #tpu.memory_space<vmem>>, %arg11: memref<1x8x8x128xf32, #tpu.memory_space<vmem>>, %arg12: memref<10x25x128xbf16, #tpu.memory_space<vmem>>) attributes {dimension_semantics = [#tpu.dimension_semantics<parallel>], iteration_bounds = array<i64: 2>, scalar_prefetch = 0 : i64, scratch_operands = 1 : i64, tpu.core_type = #tpu.core_type<tc>, window_params = [{transform_indices = @transform_0, window_bounds = array<i64: 1, 18, 18, 128>}, {pipeline_mode = #tpu.pipeline_mode<synchronous>, transform_indices = @transform_1, window_bounds = array<i64: 1152, 128>}, {pipeline_mode = #tpu.pipeline_mode<synchronous>, transform_indices = @transform_2, window_bounds = array<i64: 1, 128>}, {pipeline_mode = #tpu.pipeline_mode<synchronous>, transform_indices = @transform_3, window_bounds = array<i64: 1, 128>}, {pipeline_mode = #tpu.pipeline_mode<synchronous>, transform_indices = @transform_4, window_bounds = array<i64: 1152, 128>}, {pipeline_mode = #tpu.pipeline_mode<synchronous>, transform_indices = @transform_5, window_bounds = array<i64: 1, 128>}, {pipeline_mode = #tpu.pipeline_mode<synchronous>, transform_indices = @transform_6, window_bounds = array<i64: 1, 128>}, {pipeline_mode = #tpu.pipeline_mode<synchronous>, transform_indices = @transform_7, window_bounds = array<i64: 128, 128>}, {pipeline_mode = #tpu.pipeline_mode<synchronous>, transform_indices = @transform_8, window_bounds = array<i64: 1, 128>}, {pipeline_mode = #tpu.pipeline_mode<synchronous>, transform_indices = @transform_9, window_bounds = array<i64: 1, 128>}, {transform_indices = @transform_10, window_bounds = array<i64: 1, 8, 8, 128>}]} {
    %c0 = arith.constant 0 : index
    %c0_0 = arith.constant 0 : index
    %c0_1 = arith.constant 0 : index
    %c0_2 = arith.constant 0 : index
    %0 = tpu.strided_load %arg1[%c0, %c0_0, %c0_1, %c0_2] {strides = array<i32: 1, 2, 2, 1>} : memref<1x18x18x128xf32, #tpu.memory_space<vmem>>, vector<1x8x8x128xf32>
    %1 = arith.truncf %0 : vector<1x8x8x128xf32> to vector<1x8x8x128xbf16>
    %c0_3 = arith.constant 0 : index
    %c0_4 = arith.constant 0 : index
    %c1 = arith.constant 1 : index
    %c0_5 = arith.constant 0 : index
    %2 = tpu.strided_load %arg1[%c0_3, %c0_4, %c1, %c0_5] {strides = array<i32: 1, 2, 2, 1>} : memref<1x18x18x128xf32, #tpu.memory_space<vmem>>, vector<1x8x8x128xf32>
    %3 = arith.truncf %2 : vector<1x8x8x128xf32> to vector<1x8x8x128xbf16>
    %c0_6 = arith.constant 0 : index
    %c0_7 = arith.constant 0 : index
    %c2 = arith.constant 2 : index
    %c0_8 = arith.constant 0 : index
    %4 = tpu.strided_load %arg1[%c0_6, %c0_7, %c2, %c0_8] {strides = array<i32: 1, 2, 2, 1>} : memref<1x18x18x128xf32, #tpu.memory_space<vmem>>, vector<1x8x8x128xf32>
    %5 = arith.truncf %4 : vector<1x8x8x128xf32> to vector<1x8x8x128xbf16>
    %c0_9 = arith.constant 0 : index
    %c1_10 = arith.constant 1 : index
    %c0_11 = arith.constant 0 : index
    %c0_12 = arith.constant 0 : index
    %6 = tpu.strided_load %arg1[%c0_9, %c1_10, %c0_11, %c0_12] {strides = array<i32: 1, 2, 2, 1>} : memref<1x18x18x128xf32, #tpu.memory_space<vmem>>, vector<1x8x8x128xf32>
    %7 = arith.truncf %6 : vector<1x8x8x128xf32> to vector<1x8x8x128xbf16>
    %c0_13 = arith.constant 0 : index
    %c1_14 = arith.constant 1 : index
    %c1_15 = arith.constant 1 : index
    %c0_16 = arith.constant 0 : index
    %8 = tpu.strided_load %arg1[%c0_13, %c1_14, %c1_15, %c0_16] {strides = array<i32: 1, 2, 2, 1>} : memref<1x18x18x128xf32, #tpu.memory_space<vmem>>, vector<1x8x8x128xf32>
    %9 = arith.truncf %8 : vector<1x8x8x128xf32> to vector<1x8x8x128xbf16>
    %c0_17 = arith.constant 0 : index
    %c1_18 = arith.constant 1 : index
    %c2_19 = arith.constant 2 : index
    %c0_20 = arith.constant 0 : index
    %10 = tpu.strided_load %arg1[%c0_17, %c1_18, %c2_19, %c0_20] {strides = array<i32: 1, 2, 2, 1>} : memref<1x18x18x128xf32, #tpu.memory_space<vmem>>, vector<1x8x8x128xf32>
    %11 = arith.truncf %10 : vector<1x8x8x128xf32> to vector<1x8x8x128xbf16>
    %c0_21 = arith.constant 0 : index
    %c2_22 = arith.constant 2 : index
    %c0_23 = arith.constant 0 : index
    %c0_24 = arith.constant 0 : index
    %12 = tpu.strided_load %arg1[%c0_21, %c2_22, %c0_23, %c0_24] {strides = array<i32: 1, 2, 2, 1>} : memref<1x18x18x128xf32, #tpu.memory_space<vmem>>, vector<1x8x8x128xf32>
    %13 = arith.truncf %12 : vector<1x8x8x128xf32> to vector<1x8x8x128xbf16>
    %c0_25 = arith.constant 0 : index
    %c2_26 = arith.constant 2 : index
    %c1_27 = arith.constant 1 : index
    %c0_28 = arith.constant 0 : index
    %14 = tpu.strided_load %arg1[%c0_25, %c2_26, %c1_27, %c0_28] {strides = array<i32: 1, 2, 2, 1>} : memref<1x18x18x128xf32, #tpu.memory_space<vmem>>, vector<1x8x8x128xf32>
    %15 = arith.truncf %14 : vector<1x8x8x128xf32> to vector<1x8x8x128xbf16>
    %c0_29 = arith.constant 0 : index
    %c2_30 = arith.constant 2 : index
    %c2_31 = arith.constant 2 : index
    %c0_32 = arith.constant 0 : index
    %16 = tpu.strided_load %arg1[%c0_29, %c2_30, %c2_31, %c0_32] {strides = array<i32: 1, 2, 2, 1>} : memref<1x18x18x128xf32, #tpu.memory_space<vmem>>, vector<1x8x8x128xf32>
    %17 = arith.truncf %16 : vector<1x8x8x128xf32> to vector<1x8x8x128xbf16>
    %18 = tpu.concatenate %1, %3, %5, %7, %9, %11, %13, %15, %17 in 3 : vector<1x8x8x128xbf16>, vector<1x8x8x128xbf16>, vector<1x8x8x128xbf16>, vector<1x8x8x128xbf16>, vector<1x8x8x128xbf16>, vector<1x8x8x128xbf16>, vector<1x8x8x128xbf16>, vector<1x8x8x128xbf16>, vector<1x8x8x128xbf16> -> vector<1x8x8x1152xbf16>
    %19 = vector.shape_cast %18 : vector<1x8x8x1152xbf16> to vector<64x1152xbf16>
    %c0_33 = arith.constant 0 : index
    %c0_34 = arith.constant 0 : index
    %20 = vector.load %arg2[%c0_33, %c0_34] : memref<1152x128xbf16, #tpu.memory_space<vmem>>, vector<1152x128xbf16>
    %cst = arith.constant dense<0.000000e+00> : vector<64x128xf32>
    %21 = tpu.matmul %19, %20, %cst {dimension_numbers = #tpu.dot_dimension_numbers<[1], [0], [0], [1], [0, 0, 1, 1], [], []>} : vector<64x1152xbf16>, vector<1152x128xbf16>, vector<64x128xf32> -> vector<64x128xf32>
    %c0_35 = arith.constant 0 : index
    %c0_36 = arith.constant 0 : index
    %22 = vector.load %arg3[%c0_35, %c0_36] : memref<1x128xf32, #tpu.memory_space<vmem>>, vector<1x128xf32>
    %23 = vector.broadcast %22 : vector<1x128xf32> to vector<64x128xf32>
    %24 = arith.mulf %21, %23 : vector<64x128xf32>
    %c0_37 = arith.constant 0 : index
    %c0_38 = arith.constant 0 : index
    %25 = vector.load %arg4[%c0_37, %c0_38] : memref<1x128xf32, #tpu.memory_space<vmem>>, vector<1x128xf32>
    %26 = vector.broadcast %25 : vector<1x128xf32> to vector<64x128xf32>
    %27 = arith.addf %24, %26 : vector<64x128xf32>
    %cst_39 = arith.constant 0.000000e+00 : f32
    %28 = vector.broadcast %cst_39 : f32 to vector<64x128xf32>
    %29 = arith.maximumf %27, %28 : vector<64x128xf32>
    %cst_40 = arith.constant 0.000000e+00 : bf16
    %30 = vector.broadcast %cst_40 : bf16 to vector<1x10x128xbf16>
    %cst_41 = arith.constant 0.000000e+00 : bf16
    %31 = vector.broadcast %cst_41 : bf16 to vector<10x1x128xbf16>
    %c0_42 = arith.constant 0 : index
    %c15 = arith.constant 15 : index
    %c0_43 = arith.constant 0 : index
    %32 = vector.load %arg12[%c0_42, %c15, %c0_43] : memref<10x25x128xbf16, #tpu.memory_space<vmem>>, vector<1x10x128xbf16>
    tpu.vector_store %arg12[%c0_42, %c15, %c0_43], %30 {strides = array<i32>} : memref<10x25x128xbf16, #tpu.memory_space<vmem>>, vector<1x10x128xbf16>,
    %c9 = arith.constant 9 : index
    %c15_44 = arith.constant 15 : index
    %c0_45 = arith.constant 0 : index
    %33 = vector.load %arg12[%c9, %c15_44, %c0_45] : memref<10x25x128xbf16, #tpu.memory_space<vmem>>, vector<1x10x128xbf16>
    tpu.vector_store %arg12[%c9, %c15_44, %c0_45], %30 {strides = array<i32>} : memref<10x25x128xbf16, #tpu.memory_space<vmem>>, vector<1x10x128xbf16>,
    %c0_46 = arith.constant 0 : index
    %c15_47 = arith.constant 15 : index
    %c0_48 = arith.constant 0 : index
    %34 = vector.load %arg12[%c0_46, %c15_47, %c0_48] : memref<10x25x128xbf16, #tpu.memory_space<vmem>>, vector<10x1x128xbf16>
    tpu.vector_store %arg12[%c0_46, %c15_47, %c0_48], %31 {strides = array<i32>} : memref<10x25x128xbf16, #tpu.memory_space<vmem>>, vector<10x1x128xbf16>,
    %c0_49 = arith.constant 0 : index
    %c24 = arith.constant 24 : index
    %c0_50 = arith.constant 0 : index
    %35 = vector.load %arg12[%c0_49, %c24, %c0_50] : memref<10x25x128xbf16, #tpu.memory_space<vmem>>, vector<10x1x128xbf16>
    tpu.vector_store %arg12[%c0_49, %c24, %c0_50], %31 {strides = array<i32>} : memref<10x25x128xbf16, #tpu.memory_space<vmem>>, vector<10x1x128xbf16>,
    %36 = vector.shape_cast %29 : vector<64x128xf32> to vector<8x8x128xf32>
    %37 = arith.truncf %36 : vector<8x8x128xf32> to vector<8x8x128xbf16>
    %c1_51 = arith.constant 1 : index
    %c16 = arith.constant 16 : index
    %c0_52 = arith.constant 0 : index
    %38 = vector.load %arg12[%c1_51, %c16, %c0_52] : memref<10x25x128xbf16, #tpu.memory_space<vmem>>, vector<8x8x128xbf16>
    tpu.vector_store %arg12[%c1_51, %c16, %c0_52], %37 {strides = array<i32>} : memref<10x25x128xbf16, #tpu.memory_space<vmem>>, vector<8x8x128xbf16>,
    %c0_53 = arith.constant 0 : index
    %c15_54 = arith.constant 15 : index
    %c0_55 = arith.constant 0 : index
    %39 = vector.load %arg12[%c0_53, %c15_54, %c0_55] : memref<10x25x128xbf16, #tpu.memory_space<vmem>>, vector<8x8x128xbf16>
    %c0_56 = arith.constant 0 : index
    %c16_57 = arith.constant 16 : index
    %c0_58 = arith.constant 0 : index
    %40 = vector.load %arg12[%c0_56, %c16_57, %c0_58] : memref<10x25x128xbf16, #tpu.memory_space<vmem>>, vector<8x8x128xbf16>
    %c0_59 = arith.constant 0 : index
    %c17 = arith.constant 17 : index
    %c0_60 = arith.constant 0 : index
    %41 = vector.load %arg12[%c0_59, %c17, %c0_60] : memref<10x25x128xbf16, #tpu.memory_space<vmem>>, vector<8x8x128xbf16>
    %c1_61 = arith.constant 1 : index
    %c15_62 = arith.constant 15 : index
    %c0_63 = arith.constant 0 : index
    %42 = vector.load %arg12[%c1_61, %c15_62, %c0_63] : memref<10x25x128xbf16, #tpu.memory_space<vmem>>, vector<8x8x128xbf16>
    %c1_64 = arith.constant 1 : index
    %c16_65 = arith.constant 16 : index
    %c0_66 = arith.constant 0 : index
    %43 = vector.load %arg12[%c1_64, %c16_65, %c0_66] : memref<10x25x128xbf16, #tpu.memory_space<vmem>>, vector<8x8x128xbf16>
    %c1_67 = arith.constant 1 : index
    %c17_68 = arith.constant 17 : index
    %c0_69 = arith.constant 0 : index
    %44 = vector.load %arg12[%c1_67, %c17_68, %c0_69] : memref<10x25x128xbf16, #tpu.memory_space<vmem>>, vector<8x8x128xbf16>
    %c2_70 = arith.constant 2 : index
    %c15_71 = arith.constant 15 : index
    %c0_72 = arith.constant 0 : index
    %45 = vector.load %arg12[%c2_70, %c15_71, %c0_72] : memref<10x25x128xbf16, #tpu.memory_space<vmem>>, vector<8x8x128xbf16>
    %c2_73 = arith.constant 2 : index
    %c16_74 = arith.constant 16 : index
    %c0_75 = arith.constant 0 : index
    %46 = vector.load %arg12[%c2_73, %c16_74, %c0_75] : memref<10x25x128xbf16, #tpu.memory_space<vmem>>, vector<8x8x128xbf16>
    %c2_76 = arith.constant 2 : index
    %c17_77 = arith.constant 17 : index
    %c0_78 = arith.constant 0 : index
    %47 = vector.load %arg12[%c2_76, %c17_77, %c0_78] : memref<10x25x128xbf16, #tpu.memory_space<vmem>>, vector<8x8x128xbf16>
    %48 = tpu.concatenate %39, %40, %41, %42, %43, %44, %45, %46, %47 in 2 : vector<8x8x128xbf16>, vector<8x8x128xbf16>, vector<8x8x128xbf16>, vector<8x8x128xbf16>, vector<8x8x128xbf16>, vector<8x8x128xbf16>, vector<8x8x128xbf16>, vector<8x8x128xbf16>, vector<8x8x128xbf16> -> vector<8x8x1152xbf16>
    %49 = vector.shape_cast %48 : vector<8x8x1152xbf16> to vector<64x1152xbf16>
    %c0_79 = arith.constant 0 : index
    %c0_80 = arith.constant 0 : index
    %50 = vector.load %arg5[%c0_79, %c0_80] : memref<1152x128xbf16, #tpu.memory_space<vmem>>, vector<1152x128xbf16>
    %cst_81 = arith.constant dense<0.000000e+00> : vector<64x128xf32>
    %51 = tpu.matmul %49, %50, %cst_81 {dimension_numbers = #tpu.dot_dimension_numbers<[1], [0], [0], [1], [0, 0, 1, 1], [], []>} : vector<64x1152xbf16>, vector<1152x128xbf16>, vector<64x128xf32> -> vector<64x128xf32>
    %c0_82 = arith.constant 0 : index
    %c0_83 = arith.constant 0 : index
    %52 = vector.load %arg6[%c0_82, %c0_83] : memref<1x128xf32, #tpu.memory_space<vmem>>, vector<1x128xf32>
    %53 = vector.broadcast %52 : vector<1x128xf32> to vector<64x128xf32>
    %54 = arith.mulf %51, %53 : vector<64x128xf32>
    %c0_84 = arith.constant 0 : index
    %c0_85 = arith.constant 0 : index
    %55 = vector.load %arg7[%c0_84, %c0_85] : memref<1x128xf32, #tpu.memory_space<vmem>>, vector<1x128xf32>
    %56 = vector.broadcast %55 : vector<1x128xf32> to vector<64x128xf32>
    %57 = arith.addf %54, %56 : vector<64x128xf32>
    %c0_86 = arith.constant 0 : index
    %c1_87 = arith.constant 1 : index
    %c1_88 = arith.constant 1 : index
    %c0_89 = arith.constant 0 : index
    %58 = tpu.strided_load %arg1[%c0_86, %c1_87, %c1_88, %c0_89] {strides = array<i32: 1, 2, 2, 1>} : memref<1x18x18x128xf32, #tpu.memory_space<vmem>>, vector<1x8x8x128xf32>
    %59 = vector.shape_cast %58 : vector<1x8x8x128xf32> to vector<64x128xf32>
    %60 = arith.truncf %59 : vector<64x128xf32> to vector<64x128xbf16>
    %c0_90 = arith.constant 0 : index
    %c0_91 = arith.constant 0 : index
    %61 = vector.load %arg8[%c0_90, %c0_91] : memref<128x128xbf16, #tpu.memory_space<vmem>>, vector<128x128xbf16>
    %cst_92 = arith.constant dense<0.000000e+00> : vector<64x128xf32>
    %62 = tpu.matmul %60, %61, %cst_92 {dimension_numbers = #tpu.dot_dimension_numbers<[1], [0], [0], [1], [0, 0, 1, 1], [], []>} : vector<64x128xbf16>, vector<128x128xbf16>, vector<64x128xf32> -> vector<64x128xf32>
    %c0_93 = arith.constant 0 : index
    %c0_94 = arith.constant 0 : index
    %63 = vector.load %arg9[%c0_93, %c0_94] : memref<1x128xf32, #tpu.memory_space<vmem>>, vector<1x128xf32>
    %64 = vector.broadcast %63 : vector<1x128xf32> to vector<64x128xf32>
    %65 = arith.mulf %62, %64 : vector<64x128xf32>
    %c0_95 = arith.constant 0 : index
    %c0_96 = arith.constant 0 : index
    %66 = vector.load %arg10[%c0_95, %c0_96] : memref<1x128xf32, #tpu.memory_space<vmem>>, vector<1x128xf32>
    %67 = vector.broadcast %66 : vector<1x128xf32> to vector<64x128xf32>
    %68 = arith.addf %65, %67 : vector<64x128xf32>
    %69 = arith.addf %57, %68 : vector<64x128xf32>
    %cst_97 = arith.constant 0.000000e+00 : f32
    %70 = vector.broadcast %cst_97 : f32 to vector<64x128xf32>
    %71 = arith.maximumf %69, %70 : vector<64x128xf32>
    %72 = vector.shape_cast %71 : vector<64x128xf32> to vector<1x8x8x128xf32>
    %c0_98 = arith.constant 0 : index
    %c0_99 = arith.constant 0 : index
    %c0_100 = arith.constant 0 : index
    %c0_101 = arith.constant 0 : index
    %73 = vector.load %arg11[%c0_98, %c0_99, %c0_100, %c0_101] : memref<1x8x8x128xf32, #tpu.memory_space<vmem>>, vector<1x8x8x128xf32>
    tpu.vector_store %arg11[%c0_98, %c0_99, %c0_100, %c0_101], %72 {strides = array<i32>} : memref<1x8x8x128xf32, #tpu.memory_space<vmem>>, vector<1x8x8x128xf32>,
    return
  }
  func.func @transform_0(%arg0: i32) -> (i32, i32, i32, i32) {
    %c0_i32 = arith.constant 0 : i32
    %c0_i32_0 = arith.constant 0 : i32
    %c0_i32_1 = arith.constant 0 : i32
    %c0_i32_2 = arith.constant 0 : i32
    return %arg0, %c0_i32, %c0_i32_0, %c0_i32_1 : i32, i32, i32, i32
  }
  func.func @transform_1(%arg0: i32) -> (i32, i32) {
    %c0_i32 = arith.constant 0 : i32
    %c0_i32_0 = arith.constant 0 : i32
    %c0_i32_1 = arith.constant 0 : i32
    return %c0_i32, %c0_i32_0 : i32, i32
  }
  func.func @transform_2(%arg0: i32) -> (i32, i32) {
    %c0_i32 = arith.constant 0 : i32
    %c0_i32_0 = arith.constant 0 : i32
    %c0_i32_1 = arith.constant 0 : i32
    return %c0_i32, %c0_i32_0 : i32, i32
  }
  func.func @transform_3(%arg0: i32) -> (i32, i32) {
    %c0_i32 = arith.constant 0 : i32
    %c0_i32_0 = arith.constant 0 : i32
    %c0_i32_1 = arith.constant 0 : i32
    return %c0_i32, %c0_i32_0 : i32, i32
  }
  func.func @transform_4(%arg0: i32) -> (i32, i32) {
    %c0_i32 = arith.constant 0 : i32
    %c0_i32_0 = arith.constant 0 : i32
    %c0_i32_1 = arith.constant 0 : i32
    return %c0_i32, %c0_i32_0 : i32, i32
  }
  func.func @transform_5(%arg0: i32) -> (i32, i32) {
    %c0_i32 = arith.constant 0 : i32
    %c0_i32_0 = arith.constant 0 : i32
    %c0_i32_1 = arith.constant 0 : i32
    return %c0_i32, %c0_i32_0 : i32, i32
  }
  func.func @transform_6(%arg0: i32) -> (i32, i32) {
    %c0_i32 = arith.constant 0 : i32
    %c0_i32_0 = arith.constant 0 : i32
    %c0_i32_1 = arith.constant 0 : i32
    return %c0_i32, %c0_i32_0 : i32, i32
  }
  func.func @transform_7(%arg0: i32) -> (i32, i32) {
    %c0_i32 = arith.constant 0 : i32
    %c0_i32_0 = arith.constant 0 : i32
    %c0_i32_1 = arith.constant 0 : i32
    return %c0_i32, %c0_i32_0 : i32, i32
  }
  func.func @transform_8(%arg0: i32) -> (i32, i32) {
    %c0_i32 = arith.constant 0 : i32
    %c0_i32_0 = arith.constant 0 : i32
    %c0_i32_1 = arith.constant 0 : i32
    return %c0_i32, %c0_i32_0 : i32, i32
  }
  func.func @transform_9(%arg0: i32) -> (i32, i32) {
    %c0_i32 = arith.constant 0 : i32
    %c0_i32_0 = arith.constant 0 : i32
    %c0_i32_1 = arith.constant 0 : i32
    return %c0_i32, %c0_i32_0 : i32, i32
  }
  func.func @transform_10(%arg0: i32) -> (i32, i32, i32, i32) {
    %c0_i32 = arith.constant 0 : i32
    %c0_i32_0 = arith.constant 0 : i32
    %c0_i32_1 = arith.constant 0 : i32
    %c0_i32_2 = arith.constant 0 : i32
    return %arg0, %c0_i32, %c0_i32_0, %c0_i32_1 : i32, i32, i32, i32
  }
}

</mosaic_0001>

<bundles_post_ra>
// kernel: tpu_custom_call.1
= control target key start
LH: loop header
LB: loop body
LE: loop exit
PB: predicated region body
PF: predicated region fallthrough
CT: control target
= control target key end

     0   :  { %15 = vsyncpa [#allocation4], 0  ;;  %s6737_s0 = inlined_call_operand.vmem [shape: f32[2,18,18,128], index: 0, kind: input, shape index: {}]   ;;  %s6738_s1 = inlined_call_operand.vmem [shape: bf16[1152,128], index: 1, kind: input, shape index: {}]   ;;  %s6739_s2 = inlined_call_operand.vmem [shape: f32[1,128], index: 2, kind: input, shape index: {}]   ;;  %s6740_s3 = inlined_call_operand.vmem [shape: f32[1,128], index: 3, kind: input, shape index: {}]   ;;  %s6741_s4 = inlined_call_operand.vmem [shape: bf16[1152,128], index: 4, kind: input, shape index: {}]   ;;  %s6742_s5 = inlined_call_operand.vmem [shape: f32[1,128], index: 5, kind: input, shape index: {}]   ;;  %s6743_s6 = inlined_call_operand.vmem [shape: f32[1,128], index: 6, kind: input, shape index: {}]   ;;  %s6744_s7 = inlined_call_operand.vmem [shape: bf16[128,128], index: 7, kind: input, shape index: {}]   ;;  %s6745_s8 = inlined_call_operand.vmem [shape: f32[1,128], index: 8, kind: input, shape index: {}]   ;;  %s6746_s9 = inlined_call_operand.vmem [shape: f32[1,128], index: 9, kind: input, shape index: {}]   ;;  %s6747_s10 = inlined_call_operand.hbm [shape: f32[2,8,8,128], index: 10, kind: output, shape index: {}]  }
   0x1   :  { %17 = vsyncpa [#allocation4 + $0x1], 0  ;;  %s5304_s13 = smov 0   ;;  %s5306_s14 = smov 0  }
   0x2   :  { %s5308_s15 = smov 0   ;;  %s5310_s16 = smov 0  }
   0x3 LB: > { %s5325_s17 = sadd.s32 4294967295, %s5244_s16   ;;  %s4218_s18 = sadd.s32 4294967294, %s5244_s16   ;;  %s5244_s16 = sphi %s5310_s16, %s6759_s16   ;;  %s5240_s15 = sphi %s5308_s15, %s6758_s15   ;;  %s5236_s14 = sphi %s5306_s14, %s6757_s14   ;;  %s5232_s13 = sphi %s5304_s13, %s6756_s13  }
   0x4   : > { %s5329_s19 = sadd.s32 1, %s5244_s16   ;;  %s245_s20 = sadd.s32 1, %s5240_s15 }
   0x5   : > { %s242_s21 = ssub.s32 %s5244_s16, %s5329_s19  ;;  %p255_p0 = scmp.ne.s32.totalorder %s5240_s15, %s5236_s14 }
   0x6   : > { %p243_p1 = scmp.eq.s32.totalorder %s242_s21, 0  ;;  %p256_p2 = scmp.eq.s32.totalorder %s5325_s17, 1 }
   0x7   : > { %p261_p3 = scmp.ne.s32.totalorder %s5236_s14, %s5232_s13  ;;  %p262_p4 = scmp.eq.s32.totalorder %s4218_s18, 1 }
   0x8   : > { %s5340_s22 = scalar_select %p243_p1, %s5240_s15, %s245_s20  }
   0x9   : > { %p5342_p5 = por %p256_p2, %p255_p0  ;;  %p5346_p6 = por %p262_p4, %p261_p3 }
   0xa   : > { %p4221_p7 = scmp.ge.s32.totalorder %s5244_s16, 1  ;;  %p315_p8 = scmp.lt.s32.totalorder %s5244_s16, 3 }
   0xc   : > { %p316_p9 = pnand %p4221_p7, %p315_p8 }
   0xd   : > { %p353_p10 = scmp.lt.s32.totalorder (!%p316_p9), %s5325_s17, 1  ;;  %s350_s20 = sand.u32 (!%p316_p9), 1, %s5236_s14  }
   0xe   : > { %319 = sbr.rel (%p316_p9) target bundleno = 686 (0x2ae), region = 60  ;;  %s4222_s21 = sshll.u32 (!%p316_p9), %s350_s20, 6 }
   0xf   : > { %s6651_s25 = scalar_lea.vmem (!%p316_p9), [#allocation3], %s4222_s21  ;;  %s4095_s30 = scalar_lea.sflag (!%p316_p9), [#allocation4], %s350_s20 }
  0x13   : > { %v4963_v0 = vld [vmem:[%s6738_s1 + $0x38] sm:$0xff]  ;;  %v4962_v3 = vld [vmem:[%s6738_s1 + $0x30] sm:$0xff]  ;;  %s354_s26 = scalar_select %p353_p10, %s5325_s17, 1  ;;  %v4961_v6 = vld [vmem:[%s6738_s1 + $0x28] sm:$0xff]  ;;  %vm1666_vm0 = vcmask 1040384   ;;  %vm1659_vm3 = vcmask 1043459  }
  0x14   : > { %v4971_v1 = vld [vmem:[%s6738_s1 + $0x78] sm:$0xff]  ;;  %1366 = vmatpush.bf16.msra.mxu0 %v4963_v0  ;;  %5109 = vmatpush.bf16.msra.mxu3 %v4963_v0  ;;  %v4970_v4 = vld [vmem:[%s6738_s1 + $0x70] sm:$0xff]  ;;  %v4969_v7 = vld [vmem:[%s6738_s1 + $0x68] sm:$0xff]  ;;  %vm1667_vm1 = vsmask.f32 256 }
  0x15   : > { %v4979_v2 = vld [vmem:[%s6738_s1 + $0xb8] sm:$0xff]  ;;  %1395 = vmatpush.bf16.msra.mxu1 %v4971_v1  ;;  %v4978_v5 = vld [vmem:[%s6738_s1 + $0xb0] sm:$0xff]  ;;  %v4977_v8 = vld [vmem:[%s6738_s1 + $0xa8] sm:$0xff]  ;;  %s5133_s18 = smul.u32 432, %s354_s26  ;;  %vm1660_vm4 = vsmask.f32 7950 }
  0x16   : > { %1424 = vmatpush.bf16.msra.mxu2 %v4979_v2  ;;  %v4960_v9 = vld [vmem:[%s6738_s1 + $0x20] sm:$0xff]  ;;  %v4959_v12 = vld [vmem:[%s6738_s1 + $0x18] sm:$0xff]  ;;  %v4958_v16 = vld [vmem:[%s6738_s1 + $0x10] sm:$0xff]  ;;  %vm2414_vm6 = vsmask.f32 4368 }
  0x17   : > { %v4968_v10 = vld [vmem:[%s6738_s1 + $0x60] sm:$0xff]  ;;  %s5393_s26 = scalar_lea.vmem %s6737_s0, %s5133_s18  ;;  %v4967_v13 = vld [vmem:[%s6738_s1 + $0x58] sm:$0xff]  ;;  %v4966_v18 = vld [vmem:[%s6738_s1 + $0x50] sm:$0xff]  ;;  %s5202_s18 = scalar_lea.hbm %s6747_s10, 128 }
  0x18   : > { %1367 = vmatpush.bf16.msra.mxu0 %v4962_v3  ;;  %5110 = vmatpush.bf16.msra.mxu3 %v4962_v3  ;;  %v4976_v11 = vld [vmem:[%s6738_s1 + $0xa0] sm:$0xff]  ;;  %v4975_v14 = vld [vmem:[%s6738_s1 + $0x98] sm:$0xff]  ;;  %v4974_v19 = vld [vmem:[%s6738_s1 + $0x90] sm:$0xff] }
  0x19   : > { %1396 = vmatpush.bf16.msra.mxu1 %v4970_v4  ;;  %v359_v15 = vld [vmem:[%s5393_s26] ss:$2 sm:$0xff]  ;;  %v4224_v17 = vld [vmem:[%s5393_s26 + $0x30] ss:$2 sm:$0xff]  ;;  %v4231_v22 = vld [vmem:[%s5393_s26 + $0x1] ss:$2 sm:$0xff] }
  0x1a   : > { %1425 = vmatpush.bf16.msra.mxu2 %v4978_v5  ;;  %v4227_v20 = vld [vmem:[%s5393_s26 + $0xc0] ss:$2 sm:$0xff]  ;;  %v4228_v21 = vld [vmem:[%s5393_s26 + $0xf0] ss:$2 sm:$0xff]  ;;  %v4232_v23 = vld [vmem:[%s5393_s26 + $0x31] ss:$2 sm:$0xff]  ;;  %v374_v26 = vpack.c.bf16 %v359_v15, %v359_v15  ;;  %v375_v27 = vpack.c.bf16 %v4224_v17, %v4224_v17  ;;  %v398_v30 = vpack.c.bf16 %v4231_v22, %v4231_v22 }
  0x1b   : > { %v4239_v24 = vld [vmem:[%s5393_s26 + $0x2] ss:$2 sm:$0xff]  ;;  %v4240_v25 = vld [vmem:[%s5393_s26 + $0x32] ss:$2 sm:$0xff]  ;;  %v378_v28 = vpack.c.bf16 %v4227_v20, %v4227_v20  ;;  %v379_v29 = vpack.c.bf16 %v4228_v21, %v4228_v21  ;;  %v399_v32 = vpack.c.bf16 %v4232_v23, %v4232_v23  ;;  %v4233_v62 = vld [vmem:[%s5393_s26 + $0x61] ss:$2 sm:$0xff] }
  0x1c   : > { %1368 = vmatpush.bf16.msra.mxu0 %v4961_v6  ;;  %5111 = vmatpush.bf16.msra.mxu3 %v4961_v6  ;;  %v4957_v31 = vld [vmem:[%s6738_s1 + $0x8] sm:$0xff]  ;;  %v422_v33 = vpack.c.bf16 %v4239_v24, %v4239_v24  ;;  %v423_v34 = vpack.c.bf16 %v4240_v25, %v4240_v25  ;;  %v646_v37 = vunpack.c.l.b16 %v374_v26  ;;  %v655_v38 = vunpack.c.l.b16 %v375_v27  ;;  %v4956_v41 = vld [vmem:[%s6738_s1] sm:$0xff]  ;;  %v4987_v48 = vld [vmem:[%s6738_s1 + $0xf8] sm:$0xff] }
  0x1d   : > { %1397 = vmatpush.bf16.msra.mxu1 %v4969_v7  ;;  %v4965_v35 = vld [vmem:[%s6738_s1 + $0x48] sm:$0xff]  ;;  %v682_v39 = vunpack.c.l.b16 %v378_v28  ;;  %v691_v40 = vunpack.c.l.b16 %v379_v29  ;;  %v647_v42 = vunpack.c.l.b16 %v398_v30  ;;  %v656_v43 = vunpack.c.l.b16 %v399_v32  ;;  %v4964_v46 = vld [vmem:[%s6738_s1 + $0x40] sm:$0xff]  ;;  %v4995_v49 = vld [vmem:[%s6738_s1 + $0x138] sm:$0xff] }
  0x1e   : > { %1426 = vmatpush.bf16.msra.mxu2 %v4977_v8  ;;  %v4973_v36 = vld [vmem:[%s6738_s1 + $0x88] sm:$0xff]  ;;  %v648_v44 = vunpack.c.l.b16 %v422_v33  ;;  %v657_v45 = vunpack.c.l.b16 %v423_v34  ;;  %v4972_v47 = vld [vmem:[%s6738_s1 + $0x80] sm:$0xff]  ;;  %v862_v50 = vpack.c.b16 %v655_v38, %v646_v37  ;;  %v4986_v54 = vld [vmem:[%s6738_s1 + $0xf0] sm:$0xff] }
  0x1f   : > { %v880_v51 = vpack.c.b16 %v691_v40, %v682_v39  ;;  %v863_v52 = vpack.c.b16 %v656_v43, %v647_v42  ;;  %v5011_v55 = vld [vmem:[%s6738_s1 + $0x1b8] sm:$0xff]  ;;  %v4994_v56 = vld [vmem:[%s6738_s1 + $0x130] sm:$0xff]  ;;  %v4225_v57 = vld [vmem:[%s5393_s26 + $0x60] ss:$2 sm:$0xff] }
  0x20   : > { %1369 = vmatpush.bf16.msra.mxu0 %v4960_v9  ;;  %5112 = vmatpush.bf16.msra.mxu3 %v4960_v9  ;;  %v864_v53 = vpack.c.b16 %v657_v45, %v648_v44  ;;  %v4226_v58 = vld [vmem:[%s5393_s26 + $0x90] ss:$2 sm:$0xff]  ;;  %v4229_v59 = vld [vmem:[%s5393_s26 + $0x120] ss:$2 sm:$0xff]  ;;  %v4234_v63 = vld [vmem:[%s5393_s26 + $0x91] ss:$2 sm:$0xff]  ;;  %v376_v6 = vpack.c.bf16 %v4225_v57, %v4225_v57 }
  0x21   : > { %1398 = vmatpush.bf16.msra.mxu1 %v4968_v10  ;;  %v4230_v60 = vld [vmem:[%s5393_s26 + $0x150] ss:$2 sm:$0xff]  ;;  %v4985_v4 = vld [vmem:[%s6738_s1 + $0xe8] sm:$0xff]  ;;  %v377_v7 = vpack.c.bf16 %v4226_v58, %v4226_v58  ;;  %v380_v8 = vpack.c.bf16 %v4229_v59, %v4229_v59  ;;  %v400_v10 = vpack.c.bf16 %v4233_v62, %v4233_v62  ;;  %v4992_v17 = vld [vmem:[%s6738_s1 + $0x120] sm:$0xff] }
  0x22   : > { %1427 = vmatpush.bf16.msra.mxu2 %v4976_v11  ;;  %v5003_v61 = vld [vmem:[%s6738_s1 + $0x178] sm:$0xff]  ;;  %v4241_v0 = vld [vmem:[%s5393_s26 + $0x62] ss:$2 sm:$0xff]  ;;  %v381_v9 = vpack.c.bf16 %v4230_v60, %v4230_v60  ;;  %v401_v11 = vpack.c.bf16 %v4234_v63, %v4234_v63  ;;  %v4256_v44 = vld [vmem:[%s5393_s26 + $0x49] ss:$2 sm:$0xff] }
  0x23   : > { %v4242_v1 = vld [vmem:[%s5393_s26 + $0x92] ss:$2 sm:$0xff]  ;;  %v4993_v5 = vld [vmem:[%s6738_s1 + $0x128] sm:$0xff]  ;;  %v700_v20 = vunpack.c.l.b16 %v380_v8  ;;  %v665_v22 = vunpack.c.l.b16 %v400_v10  ;;  %v4236_v37 = vld [vmem:[%s5393_s26 + $0xf1] ss:$2 sm:$0xff] }
  0x24   : > { %1370 = vmatpush.bf16.msra.mxu0 %v4959_v12  ;;  %5113 = vmatpush.bf16.msra.mxu3 %v4959_v12  ;;  %v5002_v2 = vld [vmem:[%s6738_s1 + $0x170] sm:$0xff]  ;;  %v424_v12 = vpack.c.bf16 %v4241_v0, %v4241_v0  ;;  %v5009_v15 = vld [vmem:[%s6738_s1 + $0x1a8] sm:$0xff]  ;;  %v709_v21 = vunpack.c.l.b16 %v381_v9  ;;  %v674_v23 = vunpack.c.l.b16 %v401_v11  ;;  %v5000_v26 = vld [vmem:[%s6738_s1 + $0x160] sm:$0xff] }
  0x25   : > { %1399 = vmatpush.bf16.msra.mxu1 %v4967_v13  ;;  %v5010_v3 = vld [vmem:[%s6738_s1 + $0x1b0] sm:$0xff]  ;;  %v425_v13 = vpack.c.bf16 %v4242_v1, %v4242_v1  ;;  %v5008_v27 = vld [vmem:[%s6738_s1 + $0x1a0] sm:$0xff]  ;;  %v4983_v28 = vld [vmem:[%s6738_s1 + $0xd8] sm:$0xff] }
  0x26   : > { %1428 = vmatpush.bf16.msra.mxu2 %v4975_v14  ;;  %v5001_v14 = vld [vmem:[%s6738_s1 + $0x168] sm:$0xff]  ;;  %v666_v24 = vunpack.c.l.b16 %v424_v12  ;;  %v4991_v29 = vld [vmem:[%s6738_s1 + $0x118] sm:$0xff]  ;;  %v872_v32 = vpack.c.b16 %v674_v23, %v665_v22  ;;  %v4982_v34 = vld [vmem:[%s6738_s1 + $0xd0] sm:$0xff] }
  0x27   : > { %v675_v25 = vunpack.c.l.b16 %v425_v13  ;;  %v4243_v38 = vld [vmem:[%s5393_s26 + $0xc2] ss:$2 sm:$0xff]  ;;  %v4999_v40 = vld [vmem:[%s6738_s1 + $0x158] sm:$0xff]  ;;  %v4258_v22 = vld [vmem:[%s5393_s26 + $0xa9] ss:$2 sm:$0xff] }
  0x28   : > { %1371 = vmatpush.bf16.msra.mxu0 %v4958_v16  ;;  %5114 = vmatpush.bf16.msra.mxu3 %v4958_v16  ;;  %v4984_v16 = vld [vmem:[%s6738_s1 + $0xe0] sm:$0xff]  ;;  %v4248_v42 = vld [vmem:[%s5393_s26 + $0x48] ss:$2 sm:$0xff]  ;;  %vm5731_vm2 = vmand %vm1666_vm0, %vm1667_vm1 }
  0x29   : > { %1400 = vmatpush.bf16.msra.mxu1 %v4966_v18  ;;  %v664_v18 = vunpack.c.l.b16 %v376_v6  ;;  %v873_v33 = vpack.c.b16 %v675_v25, %v666_v24  ;;  %v4247_v39 = vld [vmem:[%s5393_s26 + $0x18] ss:$2 sm:$0xff]  ;;  %v4255_v43 = vld [vmem:[%s5393_s26 + $0x19] ss:$2 sm:$0xff]  ;;  %v4997_v58 = vld [vmem:[%s6738_s1 + $0x148] sm:$0xff] }
  0x2a   : > { %1429 = vmatpush.bf16.msra.mxu2 %v4974_v19  ;;  %v673_v19 = vunpack.c.l.b16 %v377_v7  ;;  %v4244_v45 = vld [vmem:[%s5393_s26 + $0xf2] ss:$2 sm:$0xff]  ;;  %v5005_v59 = vld [vmem:[%s6738_s1 + $0x188] sm:$0xff]  ;;  %vm5769_vm5 = vmand %vm1659_vm3, %vm1660_vm4 }
  0x2b   : > { %v427_v57 = vpack.c.bf16 %v4244_v45, %v4244_v45  ;;  %v4980_v60 = vld [vmem:[%s6738_s1 + $0xc0] sm:$0xff]  ;;  %v5017_v24 = vld [vmem:[%s6738_s1 + $0x1e8] sm:$0xff]  ;;  %v5023_v45 = vld [vmem:[%s6738_s1 + $0x218] sm:$0xff] }
  0x2c   : > { %1372 = vmatpush.bf16.msra.mxu0 %v4957_v31  ;;  %5115 = vmatpush.bf16.msra.mxu3 %v4957_v31  ;;  %v871_v30 = vpack.c.b16 %v673_v19, %v664_v18  ;;  %v889_v31 = vpack.c.b16 %v709_v21, %v700_v20  ;;  %v4996_v8 = vld [vmem:[%s6738_s1 + $0x140] sm:$0xff]  ;;  %v4250_v20 = vld [vmem:[%s5393_s26 + $0xa8] ss:$2 sm:$0xff]  ;;  %vm5971_vm7 = vmor %vm1667_vm1, %vm2414_vm6 }
  0x2d   : > { %1401 = vmatpush.bf16.msra.mxu1 %v4965_v35  ;;  %v4990_v35 = vld [vmem:[%s6738_s1 + $0x110] sm:$0xff]  ;;  %v693_v7 = vunpack.c.l.b16 %v427_v57  ;;  %v5004_v9 = vld [vmem:[%s6738_s1 + $0x180] sm:$0xff]  ;;  %v5025_v25 = vld [vmem:[%s6738_s1 + $0x228] sm:$0xff] }
  0x2e   : > { %1430 = vmatpush.bf16.msra.mxu2 %v4973_v36  ;;  %v4235_v36 = vld [vmem:[%s5393_s26 + $0xc1] ss:$2 sm:$0xff]  ;;  %v4245_v18 = vld [vmem:[%s5393_s26 + $0x122] ss:$2 sm:$0xff]  ;;  %v4246_v23 = vld [vmem:[%s5393_s26 + $0x152] ss:$2 sm:$0xff] }
  0x2f   : > { %v4249_v19 = vld [vmem:[%s5393_s26 + $0x78] ss:$2 sm:$0xff]  ;;  %v4257_v21 = vld [vmem:[%s5393_s26 + $0x79] ss:$2 sm:$0xff]  ;;  %v5022_v57 = vld [vmem:[%s6738_s1 + $0x210] sm:$0xff] }
  0x30   : > { %1373 = vmatpush.bf16.msra.mxu0 %v4956_v41  ;;  %5116 = vmatpush.bf16.msra.mxu3 %v4956_v41  ;;  %v5007_v41 = vld [vmem:[%s6738_s1 + $0x198] sm:$0xff] }
  0x31   : > { %1402 = vmatpush.bf16.msra.mxu1 %v4964_v46  ;;  %v4998_v46 = vld [vmem:[%s6738_s1 + $0x150] sm:$0xff] }
  0x32   : > { %1431 = vmatpush.bf16.msra.mxu2 %v4972_v47  ;;  %v5006_v47 = vld [vmem:[%s6738_s1 + $0x190] sm:$0xff] }
  0x33   : > { %1374 = vmatmul.bf16.vlgmr.msra.gmra.mxu0 %v862_v50  ;;  %1384 = vmatmul.bf16.vlgmr.msra.gmra.mxu3 %v880_v51  ;;  %v446_v50 = vpack.c.bf16 %v4247_v39, %v4247_v39  ;;  %v447_v51 = vpack.c.bf16 %v4248_v42, %v4248_v42 }
  0x34   : > { %1453 = vmatpush.bf16.msrb.mxu3 %v4987_v48  ;;  %1482 = vmatpush.bf16.msrb.mxu0 %v4995_v49  ;;  %v4981_v48 = vld [vmem:[%s6738_s1 + $0xc8] sm:$0xff] }
  0x35   : > { %1403 = vmatmul.bf16.vlgmr.msra.gmra.mxu1 %v863_v52  ;;  %1432 = vmatmul.bf16.vlgmr.msra.gmra.mxu2 %v864_v53  ;;  %v4989_v49 = vld [vmem:[%s6738_s1 + $0x108] sm:$0xff]  ;;  %v470_v52 = vpack.c.bf16 %v4255_v43, %v4255_v43  ;;  %v471_v53 = vpack.c.bf16 %v4256_v44, %v4256_v44  ;;  %v649_v62 = vunpack.c.l.b16 %v446_v50  ;;  %v658_v63 = vunpack.c.l.b16 %v447_v51  ;;  %v5015_v44 = vld [vmem:[%s6738_s1 + $0x1d8] sm:$0xff]  ;;  %v5014_v50 = vld [vmem:[%s6738_s1 + $0x1d0] sm:$0xff] }
  0x36   : > { %1540 = vmatpush.bf16.msrb.mxu2 %v5011_v55  ;;  %1511 = vmatpush.bf16.msrb.mxu1 %v5003_v61  ;;  %v403_v55 = vpack.c.bf16 %v4236_v37, %v4236_v37  ;;  %v4988_v61 = vld [vmem:[%s6738_s1 + $0x100] sm:$0xff] }
  0x37   : > { %v650_v0 = vunpack.c.l.b16 %v470_v52  ;;  %v659_v1 = vunpack.c.l.b16 %v471_v53  ;;  %v865_v10 = vpack.c.b16 %v658_v63, %v649_v62  ;;  %v4251_v51 = vld [vmem:[%s5393_s26 + $0xd8] ss:$2 sm:$0xff]  ;;  %v4252_v52 = vld [vmem:[%s5393_s26 + $0x108] ss:$2 sm:$0xff]  ;;  %v4259_v53 = vld [vmem:[%s5393_s26 + $0xd9] ss:$2 sm:$0xff] }
  0x38   : > { %1454 = vmatpush.bf16.msrb.mxu3 %v4986_v54  ;;  %1483 = vmatpush.bf16.msrb.mxu0 %v4994_v56  ;;  %v402_v54 = vpack.c.bf16 %v4235_v36, %v4235_v36  ;;  %v426_v56 = vpack.c.bf16 %v4243_v38, %v4243_v38  ;;  %v450_v62 = vpack.c.bf16 %v4251_v51, %v4251_v51  ;;  %v4287_v51 = vld [vmem:[%s5393_s26 + $0x32] ss:$2 sm:$0xff] }
  0x39   : > { %v866_v11 = vpack.c.b16 %v659_v1, %v650_v0  ;;  %v451_v63 = vpack.c.bf16 %v4252_v52, %v4252_v52  ;;  %v474_v0 = vpack.c.bf16 %v4259_v53, %v4259_v53  ;;  %v4288_v52 = vld [vmem:[%s5393_s26 + $0x62] ss:$2 sm:$0xff] }
  0x3a   : > { %1512 = vmatpush.bf16.msrb.mxu1 %v5002_v2  ;;  %1541 = vmatpush.bf16.msrb.mxu2 %v5010_v3  ;;  %v5019_v2 = vld [vmem:[%s6738_s1 + $0x1f8] sm:$0xff]  ;;  %v684_v6 = vunpack.c.l.b16 %v426_v56 }
  0x3b   : > { %v5027_v3 = vld [vmem:[%s6738_s1 + $0x238] sm:$0xff] }
  0x3c   : > { %1455 = vmatpush.bf16.msrb.mxu3 %v4985_v4  ;;  %1484 = vmatpush.bf16.msrb.mxu0 %v4993_v5  ;;  %v683_v4 = vunpack.c.l.b16 %v402_v54  ;;  %v692_v5 = vunpack.c.l.b16 %v403_v55  ;;  %v882_v13 = vpack.c.b16 %v693_v7, %v684_v6  ;;  %v4260_v54 = vld [vmem:[%s5393_s26 + $0x109] ss:$2 sm:$0xff]  ;;  %v4263_v55 = vld [vmem:[%s5393_s26 + $0x1a] ss:$2 sm:$0xff]  ;;  %v4264_v56 = vld [vmem:[%s5393_s26 + $0x4a] ss:$2 sm:$0xff] }
  0x3d   : > { %v475_v1 = vpack.c.bf16 %v4260_v54, %v4260_v54  ;;  %v5012_v6 = vld [vmem:[%s6738_s1 + $0x1c0] sm:$0xff]  ;;  %v4268_v53 = vld [vmem:[%s5393_s26 + $0x10a] ss:$2 sm:$0xff] }
  0x3e   : > { %1513 = vmatpush.bf16.msrb.mxu1 %v5001_v14  ;;  %1542 = vmatpush.bf16.msrb.mxu2 %v5009_v15  ;;  %v881_v12 = vpack.c.b16 %v692_v5, %v683_v4  ;;  %v5018_v14 = vld [vmem:[%s6738_s1 + $0x1f0] sm:$0xff]  ;;  %v5020_v7 = vld [vmem:[%s6738_s1 + $0x200] sm:$0xff] }
  0x3f   : > { %v5026_v15 = vld [vmem:[%s6738_s1 + $0x230] sm:$0xff] }
  0x40   : > { %1456 = vmatpush.bf16.msrb.mxu3 %v4984_v16  ;;  %1485 = vmatpush.bf16.msrb.mxu0 %v4992_v17  ;;  %v4237_v16 = vld [vmem:[%s5393_s26 + $0x121] ss:$2 sm:$0xff]  ;;  %v4238_v17 = vld [vmem:[%s5393_s26 + $0x151] ss:$2 sm:$0xff]  ;;  %v4275_v54 = vld [vmem:[%s5393_s26 + $0xf0] ss:$2 sm:$0xff] }
  0x42   : > { %1514 = vmatpush.bf16.msrb.mxu1 %v5000_v26  ;;  %1543 = vmatpush.bf16.msrb.mxu2 %v5008_v27  ;;  %v448_v26 = vpack.c.bf16 %v4249_v19, %v4249_v19  ;;  %v449_v27 = vpack.c.bf16 %v4250_v20, %v4250_v20  ;;  %v4253_v20 = vld [vmem:[%s5393_s26 + $0x138] ss:$2 sm:$0xff] }
  0x43   : > { %1379 = vmatmul.bf16.gmra.mxu0 %v871_v30  ;;  %1389 = vmatmul.bf16.gmra.mxu3 %v889_v31  ;;  %v404_v30 = vpack.c.bf16 %v4237_v16, %v4237_v16  ;;  %v405_v31 = vpack.c.bf16 %v4238_v17, %v4238_v17 }
  0x44   : > { %1457 = vmatpush.bf16.msrb.mxu3 %v4983_v28  ;;  %1486 = vmatpush.bf16.msrb.mxu0 %v4991_v29  ;;  %v472_v28 = vpack.c.bf16 %v4257_v21, %v4257_v21  ;;  %v473_v29 = vpack.c.bf16 %v4258_v22, %v4258_v22  ;;  %v667_v36 = vunpack.c.l.b16 %v448_v26  ;;  %v676_v37 = vunpack.c.l.b16 %v449_v27  ;;  %v4254_v21 = vld [vmem:[%s5393_s26 + $0x168] ss:$2 sm:$0xff]  ;;  %v4261_v22 = vld [vmem:[%s5393_s26 + $0x139] ss:$2 sm:$0xff] }
  0x45   : > { %1408 = vmatmul.bf16.gmra.mxu1 %v872_v32  ;;  %1437 = vmatmul.bf16.gmra.mxu2 %v873_v33  ;;  %v428_v32 = vpack.c.bf16 %v4245_v18, %v4245_v18  ;;  %v429_v33 = vpack.c.bf16 %v4246_v23, %v4246_v23  ;;  %v4262_v23 = vld [vmem:[%s5393_s26 + $0x169] ss:$2 sm:$0xff]  ;;  %v4273_v26 = vld [vmem:[%s5393_s26 + $0x90] ss:$2 sm:$0xff]  ;;  %v4274_v27 = vld [vmem:[%s5393_s26 + $0xc0] ss:$2 sm:$0xff] }
  0x46   : > { %1515 = vmatpush.bf16.msrb.mxu1 %v4999_v40  ;;  %1544 = vmatpush.bf16.msrb.mxu2 %v5007_v41  ;;  %v668_v38 = vunpack.c.l.b16 %v472_v28  ;;  %v677_v39 = vunpack.c.l.b16 %v473_v29  ;;  %v701_v40 = vunpack.c.l.b16 %v404_v30  ;;  %v710_v41 = vunpack.c.l.b16 %v405_v31 }
  0x47   : > { %v702_v42 = vunpack.c.l.b16 %v428_v32  ;;  %v711_v43 = vunpack.c.l.b16 %v429_v33  ;;  %v452_v28 = vpack.c.bf16 %v4253_v20, %v4253_v20  ;;  %v453_v29 = vpack.c.bf16 %v4254_v21, %v4254_v21 }
  0x48   : > { %1458 = vmatpush.bf16.msrb.mxu3 %v4982_v34  ;;  %1487 = vmatpush.bf16.msrb.mxu0 %v4990_v35  ;;  %v5016_v34 = vld [vmem:[%s6738_s1 + $0x1e0] sm:$0xff]  ;;  %v476_v30 = vpack.c.bf16 %v4261_v22, %v4261_v22  ;;  %v477_v31 = vpack.c.bf16 %v4262_v23, %v4262_v23 }
  0x49   : > { %v5024_v35 = vld [vmem:[%s6738_s1 + $0x220] sm:$0xff] }
  0x4a   : > { %1516 = vmatpush.bf16.msrb.mxu1 %v4998_v46  ;;  %1545 = vmatpush.bf16.msrb.mxu2 %v5006_v47  ;;  %v874_v46 = vpack.c.b16 %v676_v37, %v667_v36  ;;  %v875_v47 = vpack.c.b16 %v677_v39, %v668_v38  ;;  %v703_v36 = vunpack.c.l.b16 %v452_v28  ;;  %v712_v37 = vunpack.c.l.b16 %v453_v29 }
  0x4b   : > { %v704_v38 = vunpack.c.l.b16 %v476_v30  ;;  %v713_v39 = vunpack.c.l.b16 %v477_v31 }
  0x4c   : > { %1459 = vmatpush.bf16.msrb.mxu3 %v4981_v48  ;;  %1488 = vmatpush.bf16.msrb.mxu0 %v4989_v49  ;;  %v890_v48 = vpack.c.b16 %v710_v41, %v701_v40  ;;  %v891_v49 = vpack.c.b16 %v711_v43, %v702_v42 }
  0x4e   : > { %1517 = vmatpush.bf16.msrb.mxu1 %v4997_v58  ;;  %1546 = vmatpush.bf16.msrb.mxu2 %v5005_v59  ;;  %v4271_v58 = vld [vmem:[%s5393_s26 + $0x30] ss:$2 sm:$0xff]  ;;  %v4272_v59 = vld [vmem:[%s5393_s26 + $0x60] ss:$2 sm:$0xff] }
  0x4f   : > { %v518_v4 = vpack.c.bf16 %v4271_v58, %v4271_v58  ;;  %v519_v5 = vpack.c.bf16 %v4272_v59, %v4272_v59  ;;  %v566_v58 = vpack.c.bf16 %v4287_v51, %v4287_v51  ;;  %v567_v59 = vpack.c.bf16 %v4288_v52, %v4288_v52 }
  0x50   : > { %1460 = vmatpush.bf16.msrb.mxu3 %v4980_v60  ;;  %1489 = vmatpush.bf16.msrb.mxu0 %v4988_v61  ;;  %v5013_v60 = vld [vmem:[%s6738_s1 + $0x1c8] sm:$0xff] }
  0x51   : > { %v5021_v61 = vld [vmem:[%s6738_s1 + $0x208] sm:$0xff] }
  0x52   : > { %1518 = vmatpush.bf16.msrb.mxu1 %v4996_v8  ;;  %1547 = vmatpush.bf16.msrb.mxu2 %v5004_v9  ;;  %v685_v8 = vunpack.c.l.b16 %v450_v62  ;;  %v694_v9 = vunpack.c.l.b16 %v451_v63  ;;  %v522_v62 = vpack.c.bf16 %v4275_v54, %v4275_v54 }
  0x53   : > { %1461 = vmatmul.bf16.vlgmr.msrb.gmra.mxu3 %v865_v10  ;;  %1490 = vmatmul.bf16.vlgmr.msrb.gmra.mxu0 %v866_v11  ;;  %v686_v10 = vunpack.c.l.b16 %v474_v0  ;;  %v695_v11 = vunpack.c.l.b16 %v475_v1 }
  0x54   : > { %1569 = vmatpush.bf16.msra.mxu3 %v5019_v2  ;;  %1598 = vmatpush.bf16.msra.mxu0 %v5027_v3  ;;  %v494_v2 = vpack.c.bf16 %v4263_v55, %v4263_v55  ;;  %v495_v3 = vpack.c.bf16 %v4264_v56, %v4264_v56  ;;  %v883_v16 = vpack.c.b16 %v694_v9, %v685_v8  ;;  %v4276_v55 = vld [vmem:[%s5393_s26 + $0x120] ss:$2 sm:$0xff] }
  0x55   : > { %1413 = vmatmul.bf16.gmra.mxu1 %v881_v12  ;;  %1442 = vmatmul.bf16.gmra.mxu2 %v882_v13  ;;  %v884_v17 = vpack.c.b16 %v695_v11, %v686_v10  ;;  %v523_v63 = vpack.c.bf16 %v4276_v55, %v4276_v55 }
  0x56   : > { %v651_v12 = vunpack.c.l.b16 %v494_v2  ;;  %v660_v13 = vunpack.c.l.b16 %v495_v3  ;;  %v654_v2 = vunpack.c.l.b16 %v566_v58  ;;  %v663_v3 = vunpack.c.l.b16 %v567_v59  ;;  %v4293_v58 = vld [vmem:[%s5393_s26 + $0x152] ss:$2 sm:$0xff]  ;;  %v4294_v59 = vld [vmem:[%s5393_s26 + $0x182] ss:$2 sm:$0xff] }
  0x58   : > { %1570 = vmatpush.bf16.msra.mxu3 %v5018_v14  ;;  %1599 = vmatpush.bf16.msra.mxu0 %v5026_v15  ;;  %v652_v14 = vunpack.c.l.b16 %v518_v4  ;;  %v661_v15 = vunpack.c.l.b16 %v519_v5  ;;  %v867_v18 = vpack.c.b16 %v660_v13, %v651_v12  ;;  %v870_v9 = vpack.c.b16 %v663_v3, %v654_v2  ;;  %v4269_v12 = vld [vmem:[%s5393_s26 + $0x13a] ss:$2 sm:$0xff]  ;;  %v4281_v13 = vld [vmem:[%s5393_s26 + $0x91] ss:$2 sm:$0xff] }
  0x59   : > { %v544_v20 = vpack.c.bf16 %v4281_v13, %v4281_v13 }
  0x5a   : > { %v868_v19 = vpack.c.b16 %v661_v15, %v652_v14  ;;  %v4282_v14 = vld [vmem:[%s5393_s26 + $0xc1] ss:$2 sm:$0xff]  ;;  %v4289_v15 = vld [vmem:[%s5393_s26 + $0x92] ss:$2 sm:$0xff] }
  0x5b   : > { %v545_v21 = vpack.c.bf16 %v4282_v14, %v4282_v14  ;;  %v568_v22 = vpack.c.bf16 %v4289_v15, %v4289_v15  ;;  %v671_v28 = vunpack.c.l.b16 %v544_v20 }
  0x5c   : > { %1571 = vmatpush.bf16.msra.mxu3 %v5017_v24  ;;  %1600 = vmatpush.bf16.msra.mxu0 %v5025_v25  ;;  %v4265_v24 = vld [vmem:[%s5393_s26 + $0x7a] ss:$2 sm:$0xff]  ;;  %v4266_v25 = vld [vmem:[%s5393_s26 + $0xaa] ss:$2 sm:$0xff] }
  0x5d   : > { %v496_v32 = vpack.c.bf16 %v4265_v24, %v4265_v24  ;;  %v497_v33 = vpack.c.bf16 %v4266_v25, %v4266_v25  ;;  %v500_v24 = vpack.c.bf16 %v4269_v12, %v4269_v12  ;;  %v680_v29 = vunpack.c.l.b16 %v545_v21 }
  0x5e   : > { %v672_v30 = vunpack.c.l.b16 %v568_v22 }
  0x5f   : > { %v669_v40 = vunpack.c.l.b16 %v496_v32  ;;  %v678_v41 = vunpack.c.l.b16 %v497_v33  ;;  %v705_v32 = vunpack.c.l.b16 %v500_v24 }
  0x60   : > { %1572 = vmatpush.bf16.msra.mxu3 %v5016_v34  ;;  %1601 = vmatpush.bf16.msra.mxu0 %v5024_v35  ;;  %v520_v34 = vpack.c.bf16 %v4273_v26, %v4273_v26  ;;  %v521_v35 = vpack.c.bf16 %v4274_v27, %v4274_v27 }
  0x62   : > { %v670_v42 = vunpack.c.l.b16 %v520_v34  ;;  %v679_v43 = vunpack.c.l.b16 %v521_v35 }
  0x63   : > { %1466 = vmatmul.bf16.gmra.mxu3 %v874_v46  ;;  %1495 = vmatmul.bf16.gmra.mxu0 %v875_v47  ;;  %v876_v46 = vpack.c.b16 %v678_v41, %v669_v40  ;;  %v4283_v40 = vld [vmem:[%s5393_s26 + $0xf1] ss:$2 sm:$0xff]  ;;  %v4284_v41 = vld [vmem:[%s5393_s26 + $0x121] ss:$2 sm:$0xff] }
  0x64   : > { %1573 = vmatpush.bf16.msra.mxu3 %v5015_v44  ;;  %1602 = vmatpush.bf16.msra.mxu0 %v5023_v45  ;;  %v892_v44 = vpack.c.b16 %v712_v37, %v703_v36  ;;  %v893_v45 = vpack.c.b16 %v713_v39, %v704_v38  ;;  %v877_v47 = vpack.c.b16 %v679_v43, %v670_v42  ;;  %v4291_v42 = vld [vmem:[%s5393_s26 + $0xf2] ss:$2 sm:$0xff]  ;;  %v4292_v43 = vld [vmem:[%s5393_s26 + $0x122] ss:$2 sm:$0xff] }
  0x65   : > { %1418 = vmatmul.bf16.gmra.mxu1 %v890_v48  ;;  %1447 = vmatmul.bf16.gmra.mxu2 %v891_v49  ;;  %v4267_v48 = vld [vmem:[%s5393_s26 + $0xda] ss:$2 sm:$0xff]  ;;  %v4279_v49 = vld [vmem:[%s5393_s26 + $0x31] ss:$2 sm:$0xff]  ;;  %v878_v36 = vpack.c.b16 %v680_v29, %v671_v28 }
  0x66   : > { %v542_v56 = vpack.c.bf16 %v4279_v49, %v4279_v49 }
  0x68   : > { %1574 = vmatpush.bf16.msra.mxu3 %v5014_v50  ;;  %1603 = vmatpush.bf16.msra.mxu0 %v5022_v57  ;;  %v4280_v50 = vld [vmem:[%s5393_s26 + $0x61] ss:$2 sm:$0xff]  ;;  %v653_v0 = vunpack.c.l.b16 %v542_v56  ;;  %v4285_v56 = vld [vmem:[%s5393_s26 + $0x151] ss:$2 sm:$0xff] }
  0x69   : > { %v543_v57 = vpack.c.bf16 %v4280_v50, %v4280_v50 }
  0x6b   : > { %v662_v1 = vunpack.c.l.b16 %v543_v57  ;;  %v4286_v57 = vld [vmem:[%s5393_s26 + $0x181] ss:$2 sm:$0xff] }
  0x6c   : > { %1575 = vmatpush.bf16.msra.mxu3 %v5013_v60  ;;  %1604 = vmatpush.bf16.msra.mxu0 %v5021_v61  ;;  %v498_v60 = vpack.c.bf16 %v4267_v48, %v4267_v48  ;;  %v499_v61 = vpack.c.bf16 %v4268_v53, %v4268_v53 }
  0x6d   : > { %v869_v8 = vpack.c.b16 %v662_v1, %v653_v0  ;;  %v572_v0 = vpack.c.bf16 %v4293_v58, %v4293_v58  ;;  %v573_v1 = vpack.c.bf16 %v4294_v59, %v4294_v59  ;;  %v5051_v59 = vld [vmem:[%s6741_s4 + $0xb8] sm:$0xff] }
  0x6e   : > { %v687_v4 = vunpack.c.l.b16 %v498_v60  ;;  %v696_v5 = vunpack.c.l.b16 %v499_v61 }
  0x70   : > { %1576 = vmatpush.bf16.msra.mxu3 %v5012_v6  ;;  %1605 = vmatpush.bf16.msra.mxu0 %v5020_v7  ;;  %v688_v6 = vunpack.c.l.b16 %v522_v62  ;;  %v697_v7 = vunpack.c.l.b16 %v523_v63  ;;  %v885_v10 = vpack.c.b16 %v696_v5, %v687_v4  ;;  %v548_v62 = vpack.c.bf16 %v4285_v56, %v4285_v56 }
  0x71   : > { %v549_v63 = vpack.c.bf16 %v4286_v57, %v4286_v57 }
  0x72   : > { %v886_v11 = vpack.c.b16 %v697_v7, %v688_v6  ;;  %v707_v4 = vunpack.c.l.b16 %v548_v62  ;;  %v708_v6 = vunpack.c.l.b16 %v572_v0  ;;  %v717_v7 = vunpack.c.l.b16 %v573_v1  ;;  %v5059_v62 = vld [vmem:[%s6741_s4 + $0xf8] sm:$0xff]  ;;  %v5033_v0 = vld [vmem:[%s6741_s4 + $0x28] sm:$0xff]  ;;  %v5040_v1 = vld [vmem:[%s6741_s4 + $0x60] sm:$0xff] }
  0x73   : > { %1471 = vmatmul.bf16.gmra.mxu3 %v883_v16  ;;  %1500 = vmatmul.bf16.gmra.mxu0 %v884_v17  ;;  %v4290_v16 = vld [vmem:[%s5393_s26 + $0xc2] ss:$2 sm:$0xff]  ;;  %v716_v5 = vunpack.c.l.b16 %v549_v63  ;;  %v1713_v63 = vld [vmem:[#allocation2 + $0x1c] sm:$0x1] }
  0x74   : > { %v4270_v17 = vld [vmem:[%s5393_s26 + $0x16a] ss:$2 sm:$0xff]  ;;  %v569_v23 = vpack.c.bf16 %v4290_v16, %v4290_v16  ;;  %3714 = vmatpush.bf16.msrb.mxu3 %v5051_v59  ;;  %3743 = vmatpush.bf16.msrb.mxu0 %v5059_v62  ;;  %v5032_v62 = vld [vmem:[%s6741_s4 + $0x20] sm:$0xff] }
  0x75   : > { %1519 = vmatmul.bf16.vlgmr.msrb.gmra.mxu1 %v867_v18  ;;  %1548 = vmatmul.bf16.vlgmr.msrb.gmra.mxu2 %v868_v19  ;;  %v4277_v18 = vld [vmem:[%s5393_s26 + $0x150] ss:$2 sm:$0xff]  ;;  %v4278_v19 = vld [vmem:[%s5393_s26 + $0x180] ss:$2 sm:$0xff]  ;;  %v501_v25 = vpack.c.bf16 %v4270_v17, %v4270_v17 }
  0x76   : > { %v524_v26 = vpack.c.bf16 %v4277_v18, %v4277_v18  ;;  %v525_v27 = vpack.c.bf16 %v4278_v19, %v4278_v19  ;;  %v681_v31 = vunpack.c.l.b16 %v569_v23 }
  0x77   : > { %v714_v33 = vunpack.c.l.b16 %v501_v25 }
  0x78   : > { %v706_v34 = vunpack.c.l.b16 %v524_v26  ;;  %v715_v35 = vunpack.c.l.b16 %v525_v27  ;;  %v879_v37 = vpack.c.b16 %v681_v31, %v672_v30  ;;  %v5043_v30 = vld [vmem:[%s6741_s4 + $0x78] sm:$0xff] }
  0x79   : > { %v894_v38 = vpack.c.b16 %v714_v33, %v705_v32  ;;  %3685 = vmatpush.bf16.msra.mxu2 %v5043_v30  ;;  %v5058_v30 = vld [vmem:[%s6741_s4 + $0xf0] sm:$0xff] }
  0x7a   : > { %v895_v39 = vpack.c.b16 %v715_v35, %v706_v34  ;;  %v5035_v35 = vld [vmem:[%s6741_s4 + $0x38] sm:$0xff]  ;;  %3744 = vmatpush.bf16.msrb.mxu0 %v5058_v30 }
  0x7b   : > { %3656 = vmatpush.bf16.msra.mxu1 %v5035_v35 }
  0x83   : > { %1476 = vmatmul.bf16.gmra.mxu3 %v892_v44  ;;  %1505 = vmatmul.bf16.gmra.mxu0 %v893_v45  ;;  %v546_v44 = vpack.c.bf16 %v4283_v40, %v4283_v40  ;;  %v547_v45 = vpack.c.bf16 %v4284_v41, %v4284_v41  ;;  %v5034_v41 = vld [vmem:[%s6741_s4 + $0x30] sm:$0xff] }
  0x84   : > { %3657 = vmatpush.bf16.msra.mxu1 %v5034_v41  ;;  %v1662_v41 = vld [vmem:[#allocation2 + $0x4] sm:$0x8] }
  0x85   : > { %1524 = vmatmul.bf16.gmra.mxu1 %v876_v46  ;;  %1553 = vmatmul.bf16.gmra.mxu2 %v877_v47  ;;  %v570_v46 = vpack.c.bf16 %v4291_v42, %v4291_v42  ;;  %v571_v47 = vpack.c.bf16 %v4292_v43, %v4292_v43  ;;  %v689_v48 = vunpack.c.l.b16 %v546_v44  ;;  %v698_v49 = vunpack.c.l.b16 %v547_v45  ;;  %v5041_v42 = vld [vmem:[%s6741_s4 + $0x68] sm:$0xff] }
  0x86   : > { %v1669_v44 = vld [vmem:[#allocation2 + $0xc] sm:$0x1] }
  0x87   : > { %v690_v50 = vunpack.c.l.b16 %v570_v46  ;;  %v699_v51 = vunpack.c.l.b16 %v571_v47  ;;  %v887_v52 = vpack.c.b16 %v698_v49, %v689_v48  ;;  %v1670_v45 = vsel %vm5731_vm2, 0, %v1669_v44  ;;  %v1686_v44 = vld [vmem:[#allocation2 + $0x24] sm:$0x8] }
  0x88   : > { %1671 = vst [vmem:[#allocation2 + $0xc] sm:$0x1] %v1670_v45  ;;  %3658 = vmatpush.bf16.msra.mxu1 %v5033_v0  ;;  %v1663_v45 = vsel %vm5769_vm5, 0, %v1662_v41  ;;  %v1716_v0 = vld [vmem:[#allocation2 + $0x2c] sm:$0x1] }
  0x89   : > { %v888_v53 = vpack.c.b16 %v699_v51, %v690_v50  ;;  %1664 = vst [vmem:[#allocation2 + $0x4] sm:$0x8] %v1663_v45 }
  0x8c   : > { %3659 = vmatpush.bf16.msra.mxu1 %v5032_v62 }
  0x8f   : > { %v1710_v50 = vld [vmem:[#allocation2 + $0xc] sm:$0x1] }
  0x90   : > { %v1711_v51 = vsel %vm5731_vm2, 0, %v1710_v50  ;;  %v1680_v45 = vld [vmem:[#allocation2 + $0x4] sm:$0x8] }
  0x91   : > { %1712 = vst [vmem:[#allocation2 + $0xc] sm:$0x1] %v1711_v51  ;;  %v1687_v51 = vsel %vm5769_vm5, 0, %v1686_v44 }
  0x92   : > { %1688 = vst [vmem:[#allocation2 + $0x24] sm:$0x8] %v1687_v51 }
  0x93   : > { %1577 = vmatmul.bf16.vlgmr.msra.gmra.mxu3 %v869_v8  ;;  %1606 = vmatmul.bf16.vlgmr.msra.gmra.mxu0 %v870_v9 }
  0x95   : > { %1529 = vmatmul.bf16.gmra.mxu1 %v885_v10  ;;  %1558 = vmatmul.bf16.gmra.mxu2 %v886_v11  ;;  %v896_v10 = vpack.c.b16 %v716_v5, %v707_v4  ;;  %v897_v11 = vpack.c.b16 %v717_v7, %v708_v6  ;;  %v1714_v4 = vsel %vm5731_vm2, 0, %v1713_v63  ;;  %v1683_v6 = vld [vmem:[#allocation2 + $0x14] sm:$0x8]  ;;  %v5039_v63 = vld [vmem:[%s6741_s4 + $0x58] sm:$0xff]  ;;  %v5092_v5 = vld [vmem:[%s6741_s4 + $0x200] sm:$0xff] }
  0x96   : > { %1715 = vst [vmem:[#allocation2 + $0x1c] sm:$0x1] %v1714_v4  ;;  %v1684_v7 = vsel %vm5769_vm5, 0, %v1683_v6 }
  0x97   : > { %1685 = vst [vmem:[#allocation2 + $0x14] sm:$0x8] %v1684_v7  ;;  %v5048_v7 = vld [vmem:[%s6741_s4 + $0xa0] sm:$0xff] }
  0xa3   : > { %1582 = vmatmul.bf16.gmra.mxu3 %v878_v36  ;;  %1611 = vmatmul.bf16.gmra.mxu0 %v879_v37  ;;  %v5042_v36 = vld [vmem:[%s6741_s4 + $0x70] sm:$0xff] }
  0xa4   : > { %3686 = vmatpush.bf16.msra.mxu2 %v5042_v36 }
  0xa5   : > { %1534 = vmatmul.bf16.gmra.mxu1 %v894_v38  ;;  %1563 = vmatmul.bf16.gmra.mxu2 %v895_v39 }
  0xa8   : > { %3687 = vmatpush.bf16.msra.mxu2 %v5041_v42 }
  0xac   : > { %3688 = vmatpush.bf16.msra.mxu2 %v5040_v1 }
  0xb0   : > { %v5643_v54 = vpop.f32.mrf.mxu0  ;;  %3689 = vmatpush.bf16.msra.mxu2 %v5039_v63  ;;  %v5047_v63 = vld [vmem:[%s6741_s4 + $0x98] sm:$0xff] }
  0xb2   : > { %v5645_v55 = vpop.f32.mrf.mxu1 }
  0xb3   : > { %1587 = vmatmul.bf16.gmra.mxu3 %v887_v52  ;;  %1616 = vmatmul.bf16.gmra.mxu0 %v888_v53  ;;  %v5246_v53 = vmov 0   ;;  %v1405_v35 = vadd.f32 %v5645_v55, %v5643_v54  ;;  %v5049_v54 = vld [vmem:[%s6741_s4 + $0xa8] sm:$0xff] }
  0xb4   : > { %1665 = vst [vmem:[#allocation2 + $0x8] sm:$0xf] %v5246_v53  ;;  %v5057_v55 = vld [vmem:[%s6741_s4 + $0xe8] sm:$0xff] }
  0xb5   : > { %1676 = vst [vmem:[#allocation2 + $0x98] sm:$0xf] %v5246_v53  ;;  %3745 = vmatpush.bf16.msrb.mxu0 %v5057_v55  ;;  %v1681_v55 = vsel %vm5769_vm5, 0, %v1680_v45 }
  0xb6   : > { %v5651_v60 = vpop.f32.mrf.mxu3  ;;  %1682 = vst [vmem:[#allocation2 + $0x4] sm:$0x8] %v1681_v55  ;;  %v5054_v55 = vld [vmem:[%s6741_s4 + $0xd0] sm:$0xff] }
  0xb8   : > { %v5653_v61 = vpop.f32.mrf.mxu2  ;;  %v5655_v2 = vpop.f32.mrf.mxu0 }
  0xb9   : > { %v1434_v59 = vadd.f32 %v5653_v61, %v1405_v35  ;;  %v1717_v61 = vsel %vm5731_vm2, 0, %v1716_v0  ;;  %v5031_v0 = vld [vmem:[%s6741_s4 + $0x18] sm:$0xff] }
  0xba   : > { %v5657_v3 = vpop.f32.mrf.mxu1  ;;  %1718 = vst [vmem:[#allocation2 + $0x2c] sm:$0x1] %v1717_v61  ;;  %3660 = vmatpush.bf16.msra.mxu1 %v5031_v0  ;;  %v5030_v0 = vld [vmem:[%s6741_s4 + $0x10] sm:$0xff] }
  0xbb   : > { %v1758_v53 = vld [vmem:[#allocation2 + $0x8] sm:$0xf]  ;;  %v1407_v41 = vadd.f32 %v5657_v3, %v5655_v2  ;;  %v5055_v2 = vld [vmem:[%s6741_s4 + $0xd8] sm:$0xff] }
  0xbc   : > { %v5809_v4 = vunpack.c.l.b16 %v1758_v53 }
  0xbe   : > { %v5659_v8 = vpop.f32.mrf.mxu3  ;;  %v1862_v35 = vpack.c.b16 %v5809_v4, %v5809_v4  ;;  %3661 = vmatpush.bf16.msra.mxu1 %v5030_v0 }
  0xc0   : > { %v5661_v9 = vpop.f32.mrf.mxu2  ;;  %v5663_v12 = vpop.f32.mrf.mxu0  ;;  %v1871_v53 = vshrl.u32 %v1862_v35, 16 }
  0xc1   : > { %v1436_v62 = vadd.f32 %v5661_v9, %v1407_v41  ;;  %v5038_v9 = vld [vmem:[%s6741_s4 + $0x50] sm:$0xff] }
  0xc2   : > { %v5665_v13 = vpop.f32.mrf.mxu1  ;;  %3690 = vmatpush.bf16.msra.mxu2 %v5038_v9 }
  0xc3   : > { %1592 = vmatmul.bf16.gmra.mxu3 %v896_v10  ;;  %1621 = vmatmul.bf16.gmra.mxu0 %v897_v11  ;;  %v5050_v11 = vld [vmem:[%s6741_s4 + $0xb0] sm:$0xff] }
  0xc4   : > { %3715 = vmatpush.bf16.msrb.mxu3 %v5050_v11  ;;  %v5056_v11 = vld [vmem:[%s6741_s4 + $0xe0] sm:$0xff] }
  0xc5   : > { %3746 = vmatpush.bf16.msrb.mxu0 %v5056_v11  ;;  %v1410_v11 = vadd.f32 %v5665_v13, %v5663_v12 }
  0xc6   : > { %v5667_v14 = vpop.f32.mrf.mxu3 }
  0xc8   : > { %v5669_v15 = vpop.f32.mrf.mxu2  ;;  %v5671_v16 = vpop.f32.mrf.mxu0  ;;  %3716 = vmatpush.bf16.msrb.mxu3 %v5049_v54 }
  0xc9   : > { %3747 = vmatpush.bf16.msrb.mxu0 %v5055_v2 }
  0xca   : > { %v5673_v17 = vpop.f32.mrf.mxu1 }
  0xcb   : > { %v1412_v12 = vadd.f32 %v5673_v17, %v5671_v16  ;;  %v5870_v16 = vld [vmem:[%s6739_s2] ss:$0 sm:$0xff] }
  0xcc   : > { %3717 = vmatpush.bf16.msrb.mxu3 %v5048_v7  ;;  %v1689_v7 = vld [vmem:[#allocation2 + $0x34] sm:$0x8] }
  0xcd   : > { %3748 = vmatpush.bf16.msrb.mxu0 %v5054_v55 }
  0xce   : > { %v5675_v18 = vpop.f32.mrf.mxu3 }
  0xd0   : > { %v5677_v19 = vpop.f32.mrf.mxu2  ;;  %v5679_v20 = vpop.f32.mrf.mxu0  ;;  %3718 = vmatpush.bf16.msrb.mxu3 %v5047_v63 }
  0xd1   : > { %v1441_v63 = vadd.f32 %v5677_v19, %v1412_v12  ;;  %v1781_v19 = vld [vmem:[#allocation2 + $0x14] sm:$0x8]  ;;  %v5029_v12 = vld [vmem:[%s6741_s4 + $0x8] sm:$0xff] }
  0xd2   : > { %v5681_v21 = vpop.f32.mrf.mxu1  ;;  %3662 = vmatpush.bf16.msra.mxu1 %v5029_v12 }
  0xd3   : > { %v1415_v2 = vadd.f32 %v5681_v21, %v5651_v60 }
  0xd6   : > { %v5683_v22 = vpop.f32.mrf.mxu3 }
  0xd7   : > { %v1463_v1 = vadd.f32 %v5683_v22, %v1434_v59  ;;  %v1773_v22 = vld [vmem:[#allocation2 + $0xc] sm:$0x1]  ;;  %v1874_v59 = vshll.u32 %v1862_v35, 16 }
  0xd8   : > { %v5685_v23 = vpop.f32.mrf.mxu2  ;;  %v5687_v24 = vpop.f32.mrf.mxu0  ;;  %v1942_v3 = vunpack.c.l.b16 %v1773_v22  ;;  %v1719_v22 = vld [vmem:[#allocation2 + $0x3c] sm:$0x1] }
  0xd9   : > { %v1492_v51 = vadd.f32 %v5679_v20, %v1463_v1  ;;  %v1873_v1 = vrot.slane %v1871_v53, 4  ;;  %v1876_v61 = vrot.slane %v1874_v59, 5  ;;  %v1444_v55 = vadd.f32 %v5685_v23, %v1415_v2 }
  0xda   : > { %v5689_v25 = vpop.f32.mrf.mxu1 }
  0xdb   : > { %v1877_v45 = vor.u32 %v1876_v61, %v1873_v1  ;;  %v1757_v61 = vld [vmem:[#allocation2 + $0x4] sm:$0x8] }
  0xdd   : > { %v2244_v17 = vunpack.c.h.b16 %v1877_v45  ;;  %v2238_v60 = vunpack.c.l.b16 %v1877_v45  ;;  %v5037_v45 = vld [vmem:[%s6741_s4 + $0x48] sm:$0xff] }
  0xde   : > { %v5691_v26 = vpop.f32.mrf.mxu3  ;;  %3691 = vmatpush.bf16.msra.mxu2 %v5037_v45  ;;  %v5953_v45 = vld [vmem:[#allocation2 + $0x2c] sm:$0x1] }
  0xdf   : > { %v1465_v35 = vadd.f32 %v5691_v26, %v1436_v62  ;;  %v5046_v26 = vld [vmem:[%s6741_s4 + $0x90] sm:$0xff]  ;;  %v1439_v62 = vadd.f32 %v5669_v15, %v1410_v11  ;;  %v5888_v21 = vpack.c.b16 %v2244_v17, %v5809_v4  ;;  %v1417_v11 = vadd.f32 %v5689_v25, %v5659_v8 }
  0xe0   : > { %v5693_v27 = vpop.f32.mrf.mxu2  ;;  %v5695_v28 = vpop.f32.mrf.mxu0  ;;  %3719 = vmatpush.bf16.msrb.mxu3 %v5046_v26 }
  0xe1   : > { %v1494_v9 = vadd.f32 %v5687_v24, %v1465_v35  ;;  %v5053_v24 = vld [vmem:[%s6741_s4 + $0xc8] sm:$0xff]  ;;  %v1846_v35 = vunpack.c.l.b16 %v1757_v61 }
  0xe2   : > { %v5697_v29 = vpop.f32.mrf.mxu1  ;;  %3749 = vmatpush.bf16.msrb.mxu0 %v5053_v24 }
  0xe6   : > { %v5702_v31 = vpop.f32.mrf.mxu3 }
  0xe7   : > { %v1468_v8 = vadd.f32 %v5702_v31, %v1439_v62  ;;  %v2422_v31 = vshrl.u32 %v5888_v21, 16 }
  0xe8   : > { %v5704_v32 = vpop.f32.mrf.mxu2  ;;  %v5706_v33 = vpop.f32.mrf.mxu0 }
  0xea   : > { %v5708_v34 = vpop.f32.mrf.mxu1 }
  0xee   : > { %v5716_v37 = vpop.f32.mrf.mxu3 }
  0xf0   : > { %v5718_v38 = vpop.f32.mrf.mxu2  ;;  %v5720_v39 = vpop.f32.mrf.mxu0 }
  0xf2   : > { %v5722_v40 = vpop.f32.mrf.mxu1 }
  0xf3   : > { %v1521_v20 = vadd.f32 %v5722_v40, %v1492_v51  ;;  %v1690_v40 = vsel %vm5769_vm5, 0, %v1689_v7  ;;  %v1720_v51 = vsel %vm5731_vm2, 0, %v1719_v22  ;;  %v1692_v7 = vld [vmem:[#allocation2 + $0x44] sm:$0x8]  ;;  %v1420_v22 = vadd.f32 %v5697_v29, %v5667_v14 }
  0xf4   : > { %1691 = vst [vmem:[#allocation2 + $0x34] sm:$0x8] %v1690_v40  ;;  %v5045_v40 = vld [vmem:[%s6741_s4 + $0x88] sm:$0xff]  ;;  %v1982_v14 = vunpack.c.l.b16 %v1781_v19  ;;  %v2424_v19 = vrot.slane %v2422_v31, 7 }
  0xf5   : > { %1721 = vst [vmem:[#allocation2 + $0x3c] sm:$0x1] %v1720_v51  ;;  %v1470_v51 = vadd.f32 %v5716_v37, %v1441_v63  ;;  %3720 = vmatpush.bf16.msrb.mxu3 %v5045_v40  ;;  %v2334_v37 = vpack.c.b16 %v2238_v60, %v1846_v35  ;;  %v1449_v17 = vadd.f32 %v5704_v32, %v1420_v22  ;;  %v5044_v63 = vld [vmem:[%s6741_s4 + $0x80] sm:$0xff]  ;;  %v1774_v22 = vld [vmem:[#allocation2 + $0x1c] sm:$0x1] }
  0xf6   : > { %v5737_v46 = vpop.f32.mrf.mxu3 }
  0xf7   : > { %v1473_v32 = vadd.f32 %v5737_v46, %v1444_v55  ;;  %v1499_v2 = vadd.f32 %v5706_v33, %v1470_v51  ;;  %v2425_v46 = vshll.u32 %v5888_v21, 16 }
  0xf8   : > { %v5739_v47 = vpop.f32.mrf.mxu2  ;;  %v5741_v48 = vpop.f32.mrf.mxu0 }
  0xf9   : > { %v1550_v41 = vadd.f32 %v5739_v47, %v1521_v20  ;;  %v5863_v47 = vpack.c.b16 %v1942_v3, %v5809_v4  ;;  %v5879_v3 = vld [vmem:[%s6740_s3] ss:$0 sm:$0xff]  ;;  %v1693_v4 = vsel %vm5769_vm5, 0, %v1692_v7  ;;  %3721 = vmatpush.bf16.msrb.mxu3 %v5044_v63  ;;  %v1502_v21 = vadd.f32 %v5720_v39, %v1473_v32  ;;  %v5959_v39 = vld [vmem:[#allocation2 + $0x14] sm:$0x8] }
  0xfa   : > { %v5743_v49 = vpop.f32.mrf.mxu1  ;;  %1694 = vst [vmem:[#allocation2 + $0x44] sm:$0x8] %v1693_v4  ;;  %v1722_v32 = vld [vmem:[#allocation2 + $0x4c] sm:$0x1] }
  0xfb   : > { %v1523_v25 = vadd.f32 %v5743_v49, %v1494_v9  ;;  %v1422_v49 = vadd.f32 %v5708_v34, %v5675_v18  ;;  %v5052_v18 = vld [vmem:[%s6741_s4 + $0xc0] sm:$0xff] }
  0xfc   : > { %3750 = vmatpush.bf16.msrb.mxu0 %v5052_v18 }
  0xfd   : > { %v1451_v34 = vadd.f32 %v5718_v38, %v1422_v49  ;;  %v5028_v38 = vld [vmem:[%s6741_s4] sm:$0xff] }
  0xfe   : > { %v5747_v52 = vpop.f32.mrf.mxu3  ;;  %3663 = vmatpush.bf16.msra.mxu1 %v5028_v38 }
 0x100   : > { %v5749_v56 = vpop.f32.mrf.mxu2  ;;  %v5751_v57 = vpop.f32.mrf.mxu0 }
 0x102   : > { %v5753_v58 = vpop.f32.mrf.mxu1 }
 0x106   : > { %v5775_v10 = vpop.f32.mrf.mxu3 }
 0x107   : > { %v1478_v24 = vadd.f32 %v5775_v10, %v1449_v17  ;;  %v1848_v17 = vunpack.c.l.b16 %v5959_v39 }
 0x108   : > { %v5785_v36 = vpop.f32.mrf.mxu2  ;;  %v5787_v42 = vpop.f32.mrf.mxu0 }
 0x109   : > { %v1507_v51 = vadd.f32 %v5751_v57, %v1478_v24 }
 0x10a   : > { %v5791_v50 = vpop.f32.mrf.mxu1 }
 0x10e   : > { %v5813_v6 = vpop.f32.mrf.mxu3 }
 0x10f   : > { %v1480_v35 = vadd.f32 %v5813_v6, %v1451_v34 }
 0x110   : > { %v5821_v30 = vpop.f32.mrf.mxu2  ;;  %v1607_v44 = vpop.f32.mrf.mxu0 }
 0x112   : > { %v5828_v54 = vpop.f32.mrf.mxu1 }
 0x116   : > { %v1578_v13 = vpop.f32.mrf.mxu3 }
 0x117   : > { %v1579_v59 = vadd.f32 %v1578_v13, %v1550_v41  ;;  %v1552_v13 = vadd.f32 %v5749_v56, %v1523_v25  ;;  %v1497_v56 = vadd.f32 %v5695_v28, %v1468_v8  ;;  %v1528_v8 = vadd.f32 %v5791_v50, %v1499_v2  ;;  %v5950_v25 = vld [vmem:[#allocation2 + $0x24] sm:$0x8] }
 0x118   : > { %v5865_v53 = vpop.f32.mrf.mxu2  ;;  %v1609_v20 = vpop.f32.mrf.mxu0  ;;  %v1984_v55 = vunpack.c.l.b16 %v5950_v25 }
 0x119   : > { %v1608_v15 = vadd.f32 %v1607_v44, %v1579_v59  ;;  %v1958_v44 = vrot.slane %v5863_v47, 5  ;;  %v1446_v59 = vadd.f32 %v5693_v27, %v1417_v11  ;;  %v2417_v11 = vshrl.u32 %v2334_v37, 16  ;;  %v5965_v37 = vld [vmem:[#allocation2 + $0x34] sm:$0x8] }
 0x11a   : > { %v5885_v1 = vpop.f32.mrf.mxu1  ;;  %v1526_v40 = vadd.f32 %v5753_v58, %v1497_v56 }
 0x11b   : > { %v1631_v41 = vmul.f32 %v5870_v16, %v1608_v15  ;;  %v2239_v29 = vunpack.c.l.b16 %v1958_v44  ;;  %v5036_v15 = vld [vmem:[%s6741_s4 + $0x40] sm:$0xff]  ;;  %v1475_v33 = vadd.f32 %v5747_v52, %v1446_v59  ;;  %v4583_v10 = vrot.slane %v2417_v11, 11 }
 0x11c   : > { %3692 = vmatpush.bf16.msra.mxu2 %v5036_v15  ;;  %v2245_v50 = vunpack.c.h.b16 %v1958_v44  ;;  %v1944_v44 = vunpack.c.l.b16 %v5953_v45 }
 0x11d   : > { %v1643_v26 = vadd.f32 %v5879_v3, %v1631_v41  ;;  %v2335_v28 = vpack.c.b16 %v1982_v14, %v2239_v29  ;;  %v2427_v41 = vor.u32 %v2425_v46, %v2424_v19  ;;  %v1504_v6 = vadd.f32 %v5741_v48, %v1475_v33 }
 0x11e   : > { %v1580_v62 = vpop.f32.mrf.mxu3  ;;  %v1557_v14 = vadd.f32 %v5821_v30, %v1528_v8  ;;  %v1531_v48 = vadd.f32 %v5828_v54, %v1502_v21 }
 0x11f   : > { %v1651_v0 = vmax.f32 %v1643_v26, 0.0  ;;  %v1581_v27 = vadd.f32 %v1580_v62, %v1552_v13  ;;  %v2430_v52 = vshrl.u32 %v2335_v28, 16  ;;  %v1509_v13 = vadd.f32 %v5787_v42, %v1480_v35  ;;  %v5963_v26 = vld [vmem:[#allocation2 + $0x3c] sm:$0x1]  ;;  %v5983_v62 = vld [vmem:[#allocation2 + $0x24] sm:$0x8] }
 0x120   : > { %v5931_v23 = vpop.f32.mrf.mxu2  ;;  %v1612_v9 = vpop.f32.mrf.mxu0  ;;  %v5981_v54 = vsel %vm5971_vm7, %v4583_v10, %v2427_v41  ;;  %v5986_v63 = vadd.f32 %v5865_v53, %v1531_v48  ;;  %v1533_v18 = vadd.f32 %v5885_v1, %v1504_v6  ;;  %v5075_v53 = vld [vmem:[%s6741_s4 + $0x178] sm:$0xff]  ;;  %v5999_v1 = vld [vmem:[#allocation2 + $0x44] sm:$0x8]  ;;  %v1723_v28 = vsel %vm5731_vm2, 0, %v1722_v32  ;;  %v6012_v35 = vld [vmem:[#allocation2 + $0x34] sm:$0x8] }
 0x121   : > { %v1740_v61 = vpack.c.bf16 %v1651_v0, %v1651_v0  ;;  %v1610_v60 = vadd.f32 %v1609_v20, %v1581_v27  ;;  %v1555_v20 = vadd.f32 %v5785_v36, %v1526_v40  ;;  %v1943_v36 = vunpack.c.l.b16 %v1774_v22  ;;  %1724 = vst [vmem:[#allocation2 + $0x4c] sm:$0x1] %v1723_v28  ;;  %3801 = vmatpush.bf16.msrb.mxu2 %v5075_v53 }
 0x122   : > { %v1535_v7 = vpop.f32.mrf.mxu1  ;;  %v5975_v30 = vrot.slane %v2430_v52, 11  ;;  %v1945_v0 = vunpack.c.l.b16 %v5963_v26  ;;  %v1986_v27 = vunpack.c.l.b16 %v5965_v37  ;;  %v6004_v19 = vadd.f32 %v5931_v23, %v1533_v18 }
 0x123   : > { %1749 = vst [vmem:[#allocation2 + $0x18] sm:$0xf] %v1740_v61  ;;  %v1632_v4 = vmul.f32 %v5870_v16, %v1610_v60  ;;  %v1536_v61 = vadd.f32 %v1535_v7, %v1507_v51  ;;  %v3080_v60 = vunpack.c.l.b16 %v5981_v54  ;;  %v1850_v11 = vunpack.c.l.b16 %v5983_v62 }
 0x124   : > { %v3081_v24 = vunpack.c.h.b16 %v5981_v54  ;;  %v1852_v51 = vunpack.c.l.b16 %v6012_v35  ;;  %v6145_v35 = vld [vmem:[#allocation2 + $0x44] sm:$0x8] }
 0x125   : > { %v1644_v58 = vadd.f32 %v5879_v3, %v1632_v4 }
 0x126   : > { %v1583_v12 = vpop.f32.mrf.mxu3 }
 0x127   : > { %v1652_v29 = vmax.f32 %v1644_v58, 0.0  ;;  %v1584_v49 = vadd.f32 %v1583_v12, %v1555_v20  ;;  %v1988_v20 = vunpack.c.l.b16 %v5999_v1  ;;  %v1695_v12 = vld [vmem:[#allocation2 + $0x54] sm:$0x8] }
 0x128   : > { %v1564_v31 = vpop.f32.mrf.mxu2  ;;  %v1614_v57 = vpop.f32.mrf.mxu0  ;;  %v1696_v18 = vsel %vm5769_vm5, 0, %v1695_v12 }
 0x129   : > { %v1741_v42 = vpack.c.bf16 %v1652_v29, %v1652_v29  ;;  %v1613_v59 = vadd.f32 %v1612_v9, %v1584_v49  ;;  %v6014_v4 = vadd.f32 %v1564_v31, %v1536_v61  ;;  %1697 = vst [vmem:[#allocation2 + $0x54] sm:$0x8] %v1696_v18 }
 0x12a   : > { %v1760_v34 = vld [vmem:[#allocation2 + $0x18] sm:$0xf]  ;;  %v1537_v9 = vpop.f32.mrf.mxu1 }
 0x12b   : > { %v1782_v56 = vld [vmem:[#allocation2 + $0x18] sm:$0xf]  ;;  %1750 = vst [vmem:[#allocation2 + $0x28] sm:$0xf] %v1741_v42  ;;  %v1633_v2 = vmul.f32 %v5870_v16, %v1613_v59  ;;  %v5992_v15 = vunpack.c.l.b16 %v1760_v34  ;;  %v1538_v23 = vadd.f32 %v1537_v9, %v1509_v13  ;;  %v5074_v9 = vld [vmem:[%s6741_s4 + $0x170] sm:$0xff] }
 0x12c   : > { %v5994_v38 = vunpack.c.l.b16 %v1782_v56  ;;  %3802 = vmatpush.bf16.msrb.mxu2 %v5074_v9 }
 0x12d   : > { %v1645_v46 = vadd.f32 %v5879_v3, %v1633_v2  ;;  %v1951_v33 = vpack.c.b16 %v1943_v36, %v5992_v15  ;;  %v1863_v22 = vpack.c.b16 %v5992_v15, %v5992_v15 }
 0x12e   : > { %v2340_v40 = vpack.c.b16 %v5994_v38, %v2245_v50  ;;  %v1585_v7 = vpop.f32.mrf.mxu3  ;;  %v6021_v10 = vpack.c.b16 %v5994_v38, %v5994_v38 }
 0x12f   : > { %v1653_v8 = vmax.f32 %v1645_v46, 0.0  ;;  %v1586_v21 = vadd.f32 %v1585_v7, %v1557_v14  ;;  %v1959_v52 = vrot.slane %v1951_v33, 5  ;;  %v1879_v41 = vshrl.u32 %v1863_v22, 16 }
 0x130   : > { %v2435_v58 = vshrl.u32 %v2340_v40, 16  ;;  %v1882_v6 = vshll.u32 %v1863_v22, 16  ;;  %v1566_v50 = vpop.f32.mrf.mxu2  ;;  %v2438_v49 = vshll.u32 %v2340_v40, 16  ;;  %v1617_v13 = vpop.f32.mrf.mxu0 }
 0x131   : > { %v1742_v36 = vpack.c.bf16 %v1653_v8, %v1653_v8  ;;  %v1615_v29 = vadd.f32 %v1614_v57, %v1586_v21  ;;  %v2251_v31 = vunpack.c.l.b16 %v1959_v52  ;;  %v1881_v14 = vrot.slane %v1879_v41, 4  ;;  %v5067_v57 = vld [vmem:[%s6741_s4 + $0x138] sm:$0xff] }
 0x132   : > { %v1784_v48 = vld [vmem:[#allocation2 + $0x28] sm:$0xf]  ;;  %v2437_v42 = vrot.slane %v2435_v58, 7  ;;  %v1884_v59 = vrot.slane %v1882_v6, 5  ;;  %v2257_v32 = vunpack.c.h.b16 %v1959_v52  ;;  %v6037_v28 = vadd.f32 %v1566_v50, %v1538_v23  ;;  %3772 = vmatpush.bf16.msrb.mxu1 %v5067_v57 }
 0x133   : > { %1751 = vst [vmem:[#allocation2 + $0x38] sm:$0xf] %v1742_v36  ;;  %v1634_v34 = vmul.f32 %v5870_v16, %v1615_v29  ;;  %v6027_v56 = vunpack.c.l.b16 %v1784_v48  ;;  %v2345_v2 = vpack.c.b16 %v1984_v55, %v2251_v31  ;;  %v1762_v53 = vld [vmem:[#allocation2 + $0x28] sm:$0xf]  ;;  %v6054_v36 = vld [vmem:[#allocation2 + $0x4c] sm:$0x1] }
 0x134   : > { %v2440_v61 = vor.u32 %v2438_v49, %v2437_v42  ;;  %v1885_v46 = vor.u32 %v1884_v59, %v1881_v14  ;;  %v6039_v33 = vunpack.c.l.b16 %v1762_v53 }
 0x135   : > { %v1646_v40 = vadd.f32 %v5879_v3, %v1634_v34  ;;  %v6044_v25 = vpack.c.b16 %v6027_v56, %v6027_v56  ;;  %v2350_v55 = vpack.c.b16 %v6027_v56, %v2257_v32  ;;  %v2495_v7 = vshrl.u32 %v2345_v2, 16 }
 0x136   : > { %v1588_v22 = vpop.f32.mrf.mxu3  ;;  %v2441_v23 = vsel %vm5971_vm7, %v5975_v30, %v2440_v61  ;;  %v2250_v8 = vunpack.c.l.b16 %v1885_v46  ;;  %v2256_v21 = vunpack.c.h.b16 %v1885_v46  ;;  %v1952_v52 = vpack.c.b16 %v1944_v44, %v6039_v33 }
 0x137   : > { %v1654_v58 = vmax.f32 %v1646_v40, 0.0  ;;  %v1589_v41 = vadd.f32 %v1588_v22, %v5986_v63  ;;  %v4589_v6 = vrot.slane %v2495_v7, 11  ;;  %v2500_v12 = vshrl.u32 %v2350_v55, 16 }
 0x138   : > { %v2503_v50 = vshll.u32 %v2350_v55, 16  ;;  %v3082_v29 = vunpack.c.l.b16 %v2441_v23  ;;  %v3083_v31 = vunpack.c.h.b16 %v2441_v23  ;;  %v2344_v49 = vpack.c.b16 %v2250_v8, %v1848_v17 }
 0x139   : > { %v1743_v30 = vpack.c.bf16 %v1654_v58, %v1654_v58  ;;  %v1618_v48 = vadd.f32 %v1617_v13, %v1589_v41  ;;  %v2502_v42 = vrot.slane %v2500_v12, 7  ;;  %v2349_v14 = vpack.c.b16 %v2256_v21, %v5992_v15  ;;  %v5066_v15 = vld [vmem:[%s6741_s4 + $0x130] sm:$0xff]  ;;  %v1619_v13 = vpop.f32.mrf.mxu0 }
 0x13a   : > { %v2482_v45 = vshrl.u32 %v2344_v49, 16  ;;  %v1764_v44 = vld [vmem:[#allocation2 + $0x38] sm:$0xf]  ;;  %v1960_v18 = vrot.slane %v1952_v52, 5  ;;  %v6061_v63 = vpack.c.b16 %v6039_v33, %v6039_v33  ;;  %v1946_v34 = vunpack.c.l.b16 %v6054_v36  ;;  %3773 = vmatpush.bf16.msrb.mxu1 %v5066_v15  ;;  %v5065_v49 = vld [vmem:[%s6741_s4 + $0x128] sm:$0xff] }
 0x13b   : > { %v1786_v59 = vld [vmem:[#allocation2 + $0x38] sm:$0xf]  ;;  %1752 = vst [vmem:[#allocation2 + $0x48] sm:$0xf] %v1743_v30  ;;  %v1635_v32 = vmul.f32 %v5870_v16, %v1618_v48  ;;  %v2505_v39 = vor.u32 %v2503_v50, %v2502_v42  ;;  %v2487_v17 = vshrl.u32 %v2349_v14, 16  ;;  %v2490_v2 = vshll.u32 %v2349_v14, 16 }
 0x13c   : > { %v4588_v57 = vrot.slane %v2482_v45, 11  ;;  %v6068_v9 = vunpack.c.l.b16 %v1764_v44  ;;  %v6070_v53 = vunpack.c.l.b16 %v1786_v59  ;;  %v2263_v61 = vunpack.c.l.b16 %v1960_v18  ;;  %v5072_v14 = vld [vmem:[%s6741_s4 + $0x160] sm:$0xff] }
 0x13d   : > { %v1647_v46 = vadd.f32 %v5879_v3, %v1635_v32  ;;  %v2506_v40 = vsel %vm5971_vm7, %v4589_v6, %v2505_v39  ;;  %v2489_v55 = vrot.slane %v2487_v17, 7  ;;  %v2269_v7 = vunpack.c.h.b16 %v1960_v18  ;;  %v5073_v6 = vld [vmem:[%s6741_s4 + $0x168] sm:$0xff]  ;;  %v5064_v45 = vld [vmem:[%s6741_s4 + $0x120] sm:$0xff] }
 0x13e   : > { %v1590_v22 = vpop.f32.mrf.mxu3  ;;  %v3091_v23 = vunpack.c.l.b16 %v2506_v40  ;;  %v3092_v8 = vunpack.c.h.b16 %v2506_v40  ;;  %v1953_v21 = vpack.c.b16 %v1945_v0, %v6068_v9  ;;  %v2355_v52 = vpack.c.b16 %v1986_v27, %v2263_v61  ;;  %3803 = vmatpush.bf16.msrb.mxu2 %v5073_v6  ;;  %3774 = vmatpush.bf16.msrb.mxu1 %v5065_v49  ;;  %v1698_v15 = vld [vmem:[#allocation2 + $0x64] sm:$0x8] }
 0x13f   : > { %v1655_v58 = vmax.f32 %v1647_v46, 0.0  ;;  %v1591_v41 = vadd.f32 %v1590_v22, %v6004_v19  ;;  %v2492_v12 = vor.u32 %v2490_v2, %v2489_v55  ;;  %v2360_v50 = vpack.c.b16 %v6070_v53, %v2269_v7 }
 0x140   : > { %v3154_v30 = vpack.c.b16 %v3091_v23, %v3082_v29  ;;  %v3155_v26 = vpack.c.b16 %v3092_v8, %v3083_v31  ;;  %v1961_v0 = vrot.slane %v1953_v21, 5  ;;  %v2560_v48 = vshrl.u32 %v2355_v52, 16  ;;  %v1725_v8 = vld [vmem:[#allocation2 + $0x5c] sm:$0x1] }
 0x141   : > { %v1744_v37 = vpack.c.bf16 %v1655_v58, %v1655_v58  ;;  %v1620_v27 = vadd.f32 %v1619_v13, %v1591_v41  ;;  %v2493_v19 = vsel %vm5971_vm7, %v4588_v57, %v2492_v12  ;;  %v2565_v42 = vshrl.u32 %v2360_v50, 16  ;;  %v1622_v23 = vpop.f32.mrf.mxu0 }
 0x142   : > { %3722 = vmatmul.bf16.vlgmr.msrb.gmra.mxu3 %v3154_v30  ;;  %3751 = vmatmul.bf16.vlgmr.msrb.gmra.mxu0 %v3155_v26  ;;  %v3089_v29 = vunpack.c.l.b16 %v2493_v19  ;;  %v3090_v31 = vunpack.c.h.b16 %v2493_v19  ;;  %v1788_v44 = vld [vmem:[#allocation2 + $0x48] sm:$0xf]  ;;  %v2275_v59 = vunpack.c.l.b16 %v1961_v0  ;;  %v2281_v18 = vunpack.c.h.b16 %v1961_v0 }
 0x143   : > { %1753 = vst [vmem:[#allocation2 + $0x58] sm:$0xf] %v1744_v37  ;;  %v1636_v32 = vmul.f32 %v5870_v16, %v1620_v27  ;;  %v6097_v39 = vunpack.c.l.b16 %v1788_v44  ;;  %v4594_v17 = vrot.slane %v2560_v48, 11  ;;  %v2567_v2 = vrot.slane %v2565_v42, 7  ;;  %3804 = vmatpush.bf16.msrb.mxu2 %v5072_v14  ;;  %3775 = vmatpush.bf16.msrb.mxu1 %v5064_v45  ;;  %v1766_v30 = vld [vmem:[#allocation2 + $0x48] sm:$0xf] }
 0x144   : > { %v3152_v13 = vpack.c.b16 %v3089_v29, %v3080_v60  ;;  %v3153_v57 = vpack.c.b16 %v3090_v31, %v3081_v24  ;;  %v2365_v61 = vpack.c.b16 %v1988_v20, %v2275_v59  ;;  %v2568_v46 = vshll.u32 %v2360_v50, 16  ;;  %v5083_v37 = vld [vmem:[%s6741_s4 + $0x1b8] sm:$0xff] }
 0x145   : > { %v1648_v40 = vadd.f32 %v5879_v3, %v1636_v32  ;;  %v2370_v55 = vpack.c.b16 %v6097_v39, %v2281_v18  ;;  %v1865_v7 = vpack.c.b16 %v6068_v9, %v6068_v9  ;;  %v1887_v22 = vshrl.u32 %v6061_v63, 16  ;;  %3830 = vmatpush.bf16.msra.mxu3 %v5083_v37 }
 0x146   : > { %3664 = vmatmul.bf16.vlgmr.msra.gmra.mxu1 %v3152_v13  ;;  %3693 = vmatmul.bf16.vlgmr.msra.gmra.mxu2 %v3153_v57  ;;  %v1593_v54 = vpop.f32.mrf.mxu3  ;;  %v2570_v60 = vor.u32 %v2568_v46, %v2567_v2  ;;  %v2625_v24 = vshrl.u32 %v2365_v61, 16  ;;  %v1890_v1 = vshll.u32 %v6061_v63, 16  ;;  %v1699_v20 = vsel %vm5769_vm5, 0, %v1698_v15 }
 0x147   : > { %v1656_v21 = vmax.f32 %v1648_v40, 0.0  ;;  %v1594_v52 = vadd.f32 %v1593_v54, %v6014_v4  ;;  %v2630_v58 = vshrl.u32 %v2370_v55, 16  ;;  %v2633_v41 = vshll.u32 %v2370_v55, 16  ;;  %1700 = vst [vmem:[#allocation2 + $0x64] sm:$0x8] %v1699_v20  ;;  %v5091_v4 = vld [vmem:[%s6741_s4 + $0x1f8] sm:$0xff] }
 0x148   : > { %v2571_v12 = vsel %vm5971_vm7, %v4594_v17, %v2570_v60  ;;  %v4599_v50 = vrot.slane %v2625_v24, 11  ;;  %v1889_v6 = vrot.slane %v1887_v22, 4  ;;  %v1892_v49 = vrot.slane %v1890_v1, 5  ;;  %3859 = vmatpush.bf16.msra.mxu0 %v5091_v4  ;;  %v1789_v24 = vld [vmem:[#allocation2 + $0x54] sm:$0x8] }
 0x149   : > { %v1745_v26 = vpack.c.bf16 %v1656_v21, %v1656_v21  ;;  %v1623_v0 = vadd.f32 %v1622_v23, %v1594_v52  ;;  %v2632_v63 = vrot.slane %v2630_v58, 7  ;;  %v3100_v48 = vunpack.c.l.b16 %v2571_v12  ;;  %v1624_v20 = vpop.f32.mrf.mxu0 }
 0x14a   : > { %v3101_v27 = vunpack.c.h.b16 %v2571_v12  ;;  %v1893_v19 = vor.u32 %v1892_v49, %v1889_v6  ;;  %v1895_v42 = vshrl.u32 %v1865_v7, 16  ;;  %v1898_v14 = vshll.u32 %v1865_v7, 16  ;;  %v1768_v45 = vld [vmem:[#allocation2 + $0x58] sm:$0xf] }
 0x14b   : > { %1754 = vst [vmem:[#allocation2 + $0x68] sm:$0xf] %v1745_v26  ;;  %v1637_v29 = vmul.f32 %v5870_v16, %v1623_v0  ;;  %v2635_v31 = vor.u32 %v2633_v41, %v2632_v63  ;;  %v1726_v44 = vsel %vm5731_vm2, 0, %v1725_v8  ;;  %v6125_v59 = vunpack.c.l.b16 %v1766_v30 }
 0x14c   : > { %v1897_v18 = vrot.slane %v1895_v42, 4  ;;  %v1900_v32 = vrot.slane %v1898_v14, 5  ;;  %v2262_v17 = vunpack.c.l.b16 %v1893_v19  ;;  %v2268_v2 = vunpack.c.h.b16 %v1893_v19  ;;  %1727 = vst [vmem:[#allocation2 + $0x5c] sm:$0x1] %v1726_v44 }
 0x14d   : > { %v1649_v15 = vadd.f32 %v5879_v3, %v1637_v29  ;;  %v2636_v13 = vsel %vm5971_vm7, %v4599_v50, %v2635_v31  ;;  %v6130_v57 = vunpack.c.l.b16 %v1768_v45  ;;  %v1954_v61 = vpack.c.b16 %v1946_v34, %v6125_v59  ;;  %v1790_v34 = vld [vmem:[#allocation2 + $0x58] sm:$0xf]  ;;  %v5082_v45 = vld [vmem:[%s6741_s4 + $0x1b0] sm:$0xff] }
 0x14e   : > { %v1595_v46 = vpop.f32.mrf.mxu3  ;;  %v3109_v40 = vunpack.c.l.b16 %v2636_v13  ;;  %v3110_v55 = vunpack.c.h.b16 %v2636_v13  ;;  %v1901_v7 = vor.u32 %v1900_v32, %v1897_v18  ;;  %v2354_v22 = vpack.c.b16 %v2262_v17, %v1850_v11  ;;  %v5090_v29 = vld [vmem:[%s6741_s4 + $0x1f0] sm:$0xff]  ;;  %v5063_v17 = vld [vmem:[%s6741_s4 + $0x118] sm:$0xff]  ;;  %3831 = vmatpush.bf16.msra.mxu3 %v5082_v45 }
 0x14f   : > { %v1657_v23 = vmax.f32 %v1649_v15, 0.0  ;;  %v1596_v54 = vadd.f32 %v1595_v46, %v6037_v28  ;;  %v2359_v60 = vpack.c.b16 %v2268_v2, %v6039_v33  ;;  %v1962_v1 = vrot.slane %v1954_v61, 5  ;;  %v1791_v33 = vld [vmem:[#allocation2 + $0x64] sm:$0x8]  ;;  %v6160_v32 = vld [vmem:[#allocation2 + $0x54] sm:$0x8]  ;;  %3860 = vmatpush.bf16.msra.mxu0 %v5090_v29  ;;  %3776 = vmatpush.bf16.msrb.mxu1 %v5063_v17 }
 0x150   : > { %v3163_v8 = vpack.c.b16 %v3109_v40, %v3100_v48  ;;  %v3164_v21 = vpack.c.b16 %v3110_v55, %v3101_v27  ;;  %v2274_v52 = vunpack.c.l.b16 %v1901_v7  ;;  %v2280_v36 = vunpack.c.h.b16 %v1901_v7  ;;  %v5081_v46 = vld [vmem:[%s6741_s4 + $0x1a8] sm:$0xff]  ;;  %v5070_v40 = vld [vmem:[%s6741_s4 + $0x150] sm:$0xff] }
 0x151   : > { %v1746_v58 = vpack.c.bf16 %v1657_v23, %v1657_v23  ;;  %v1625_v41 = vadd.f32 %v1624_v20, %v1596_v54  ;;  %v2547_v12 = vshrl.u32 %v2354_v22, 16  ;;  %v2552_v50 = vshrl.u32 %v2359_v60, 16  ;;  %v5089_v54 = vld [vmem:[%s6741_s4 + $0x1e8] sm:$0xff] }
 0x152   : > { %3727 = vmatmul.bf16.gmra.mxu3 %v3163_v8  ;;  %3756 = vmatmul.bf16.gmra.mxu0 %v3164_v21  ;;  %v2364_v62 = vpack.c.b16 %v2274_v52, %v1852_v51  ;;  %v2369_v11 = vpack.c.b16 %v2280_v36, %v6068_v9  ;;  %v2555_v28 = vshll.u32 %v2359_v60, 16  ;;  %v1792_v6 = vld [vmem:[#allocation2 + $0x68] sm:$0xf]  ;;  %v1990_v49 = vunpack.c.l.b16 %v1789_v24  ;;  %v5062_v60 = vld [vmem:[%s6741_s4 + $0x110] sm:$0xff] }
 0x153   : > { %1755 = vst [vmem:[#allocation2 + $0x78] sm:$0xf] %v1746_v58  ;;  %v1638_v30 = vmul.f32 %v5870_v16, %v1625_v41  ;;  %v4593_v26 = vrot.slane %v2547_v12, 11  ;;  %v2554_v0 = vrot.slane %v2552_v50, 7  ;;  %v1778_v63 = vld [vmem:[#allocation2 + $0x5c] sm:$0x1]  ;;  %v6143_v48 = vunpack.c.l.b16 %v1790_v34  ;;  %3832 = vmatpush.bf16.msra.mxu3 %v5081_v46  ;;  %3861 = vmatpush.bf16.msra.mxu0 %v5089_v54 }
 0x154   : > { %v2612_v37 = vshrl.u32 %v2364_v62, 16  ;;  %v2617_v4 = vshrl.u32 %v2369_v11, 16  ;;  %v2620_v27 = vshll.u32 %v2369_v11, 16  ;;  %v1947_v19 = vunpack.c.l.b16 %v1778_v63  ;;  %v5071_v16 = vld [vmem:[%s6741_s4 + $0x158] sm:$0xff]  ;;  %3777 = vmatpush.bf16.msrb.mxu1 %v5062_v60 }
 0x155   : > { %v1650_v51 = vadd.f32 %v5879_v3, %v1638_v30  ;;  %v2557_v9 = vor.u32 %v2555_v28, %v2554_v0  ;;  %v1992_v42 = vunpack.c.l.b16 %v1791_v33  ;;  %v6148_v14 = vunpack.c.l.b16 %v1792_v6  ;;  %3805 = vmatpush.bf16.msrb.mxu2 %v5071_v16  ;;  %v5080_v6 = vld [vmem:[%s6741_s4 + $0x1a0] sm:$0xff]  ;;  %v1731_v16 = vld [vmem:[#allocation2 + $0x7c] sm:$0x1] }
 0x156   : > { %v4598_v31 = vrot.slane %v2612_v37, 11  ;;  %v2619_v44 = vrot.slane %v2617_v4, 7  ;;  %v1955_v3 = vpack.c.b16 %v1947_v19, %v6130_v57  ;;  %v2287_v18 = vunpack.c.l.b16 %v1962_v1  ;;  %v1701_v37 = vld [vmem:[#allocation2 + $0x74] sm:$0x8] }
 0x157   : > { %v1658_v2 = vmax.f32 %v1650_v51, 0.0  ;;  %v2558_v15 = vsel %vm5971_vm7, %v4593_v26, %v2557_v9  ;;  %v2293_v13 = vunpack.c.h.b16 %v1962_v1  ;;  %v1854_v61 = vunpack.c.l.b16 %v6145_v35  ;;  %v1704_v9 = vld [vmem:[#allocation2 + $0x84] sm:$0x8]  ;;  %3833 = vmatpush.bf16.msra.mxu3 %v5080_v6 }
 0x158   : > { %v2622_v55 = vor.u32 %v2620_v27, %v2619_v44  ;;  %v3098_v7 = vunpack.c.l.b16 %v2558_v15  ;;  %v3099_v22 = vunpack.c.h.b16 %v2558_v15  ;;  %v1963_v23 = vrot.slane %v1955_v3, 5  ;;  %v1770_v3 = vld [vmem:[#allocation2 + $0x68] sm:$0xf] }
 0x159   : > { %v1747_v24 = vpack.c.bf16 %v1658_v2, %v1658_v2  ;;  %v2375_v1 = vpack.c.b16 %v1990_v49, %v2287_v18  ;;  %v2380_v20 = vpack.c.b16 %v6143_v48, %v2293_v13  ;;  %v1856_v8 = vunpack.c.l.b16 %v6160_v32  ;;  %3806 = vmatpush.bf16.msrb.mxu2 %v5070_v40  ;;  %v5088_v49 = vld [vmem:[%s6741_s4 + $0x1e0] sm:$0xff] }
 0x15a   : > { %v2623_v21 = vsel %vm5971_vm7, %v4598_v31, %v2622_v55  ;;  %v2299_v52 = vunpack.c.l.b16 %v1963_v23  ;;  %v2305_v36 = vunpack.c.h.b16 %v1963_v23  ;;  %v1866_v34 = vpack.c.b16 %v6125_v59, %v6125_v59  ;;  %v1772_v18 = vld [vmem:[#allocation2 + $0x78] sm:$0xf]  ;;  %3862 = vmatpush.bf16.msra.mxu0 %v5088_v49 }
 0x15b   : > { %1756 = vst [vmem:[#allocation2 + $0x88] sm:$0xf] %v1747_v24  ;;  %v3107_v58 = vunpack.c.l.b16 %v2623_v21  ;;  %v3108_v41 = vunpack.c.h.b16 %v2623_v21  ;;  %v2690_v12 = vshrl.u32 %v2375_v1, 16  ;;  %v2695_v50 = vshrl.u32 %v2380_v20, 16  ;;  %v1794_v46 = vld [vmem:[#allocation2 + $0x78] sm:$0xf] }
 0x15c   : > { %v2385_v62 = vpack.c.b16 %v1992_v42, %v2299_v52  ;;  %v2390_v11 = vpack.c.b16 %v6148_v14, %v2305_v36  ;;  %v2698_v28 = vshll.u32 %v2380_v20, 16  ;;  %v1867_v33 = vpack.c.b16 %v6130_v57, %v6130_v57  ;;  %v1728_v42 = vld [vmem:[#allocation2 + $0x6c] sm:$0x1]  ;;  %v5079_v1 = vld [vmem:[%s6741_s4 + $0x198] sm:$0xff]  ;;  %v6207_v21 = vld [vmem:[#allocation2 + $0x64] sm:$0x8] }
 0x15d   : > { %v3161_v30 = vpack.c.b16 %v3107_v58, %v3098_v7  ;;  %v3162_v26 = vpack.c.b16 %v3108_v41, %v3099_v22  ;;  %v4604_v0 = vrot.slane %v2690_v12, 11  ;;  %v2697_v63 = vrot.slane %v2695_v50, 7  ;;  %v5087_v20 = vld [vmem:[%s6741_s4 + $0x1d8] sm:$0xff]  ;;  %3834 = vmatpush.bf16.msra.mxu3 %v5079_v1 }
 0x15e   : > { %v2755_v4 = vshrl.u32 %v2385_v62, 16  ;;  %v2760_v27 = vshrl.u32 %v2390_v11, 16  ;;  %v2763_v19 = vshll.u32 %v2390_v11, 16  ;;  %v1903_v51 = vshrl.u32 %v1866_v34, 16  ;;  %3863 = vmatpush.bf16.msra.mxu0 %v5087_v20 }
 0x15f   : > { %3669 = vmatmul.bf16.gmra.mxu1 %v3161_v30  ;;  %3698 = vmatmul.bf16.gmra.mxu2 %v3162_v26  ;;  %v2700_v45 = vor.u32 %v2698_v28, %v2697_v63  ;;  %v1906_v29 = vshll.u32 %v1866_v34, 16  ;;  %v1911_v31 = vshrl.u32 %v1867_v33, 16  ;;  %v1914_v44 = vshll.u32 %v1867_v33, 16 }
 0x160   : > { %v4609_v17 = vrot.slane %v2755_v4, 11  ;;  %v2762_v2 = vrot.slane %v2760_v27, 7  ;;  %v1905_v15 = vrot.slane %v1903_v51, 4  ;;  %v1702_v13 = vsel %vm5769_vm5, 0, %v1701_v37  ;;  %v5069_v51 = vld [vmem:[%s6741_s4 + $0x148] sm:$0xff] }
 0x161   : > { %v2701_v40 = vsel %vm5971_vm7, %v4604_v0, %v2700_v45  ;;  %v1908_v55 = vrot.slane %v1906_v29, 5  ;;  %v1913_v7 = vrot.slane %v1911_v31, 4  ;;  %v1916_v22 = vrot.slane %v1914_v44, 5  ;;  %1703 = vst [vmem:[#allocation2 + $0x74] sm:$0x8] %v1702_v13  ;;  %v5061_v31 = vld [vmem:[%s6741_s4 + $0x108] sm:$0xff]  ;;  %3807 = vmatpush.bf16.msrb.mxu2 %v5069_v51 }
 0x162   : > { %v2765_v23 = vor.u32 %v2763_v19, %v2762_v2  ;;  %v3118_v54 = vunpack.c.l.b16 %v2701_v40  ;;  %v3119_v60 = vunpack.c.h.b16 %v2701_v40  ;;  %v1705_v24 = vsel %vm5769_vm5, 0, %v1704_v9  ;;  %v1796_v41 = vld [vmem:[#allocation2 + $0x88] sm:$0xf]  ;;  %v5078_v9 = vld [vmem:[%s6741_s4 + $0x190] sm:$0xff]  ;;  %v6260_v40 = vld [vmem:[#allocation2 + $0x24] sm:$0x8]  ;;  %3778 = vmatpush.bf16.msrb.mxu1 %v5061_v31 }
 0x163   : > { %v1909_v52 = vor.u32 %v1908_v55, %v1905_v15  ;;  %v1917_v36 = vor.u32 %v1916_v22, %v1913_v7  ;;  %1706 = vst [vmem:[#allocation2 + $0x84] sm:$0x8] %v1705_v24  ;;  %v1729_v34 = vsel %vm5731_vm2, 0, %v1728_v42  ;;  %v1732_v58 = vsel %vm5731_vm2, 0, %v1731_v16  ;;  %v5086_v42 = vld [vmem:[%s6741_s4 + $0x1d0] sm:$0xff]  ;;  %3835 = vmatpush.bf16.msra.mxu3 %v5078_v9 }
 0x164   : > { %v2766_v12 = vsel %vm5971_vm7, %v4609_v17, %v2765_v23  ;;  %1730 = vst [vmem:[#allocation2 + $0x6c] sm:$0x1] %v1729_v34  ;;  %v6215_v50 = vunpack.c.l.b16 %v1770_v3  ;;  %v6217_v62 = vunpack.c.l.b16 %v1772_v18  ;;  %v6219_v11 = vunpack.c.l.b16 %v1794_v46  ;;  %v5077_v3 = vld [vmem:[%s6741_s4 + $0x188] sm:$0xff]  ;;  %v5068_v46 = vld [vmem:[%s6741_s4 + $0x140] sm:$0xff]  ;;  %3864 = vmatpush.bf16.msra.mxu0 %v5086_v42 }
 0x165   : > { %v3127_v28 = vunpack.c.l.b16 %v2766_v12  ;;  %v3128_v33 = vunpack.c.h.b16 %v2766_v12  ;;  %v2286_v6 = vunpack.c.l.b16 %v1909_v52  ;;  %v2292_v49 = vunpack.c.h.b16 %v1909_v52  ;;  %1733 = vst [vmem:[#allocation2 + $0x7c] sm:$0x1] %v1732_v58  ;;  %v5060_v34 = vld [vmem:[%s6741_s4 + $0x100] sm:$0xff]  ;;  %3808 = vmatpush.bf16.msrb.mxu2 %v5068_v46  ;;  %v1807_v51 = vld [vmem:[#allocation2 + $0x28] sm:$0xf] }
 0x166   : > { %v2298_v30 = vunpack.c.l.b16 %v1917_v36  ;;  %v2304_v26 = vunpack.c.h.b16 %v1917_v36  ;;  %v6221_v0 = vunpack.c.l.b16 %v1796_v41  ;;  %v1858_v63 = vunpack.c.l.b16 %v6207_v21  ;;  %3779 = vmatpush.bf16.msrb.mxu1 %v5060_v34 }
 0x167   : > { %v3172_v37 = vpack.c.b16 %v3127_v28, %v3118_v54  ;;  %v3173_v4 = vpack.c.b16 %v3128_v33, %v3119_v60  ;;  %v2374_v27 = vpack.c.b16 %v2286_v6, %v1854_v61  ;;  %v2379_v19 = vpack.c.b16 %v2292_v49, %v6125_v59  ;;  %v5085_v60 = vld [vmem:[%s6741_s4 + $0x1c8] sm:$0xff]  ;;  %3836 = vmatpush.bf16.msra.mxu3 %v5077_v3 }
 0x168   : > { %v2384_v16 = vpack.c.b16 %v2298_v30, %v1856_v8  ;;  %v2389_v35 = vpack.c.b16 %v2304_v26, %v6130_v57  ;;  %v6239_v61 = vld [vmem:[#allocation2 + $0x74] sm:$0x8]  ;;  %v1868_v45 = vpack.c.b16 %v6215_v50, %v6215_v50  ;;  %v1869_v29 = vpack.c.b16 %v6217_v62, %v6217_v62  ;;  %v5076_v26 = vld [vmem:[%s6741_s4 + $0x180] sm:$0xff]  ;;  %3865 = vmatpush.bf16.msra.mxu0 %v5085_v60 }
 0x169   : > { %v6241_v59 = vld [vmem:[#allocation2 + $0x74] sm:$0x8]  ;;  %3732 = vmatmul.bf16.gmra.mxu3 %v3172_v37  ;;  %3761 = vmatmul.bf16.gmra.mxu0 %v3173_v4  ;;  %v2677_v32 = vshrl.u32 %v2374_v27, 16  ;;  %v2682_v8 = vshrl.u32 %v2379_v19, 16  ;;  %v2685_v44 = vshll.u32 %v2379_v19, 16  ;;  %v1994_v57 = vunpack.c.l.b16 %v6239_v61  ;;  %v5084_v19 = vld [vmem:[%s6741_s4 + $0x1c0] sm:$0xff] }
 0x16a   : > { %v2742_v18 = vshrl.u32 %v2384_v16, 16  ;;  %v2747_v17 = vshrl.u32 %v2389_v35, 16  ;;  %v2750_v2 = vshll.u32 %v2389_v35, 16  ;;  %v6254_v15 = vld [vmem:[#allocation2 + $0x84] sm:$0x8]  ;;  %v1860_v13 = vunpack.c.l.b16 %v6241_v59 }
 0x16b   : > { %v4603_v55 = vrot.slane %v2677_v32, 11  ;;  %v2684_v7 = vrot.slane %v2682_v8, 7  ;;  %v1779_v22 = vld [vmem:[#allocation2 + $0x6c] sm:$0x1]  ;;  %v1996_v23 = vunpack.c.l.b16 %v6254_v15  ;;  %v1919_v54 = vshrl.u32 %v1868_v45, 16  ;;  %3837 = vmatpush.bf16.msra.mxu3 %v5076_v26 }
 0x16c   : > { %v4608_v24 = vrot.slane %v2742_v18, 11  ;;  %v2749_v1 = vrot.slane %v2747_v17, 7  ;;  %v1780_v20 = vld [vmem:[#allocation2 + $0x7c] sm:$0x1]  ;;  %v1948_v52 = vunpack.c.l.b16 %v1779_v22  ;;  %v1922_v36 = vshll.u32 %v1868_v45, 16  ;;  %3866 = vmatpush.bf16.msra.mxu0 %v5084_v19 }
 0x16d   : > { %v2687_v58 = vor.u32 %v2685_v44, %v2684_v7  ;;  %v1949_v41 = vunpack.c.l.b16 %v1780_v20  ;;  %v1921_v12 = vrot.slane %v1919_v54, 4  ;;  %v1927_v28 = vshrl.u32 %v1869_v29, 16  ;;  %v6282_v17 = vld [vmem:[#allocation2 + $0x34] sm:$0x8]  ;;  %v1809_v19 = vld [vmem:[#allocation2 + $0x38] sm:$0xf] }
 0x16e   : > { %v2752_v33 = vor.u32 %v2750_v2, %v2749_v1  ;;  %v1956_v6 = vpack.c.b16 %v1948_v52, %v6215_v50  ;;  %v1924_v49 = vrot.slane %v1922_v36, 5  ;;  %v1930_v30 = vshll.u32 %v1869_v29, 16 }
 0x16f   : > { %v2688_v37 = vsel %vm5971_vm7, %v4603_v55, %v2687_v58  ;;  %v1957_v4 = vpack.c.b16 %v1949_v41, %v6217_v62  ;;  %v1929_v27 = vrot.slane %v1927_v28, 4  ;;  %v2118_v9 = vunpack.c.l.b16 %v6260_v40 }
 0x170   : > { %v2753_v42 = vsel %vm5971_vm7, %v4608_v24, %v2752_v33  ;;  %v3116_v16 = vunpack.c.l.b16 %v2688_v37  ;;  %v3117_v35 = vunpack.c.h.b16 %v2688_v37  ;;  %v1964_v45 = vrot.slane %v1956_v6, 5 }
 0x171   : > { %v3125_v29 = vunpack.c.l.b16 %v2753_v42  ;;  %v3126_v31 = vunpack.c.h.b16 %v2753_v42  ;;  %v1965_v32 = vrot.slane %v1957_v4, 5  ;;  %v1925_v8 = vor.u32 %v1924_v49, %v1921_v12 }
 0x172   : > { %v2311_v44 = vunpack.c.l.b16 %v1964_v45  ;;  %v2317_v3 = vunpack.c.h.b16 %v1964_v45  ;;  %v1932_v18 = vrot.slane %v1930_v30, 5  ;;  %v6284_v2 = vunpack.c.l.b16 %v1807_v51 }
 0x173   : > { %v3170_v15 = vpack.c.b16 %v3125_v29, %v3116_v16  ;;  %v3171_v46 = vpack.c.b16 %v3126_v31, %v3117_v35  ;;  %v2323_v55 = vunpack.c.l.b16 %v1965_v32  ;;  %v2329_v7 = vunpack.c.h.b16 %v1965_v32 }
 0x174   : > { %v2395_v22 = vpack.c.b16 %v1994_v57, %v2311_v44  ;;  %v2400_v54 = vpack.c.b16 %v6219_v11, %v2317_v3  ;;  %v1933_v60 = vor.u32 %v1932_v18, %v1929_v27  ;;  %v2310_v24 = vunpack.c.l.b16 %v1925_v8 }
 0x175   : > { %3674 = vmatmul.bf16.gmra.mxu1 %v3170_v15  ;;  %3703 = vmatmul.bf16.gmra.mxu2 %v3171_v46  ;;  %v2405_v1 = vpack.c.b16 %v1996_v23, %v2323_v55  ;;  %v2410_v20 = vpack.c.b16 %v6221_v0, %v2329_v7  ;;  %v2316_v52 = vunpack.c.h.b16 %v1925_v8  ;;  %v2120_v36 = vunpack.c.l.b16 %v6282_v17  ;;  %v1811_v17 = vld [vmem:[#allocation2 + $0x48] sm:$0xf] }
 0x176   : > { %v2820_v34 = vshrl.u32 %v2395_v22, 16  ;;  %v2825_v58 = vshrl.u32 %v2400_v54, 16  ;;  %v2828_v41 = vshll.u32 %v2400_v54, 16  ;;  %v2322_v12 = vunpack.c.l.b16 %v1933_v60 }
 0x177   : > { %v2885_v28 = vshrl.u32 %v2405_v1, 16  ;;  %v2890_v33 = vshrl.u32 %v2410_v20, 16  ;;  %v2893_v61 = vshll.u32 %v2410_v20, 16  ;;  %v2328_v57 = vunpack.c.h.b16 %v1933_v60  ;;  %v5107_v60 = vld [vmem:[%s6744_s7 + $0x38] sm:$0xff] }
 0x178   : > { %v4614_v6 = vrot.slane %v2820_v34, 11  ;;  %v2827_v49 = vrot.slane %v2825_v58, 7  ;;  %v2394_v30 = vpack.c.b16 %v2310_v24, %v1858_v63  ;;  %v2399_v23 = vpack.c.b16 %v2316_v52, %v6215_v50  ;;  %v5099_v24 = vld [vmem:[%s6741_s4 + $0x238] sm:$0xff]  ;;  %4017 = vmatpush.bf16.msra.mxu2 %v5107_v60  ;;  %5125 = vmatpush.bf16.msrb.mxu3 %v5107_v60 }
 0x179   : > { %v4619_v26 = vrot.slane %v2885_v28, 11  ;;  %v2892_v37 = vrot.slane %v2890_v33, 7  ;;  %v2404_v4 = vpack.c.b16 %v2322_v12, %v1860_v13  ;;  %v2409_v27 = vpack.c.b16 %v2328_v57, %v6217_v62  ;;  %5117 = vmatpush.bf16.msra.mxu1 %v5099_v24  ;;  %3888 = vmatpush.bf16.msrb.mxu0 %v5099_v24 }
 0x17a   : > { %v2830_v51 = vor.u32 %v2828_v41, %v2827_v49  ;;  %v2807_v42 = vshrl.u32 %v2394_v30, 16  ;;  %v2812_v16 = vshrl.u32 %v2399_v23, 16  ;;  %v2815_v35 = vshll.u32 %v2399_v23, 16 }
 0x17b   : > { %v2895_v45 = vor.u32 %v2893_v61, %v2892_v37  ;;  %v2872_v29 = vshrl.u32 %v2404_v4, 16  ;;  %v2877_v31 = vshrl.u32 %v2409_v27, 16  ;;  %v2880_v32 = vshll.u32 %v2409_v27, 16  ;;  %v1797_v37 = vld [vmem:[#allocation2 + $0x1c] sm:$0x1]  ;;  %v5098_v4 = vld [vmem:[%s6741_s4 + $0x230] sm:$0xff] }
 0x17c   : > { %v2831_v21 = vsel %vm5971_vm7, %v4614_v6, %v2830_v51  ;;  %v4613_v50 = vrot.slane %v2807_v42, 11  ;;  %v2814_v63 = vrot.slane %v2812_v16, 7  ;;  %v6299_v8 = vunpack.c.l.b16 %v1809_v19  ;;  %v1798_v51 = vld [vmem:[#allocation2 + $0x2c] sm:$0x1] }
 0x17d   : > { %v2896_v59 = vsel %vm5971_vm7, %v4619_v26, %v2895_v45  ;;  %v3136_v62 = vunpack.c.l.b16 %v2831_v21  ;;  %v3137_v13 = vunpack.c.h.b16 %v2831_v21  ;;  %v4618_v44 = vrot.slane %v2872_v29, 11  ;;  %5118 = vmatpush.bf16.msra.mxu1 %v5098_v4  ;;  %3889 = vmatpush.bf16.msrb.mxu0 %v5098_v4 }
 0x17e   : > { %v3145_v3 = vunpack.c.l.b16 %v2896_v59  ;;  %v3146_v18 = vunpack.c.h.b16 %v2896_v59  ;;  %v2817_v15 = vor.u32 %v2815_v35, %v2814_v63  ;;  %v2879_v46 = vrot.slane %v2877_v31, 7 }
 0x17f   : > { %v2134_v55 = vpack.c.b16 %v6284_v2, %v6284_v2  ;;  %v2135_v7 = vpack.c.b16 %v6299_v8, %v6299_v8  ;;  %v2007_v22 = vshrl.u32 %v6021_v10, 16  ;;  %v2010_v54 = vshll.u32 %v6021_v10, 16  ;;  %v5106_v10 = vld [vmem:[%s6744_s7 + $0x30] sm:$0xff] }
 0x180   : > { %v3181_v1 = vpack.c.b16 %v3145_v3, %v3136_v62  ;;  %v3182_v20 = vpack.c.b16 %v3146_v18, %v3137_v13  ;;  %v2818_v52 = vsel %vm5971_vm7, %v4613_v50, %v2817_v15  ;;  %v2882_v34 = vor.u32 %v2880_v32, %v2879_v46  ;;  %4018 = vmatpush.bf16.msra.mxu2 %v5106_v10 }
 0x181   : > { %v3134_v58 = vunpack.c.l.b16 %v2818_v52  ;;  %v3135_v41 = vunpack.c.h.b16 %v2818_v52  ;;  %v2143_v12 = vshrl.u32 %v2134_v55, 16  ;;  %v2146_v28 = vshll.u32 %v2134_v55, 16  ;;  %5126 = vmatpush.bf16.msrb.mxu3 %v5106_v10 }
 0x182   : > { %3737 = vmatmul.bf16.gmra.mxu3 %v3181_v1  ;;  %3766 = vmatmul.bf16.gmra.mxu0 %v3182_v20  ;;  %v2883_v33 = vsel %vm5971_vm7, %v4618_v44, %v2882_v34  ;;  %v2151_v61 = vshrl.u32 %v2135_v7, 16  ;;  %v2154_v57 = vshll.u32 %v2135_v7, 16  ;;  %v2009_v6 = vrot.slane %v2007_v22, 4 }
 0x183   : > { %v3143_v49 = vunpack.c.l.b16 %v2883_v33  ;;  %v3144_v30 = vunpack.c.h.b16 %v2883_v33  ;;  %v2145_v23 = vrot.slane %v2143_v12, 4  ;;  %v2148_v26 = vrot.slane %v2146_v28, 5 }
 0x184   : > { %v2153_v27 = vrot.slane %v2151_v61, 4  ;;  %v2156_v19 = vrot.slane %v2154_v57, 5  ;;  %v2012_v42 = vrot.slane %v2010_v54, 5  ;;  %v2015_v16 = vshrl.u32 %v6044_v25, 16 }
 0x185   : > { %v3179_v35 = vpack.c.b16 %v3143_v49, %v3134_v58  ;;  %v3180_v45 = vpack.c.b16 %v3144_v30, %v3135_v41  ;;  %v2149_v29 = vor.u32 %v2148_v26, %v2145_v23  ;;  %v2018_v31 = vshll.u32 %v6044_v25, 16 }
 0x186   : > { %v2157_v32 = vor.u32 %v2156_v19, %v2153_v27  ;;  %v2013_v21 = vor.u32 %v2012_v42, %v2009_v6  ;;  %v2017_v50 = vrot.slane %v2015_v16, 4  ;;  %v2078_v63 = vunpack.c.l.b16 %v1797_v37 }
 0x187   : > { %3679 = vmatmul.bf16.gmra.mxu1 %v3179_v35  ;;  %3708 = vmatmul.bf16.gmra.mxu2 %v3180_v45  ;;  %v2242_v59 = vunpack.c.l.b16 %v2149_v29  ;;  %v2248_v62 = vunpack.c.h.b16 %v2149_v29  ;;  %v2020_v13 = vrot.slane %v2018_v31, 5  ;;  %v2079_v44 = vunpack.c.l.b16 %v1798_v51  ;;  %v6342_v45 = vld [vmem:[#allocation2 + $0x54] sm:$0x8] }
 0x188   : > { %v2254_v3 = vunpack.c.l.b16 %v2157_v32  ;;  %v2260_v18 = vunpack.c.h.b16 %v2157_v32  ;;  %v2086_v15 = vpack.c.b16 %v2078_v63, %v5994_v38  ;;  %v2240_v46 = vunpack.c.l.b16 %v2013_v21 }
 0x189   : > { %v2337_v25 = vpack.c.b16 %v2242_v59, %v2118_v9  ;;  %v2342_v55 = vpack.c.b16 %v2248_v62, %v6284_v2  ;;  %v2021_v7 = vor.u32 %v2020_v13, %v2017_v50  ;;  %v2087_v22 = vpack.c.b16 %v2079_v44, %v6027_v56  ;;  %v6335_v56 = vld [vmem:[#allocation2 + $0x44] sm:$0x8]  ;;  %v1813_v50 = vld [vmem:[#allocation2 + $0x58] sm:$0xf] }
 0x18a   : > { %v2347_v54 = vpack.c.b16 %v2254_v3, %v2120_v36  ;;  %v2352_v60 = vpack.c.b16 %v2260_v18, %v6299_v8  ;;  %v2094_v24 = vrot.slane %v2086_v15, 5  ;;  %v2246_v1 = vunpack.c.h.b16 %v2013_v21 }
 0x18b   : > { %v2456_v20 = vshrl.u32 %v2337_v25, 16  ;;  %v2461_v38 = vshrl.u32 %v2342_v55, 16  ;;  %v2464_v52 = vshll.u32 %v2342_v55, 16  ;;  %v2095_v34 = vrot.slane %v2087_v22, 5 }
 0x18c   : > { %v2521_v58 = vshrl.u32 %v2347_v54, 16  ;;  %v2526_v41 = vshrl.u32 %v2352_v60, 16  ;;  %v2529_v40 = vshll.u32 %v2352_v60, 16  ;;  %v2241_v9 = vunpack.c.l.b16 %v2094_v24 }
 0x18d   : > { %v4586_v12 = vrot.slane %v2456_v20, 11  ;;  %v2463_v28 = vrot.slane %v2461_v38, 7  ;;  %v2247_v10 = vunpack.c.h.b16 %v2094_v24  ;;  %v2252_v33 = vunpack.c.l.b16 %v2021_v7 }
 0x18e   : > { %v4591_v36 = vrot.slane %v2521_v58, 11  ;;  %v2528_v61 = vrot.slane %v2526_v41, 7  ;;  %v2253_v57 = vunpack.c.l.b16 %v2095_v34  ;;  %v2258_v6 = vunpack.c.h.b16 %v2021_v7  ;;  %v5105_v58 = vld [vmem:[%s6744_s7 + $0x28] sm:$0xff] }
 0x18f   : > { %v2466_v49 = vor.u32 %v2464_v52, %v2463_v28  ;;  %v2259_v30 = vunpack.c.h.b16 %v2095_v34  ;;  %v2336_v23 = vpack.c.b16 %v2241_v9, %v2240_v46  ;;  %v2341_v26 = vpack.c.b16 %v2247_v10, %v2246_v1  ;;  %v1799_v46 = vld [vmem:[#allocation2 + $0x3c] sm:$0x1]  ;;  %v5097_v41 = vld [vmem:[%s6741_s4 + $0x228] sm:$0xff]  ;;  %4019 = vmatpush.bf16.msra.mxu2 %v5105_v58  ;;  %5127 = vmatpush.bf16.msrb.mxu3 %v5105_v58 }
 0x190   : > { %v2531_v37 = vor.u32 %v2529_v40, %v2528_v61  ;;  %v2346_v4 = vpack.c.b16 %v2253_v57, %v2252_v33  ;;  %v2122_v27 = vunpack.c.l.b16 %v6335_v56  ;;  %v6338_v19 = vunpack.c.l.b16 %v1811_v17  ;;  %5119 = vmatpush.bf16.msra.mxu1 %v5097_v41  ;;  %v5104_v61 = vld [vmem:[%s6744_s7 + $0x20] sm:$0xff]  ;;  %3890 = vmatpush.bf16.msrb.mxu0 %v5097_v41 }
 0x191   : > { %v2467_v51 = vsel %vm5971_vm7, %v4586_v12, %v2466_v49  ;;  %v2351_v42 = vpack.c.b16 %v2259_v30, %v2258_v6  ;;  %v2443_v16 = vshrl.u32 %v2336_v23, 16  ;;  %v2448_v35 = vshrl.u32 %v2341_v26, 16  ;;  %v5096_v23 = vld [vmem:[%s6741_s4 + $0x220] sm:$0xff] }
 0x192   : > { %v2532_v29 = vsel %vm5971_vm7, %v4591_v36, %v2531_v37  ;;  %v3086_v31 = vunpack.c.l.b16 %v2467_v51  ;;  %v3087_v32 = vunpack.c.h.b16 %v2467_v51  ;;  %v2451_v21 = vshll.u32 %v2341_v26, 16 }
 0x193   : > { %v3095_v63 = vunpack.c.l.b16 %v2532_v29  ;;  %v3096_v59 = vunpack.c.h.b16 %v2532_v29  ;;  %v4585_v62 = vrot.slane %v2443_v16, 11  ;;  %v2450_v13 = vrot.slane %v2448_v35, 7  ;;  %4020 = vmatpush.bf16.msra.mxu2 %v5104_v61  ;;  %5128 = vmatpush.bf16.msrb.mxu3 %v5104_v61 }
 0x194   : > { %v2508_v44 = vshrl.u32 %v2346_v4, 16  ;;  %v2513_v3 = vshrl.u32 %v2351_v42, 16  ;;  %v2516_v18 = vshll.u32 %v2351_v42, 16  ;;  %v2124_v15 = vunpack.c.l.b16 %v6342_v45  ;;  %v1800_v42 = vld [vmem:[#allocation2 + $0x4c] sm:$0x1]  ;;  %5120 = vmatpush.bf16.msra.mxu1 %v5096_v23  ;;  %3891 = vmatpush.bf16.msrb.mxu0 %v5096_v23 }
 0x195   : > { %v3158_v25 = vpack.c.b16 %v3095_v63, %v3086_v31  ;;  %v3159_v55 = vpack.c.b16 %v3096_v59, %v3087_v32  ;;  %v2453_v7 = vor.u32 %v2451_v21, %v2450_v13  ;;  %v6347_v22 = vunpack.c.l.b16 %v1813_v50  ;;  %v6373_v32 = vld [vmem:[#allocation2 + $0x64] sm:$0x8] }
 0x196   : > { %v4590_v54 = vrot.slane %v2508_v44, 11  ;;  %v2515_v60 = vrot.slane %v2513_v3, 7  ;;  %v2136_v24 = vpack.c.b16 %v6338_v19, %v6338_v19  ;;  %v2000_v1 = vpack.c.b16 %v6070_v53, %v6070_v53 }
 0x197   : > { %3838 = vmatmul.bf16.vlgmr.msra.gmra.mxu3 %v3158_v25  ;;  %3867 = vmatmul.bf16.vlgmr.msra.gmra.mxu0 %v3159_v55  ;;  %v2454_v20 = vsel %vm5971_vm7, %v4585_v62, %v2453_v7  ;;  %v2137_v38 = vpack.c.b16 %v6347_v22, %v6347_v22  ;;  %v2001_v52 = vpack.c.b16 %v6097_v39, %v6097_v39  ;;  %v2080_v34 = vunpack.c.l.b16 %v1799_v46 }
 0x198   : > { %v2518_v40 = vor.u32 %v2516_v18, %v2515_v60  ;;  %v3084_v9 = vunpack.c.l.b16 %v2454_v20  ;;  %v3085_v12 = vunpack.c.h.b16 %v2454_v20  ;;  %v2159_v28 = vshrl.u32 %v2136_v24, 16 }
 0x199   : > { %v2162_v10 = vshll.u32 %v2136_v24, 16  ;;  %v2167_v33 = vshrl.u32 %v2137_v38, 16  ;;  %v2170_v17 = vshll.u32 %v2137_v38, 16  ;;  %v2023_v36 = vshrl.u32 %v2000_v1, 16 }
 0x19a   : > { %v2519_v57 = vsel %vm5971_vm7, %v4590_v54, %v2518_v40  ;;  %v2161_v6 = vrot.slane %v2159_v28, 4  ;;  %v2026_v49 = vshll.u32 %v2000_v1, 16  ;;  %v2031_v30 = vshrl.u32 %v2001_v52, 16 }
 0x19b   : > { %v3093_v26 = vunpack.c.l.b16 %v2519_v57  ;;  %v3094_v37 = vunpack.c.h.b16 %v2519_v57  ;;  %v2164_v4 = vrot.slane %v2162_v10, 5  ;;  %v2169_v51 = vrot.slane %v2167_v33, 4  ;;  %v1815_v57 = vld [vmem:[#allocation2 + $0x68] sm:$0xf] }
 0x19c   : > { %v2172_v16 = vrot.slane %v2170_v17, 5  ;;  %v2025_v35 = vrot.slane %v2023_v36, 4  ;;  %v2028_v29 = vrot.slane %v2026_v49, 5  ;;  %v2033_v31 = vrot.slane %v2031_v30, 4 }
 0x19d   : > { %v3156_v21 = vpack.c.b16 %v3093_v26, %v3084_v9  ;;  %v3157_v50 = vpack.c.b16 %v3094_v37, %v3085_v12  ;;  %v2165_v63 = vor.u32 %v2164_v4, %v2161_v6  ;;  %v2034_v59 = vshll.u32 %v2001_v52, 16  ;;  %v6384_v6 = vld [vmem:[#allocation2 + $0x74] sm:$0x8] }
 0x19e   : > { %v2173_v62 = vor.u32 %v2172_v16, %v2169_v51  ;;  %v2029_v13 = vor.u32 %v2028_v29, %v2025_v35  ;;  %v2081_v44 = vunpack.c.l.b16 %v1800_v42  ;;  %v2088_v3 = vpack.c.b16 %v2080_v34, %v6070_v53 }
 0x19f   : > { %3780 = vmatmul.bf16.vlgmr.msrb.gmra.mxu1 %v3156_v21  ;;  %3809 = vmatmul.bf16.vlgmr.msrb.gmra.mxu2 %v3157_v50  ;;  %v2266_v18 = vunpack.c.l.b16 %v2165_v63  ;;  %v2272_v46 = vunpack.c.h.b16 %v2165_v63  ;;  %v2036_v25 = vrot.slane %v2034_v59, 5  ;;  %v2126_v55 = vunpack.c.l.b16 %v6373_v32  ;;  %v1817_v63 = vld [vmem:[#allocation2 + $0x78] sm:$0xf] }
 0x1a0   : > { %v2278_v7 = vunpack.c.l.b16 %v2173_v62  ;;  %v2284_v54 = vunpack.c.h.b16 %v2173_v62  ;;  %v2089_v60 = vpack.c.b16 %v2081_v44, %v6097_v39  ;;  %v2096_v24 = vrot.slane %v2088_v3, 5 }
 0x1a1   : > { %v2357_v1 = vpack.c.b16 %v2266_v18, %v2122_v27  ;;  %v2362_v20 = vpack.c.b16 %v2272_v46, %v6338_v19  ;;  %v2037_v53 = vor.u32 %v2036_v25, %v2033_v31  ;;  %v2264_v38 = vunpack.c.l.b16 %v2029_v13 }
 0x1a2   : > { %v2367_v52 = vpack.c.b16 %v2278_v7, %v2124_v15  ;;  %v2372_v34 = vpack.c.b16 %v2284_v54, %v6347_v22  ;;  %v2097_v58 = vrot.slane %v2089_v60, 5  ;;  %v2265_v41 = vunpack.c.l.b16 %v2096_v24 }
 0x1a3   : > { %v2586_v40 = vshrl.u32 %v2357_v1, 16  ;;  %v2591_v9 = vshrl.u32 %v2362_v20, 16  ;;  %v2594_v12 = vshll.u32 %v2362_v20, 16  ;;  %v2270_v28 = vunpack.c.h.b16 %v2029_v13  ;;  %v1801_v1 = vld [vmem:[#allocation2 + $0x5c] sm:$0x1] }
 0x1a4   : > { %v2651_v39 = vshrl.u32 %v2367_v52, 16  ;;  %v2656_v10 = vshrl.u32 %v2372_v34, 16  ;;  %v2659_v33 = vshll.u32 %v2372_v34, 16  ;;  %v2271_v56 = vunpack.c.h.b16 %v2096_v24 }
 0x1a5   : > { %v4596_v27 = vrot.slane %v2586_v40, 11  ;;  %v2593_v17 = vrot.slane %v2591_v9, 7  ;;  %v2276_v36 = vunpack.c.l.b16 %v2037_v53  ;;  %v2277_v61 = vunpack.c.l.b16 %v2097_v58  ;;  %v5103_v9 = vld [vmem:[%s6744_s7 + $0x18] sm:$0xff] }
 0x1a6   : > { %v4601_v45 = vrot.slane %v2651_v39, 11  ;;  %v2658_v15 = vrot.slane %v2656_v10, 7  ;;  %v2282_v49 = vunpack.c.h.b16 %v2037_v53  ;;  %v2283_v30 = vunpack.c.h.b16 %v2097_v58  ;;  %4021 = vmatpush.bf16.msra.mxu2 %v5103_v9  ;;  %5129 = vmatpush.bf16.msrb.mxu3 %v5103_v9 }
 0x1a7   : > { %v2596_v23 = vor.u32 %v2594_v12, %v2593_v17  ;;  %v2356_v26 = vpack.c.b16 %v2265_v41, %v2264_v38  ;;  %v2361_v37 = vpack.c.b16 %v2271_v56, %v2270_v28  ;;  %v2366_v4 = vpack.c.b16 %v2277_v61, %v2276_v36  ;;  %v5095_v12 = vld [vmem:[%s6741_s4 + $0x218] sm:$0xff]  ;;  %v5102_v61 = vld [vmem:[%s6744_s7 + $0x10] sm:$0xff] }
 0x1a8   : > { %v2661_v51 = vor.u32 %v2659_v33, %v2658_v15  ;;  %v2371_v42 = vpack.c.b16 %v2283_v30, %v2282_v49  ;;  %v6386_v16 = vunpack.c.l.b16 %v1815_v57  ;;  %v2128_v35 = vunpack.c.l.b16 %v6384_v6  ;;  %5121 = vmatpush.bf16.msra.mxu1 %v5095_v12  ;;  %v5094_v30 = vld [vmem:[%s6741_s4 + $0x210] sm:$0xff]  ;;  %3892 = vmatpush.bf16.msrb.mxu0 %v5095_v12 }
 0x1a9   : > { %v2597_v29 = vsel %vm5971_vm7, %v4596_v27, %v2596_v23  ;;  %v2573_v31 = vshrl.u32 %v2356_v26, 16  ;;  %v2578_v21 = vshrl.u32 %v2361_v37, 16  ;;  %v2581_v50 = vshll.u32 %v2361_v37, 16 }
 0x1aa   : > { %v2662_v59 = vsel %vm5971_vm7, %v4601_v45, %v2661_v51  ;;  %v3104_v62 = vunpack.c.l.b16 %v2597_v29  ;;  %v3105_v13 = vunpack.c.h.b16 %v2597_v29  ;;  %v2638_v44 = vshrl.u32 %v2366_v4, 16  ;;  %4022 = vmatpush.bf16.msra.mxu2 %v5102_v61  ;;  %5130 = vmatpush.bf16.msrb.mxu3 %v5102_v61  ;;  %v1673_v61 = vld [vmem:[#allocation2 + $0x94] sm:$0x8] }
 0x1ab   : > { %v3113_v3 = vunpack.c.l.b16 %v2662_v59  ;;  %v3114_v18 = vunpack.c.h.b16 %v2662_v59  ;;  %v4595_v46 = vrot.slane %v2573_v31, 11  ;;  %v2580_v25 = vrot.slane %v2578_v21, 7  ;;  %v1802_v21 = vld [vmem:[#allocation2 + $0x6c] sm:$0x1] }
 0x1ac   : > { %v4600_v7 = vrot.slane %v2638_v44, 11  ;;  %v2643_v54 = vshrl.u32 %v2371_v42, 16  ;;  %v2646_v60 = vshll.u32 %v2371_v42, 16  ;;  %v6393_v24 = vunpack.c.l.b16 %v1817_v63  ;;  %5122 = vmatpush.bf16.msra.mxu1 %v5094_v30  ;;  %3893 = vmatpush.bf16.msrb.mxu0 %v5094_v30 }
 0x1ad   : > { %v3167_v20 = vpack.c.b16 %v3113_v3, %v3104_v62  ;;  %v3168_v53 = vpack.c.b16 %v3114_v18, %v3105_v13  ;;  %v2583_v38 = vor.u32 %v2581_v50, %v2580_v25  ;;  %v2138_v52 = vpack.c.b16 %v6386_v16, %v6386_v16 }
 0x1ae   : > { %v2645_v34 = vrot.slane %v2643_v54, 7  ;;  %v2139_v58 = vpack.c.b16 %v6393_v24, %v6393_v24  ;;  %v2002_v41 = vpack.c.b16 %v6143_v48, %v6143_v48  ;;  %v2003_v40 = vpack.c.b16 %v6148_v14, %v6148_v14 }
 0x1af   : > { %3843 = vmatmul.bf16.gmra.mxu3 %v3167_v20  ;;  %3872 = vmatmul.bf16.gmra.mxu0 %v3168_v53  ;;  %v2584_v28 = vsel %vm5971_vm7, %v4595_v46, %v2583_v38  ;;  %v2175_v39 = vshrl.u32 %v2138_v52, 16  ;;  %v2178_v10 = vshll.u32 %v2138_v52, 16  ;;  %v2082_v33 = vunpack.c.l.b16 %v1801_v1 }
 0x1b0   : > { %v2648_v56 = vor.u32 %v2646_v60, %v2645_v34  ;;  %v3102_v27 = vunpack.c.l.b16 %v2584_v28  ;;  %v3103_v17 = vunpack.c.h.b16 %v2584_v28  ;;  %v2183_v36 = vshrl.u32 %v2139_v58, 16 }
 0x1b1   : > { %v2177_v57 = vrot.slane %v2175_v39, 4  ;;  %v2180_v45 = vrot.slane %v2178_v10, 5  ;;  %v2186_v15 = vshll.u32 %v2139_v58, 16  ;;  %v2039_v49 = vshrl.u32 %v2002_v41, 16 }
 0x1b2   : > { %v2649_v23 = vsel %vm5971_vm7, %v4600_v7, %v2648_v56  ;;  %v2185_v26 = vrot.slane %v2183_v36, 4  ;;  %v2042_v37 = vshll.u32 %v2002_v41, 16  ;;  %v2047_v4 = vshrl.u32 %v2003_v40, 16 }
 0x1b3   : > { %v3111_v51 = vunpack.c.l.b16 %v2649_v23  ;;  %v3112_v42 = vunpack.c.h.b16 %v2649_v23  ;;  %v2181_v29 = vor.u32 %v2180_v45, %v2177_v57  ;;  %v2188_v31 = vrot.slane %v2186_v15, 5  ;;  %v6427_v57 = vld [vmem:[#allocation2 + $0x84] sm:$0x8] }
 0x1b4   : > { %v2041_v50 = vrot.slane %v2039_v49, 4  ;;  %v2044_v63 = vrot.slane %v2042_v37, 5  ;;  %v2049_v59 = vrot.slane %v2047_v4, 4  ;;  %v2050_v62 = vshll.u32 %v2003_v40, 16 }
 0x1b5   : > { %v3165_v13 = vpack.c.b16 %v3111_v51, %v3102_v27  ;;  %v3166_v44 = vpack.c.b16 %v3112_v42, %v3103_v17  ;;  %v2189_v3 = vor.u32 %v2188_v31, %v2185_v26  ;;  %v2290_v18 = vunpack.c.l.b16 %v2181_v29 }
 0x1b6   : > { %v2296_v46 = vunpack.c.h.b16 %v2181_v29  ;;  %v2045_v25 = vor.u32 %v2044_v63, %v2041_v50  ;;  %v2052_v7 = vrot.slane %v2050_v62, 5  ;;  %v2083_v54 = vunpack.c.l.b16 %v1802_v21  ;;  %v1819_v63 = vld [vmem:[#allocation2 + $0x88] sm:$0xf] }
 0x1b7   : > { %3785 = vmatmul.bf16.gmra.mxu1 %v3165_v13  ;;  %3814 = vmatmul.bf16.gmra.mxu2 %v3166_v44  ;;  %v2302_v60 = vunpack.c.l.b16 %v2189_v3  ;;  %v2308_v1 = vunpack.c.h.b16 %v2189_v3  ;;  %v2377_v20 = vpack.c.b16 %v2290_v18, %v2126_v55  ;;  %v2090_v53 = vpack.c.b16 %v2082_v33, %v6143_v48  ;;  %v1821_v3 = vld [vmem:[#allocation2 + $0x98] sm:$0xf] }
 0x1b8   : > { %v2382_v38 = vpack.c.b16 %v2296_v46, %v6386_v16  ;;  %v2053_v52 = vor.u32 %v2052_v7, %v2049_v59  ;;  %v2091_v34 = vpack.c.b16 %v2083_v54, %v6148_v14  ;;  %v2288_v58 = vunpack.c.l.b16 %v2045_v25  ;;  %v1734_v54 = vld [vmem:[#allocation2 + $0x8c] sm:$0x1] }
 0x1b9   : > { %v2387_v41 = vpack.c.b16 %v2302_v60, %v2128_v35  ;;  %v2392_v40 = vpack.c.b16 %v2308_v1, %v6393_v24  ;;  %v2716_v9 = vshrl.u32 %v2377_v20, 16  ;;  %v2098_v12 = vrot.slane %v2090_v53, 5 }
 0x1ba   : > { %v2721_v28 = vshrl.u32 %v2382_v38, 16  ;;  %v2724_v39 = vshll.u32 %v2382_v38, 16  ;;  %v2099_v10 = vrot.slane %v2091_v34, 5  ;;  %v2294_v32 = vunpack.c.h.b16 %v2045_v25 }
 0x1bb   : > { %v4606_v55 = vrot.slane %v2716_v9, 11  ;;  %v2781_v56 = vshrl.u32 %v2387_v41, 16  ;;  %v2786_v48 = vshrl.u32 %v2392_v40, 16  ;;  %v2789_v33 = vshll.u32 %v2392_v40, 16 }
 0x1bc   : > { %v2723_v27 = vrot.slane %v2721_v28, 7  ;;  %v2289_v17 = vunpack.c.l.b16 %v2098_v12  ;;  %v2295_v36 = vunpack.c.h.b16 %v2098_v12  ;;  %v2300_v14 = vunpack.c.l.b16 %v2053_v52 }
 0x1bd   : > { %v4611_v6 = vrot.slane %v2781_v56, 11  ;;  %v2788_v35 = vrot.slane %v2786_v48, 7  ;;  %v2301_v45 = vunpack.c.l.b16 %v2099_v10  ;;  %v2306_v15 = vunpack.c.h.b16 %v2053_v52 }
 0x1be   : > { %v2726_v49 = vor.u32 %v2724_v39, %v2723_v27  ;;  %v2307_v30 = vunpack.c.h.b16 %v2099_v10  ;;  %v2376_v23 = vpack.c.b16 %v2289_v17, %v2288_v58  ;;  %v2381_v26 = vpack.c.b16 %v2295_v36, %v2294_v32  ;;  %v5101_v32 = vld [vmem:[%s6744_s7 + $0x8] sm:$0xff] }
 0x1bf   : > { %v2791_v37 = vor.u32 %v2789_v33, %v2788_v35  ;;  %v2386_v4 = vpack.c.b16 %v2301_v45, %v2300_v14  ;;  %v1674_v51 = vsel %vm5769_vm5, 0, %v1673_v61  ;;  %v2130_v42 = vunpack.c.l.b16 %v6427_v57  ;;  %4023 = vmatpush.bf16.msra.mxu2 %v5101_v32  ;;  %v5100_v35 = vld [vmem:[%s6744_s7] sm:$0xff]  ;;  %5131 = vmatpush.bf16.msrb.mxu3 %v5101_v32 }
 0x1c0   : > { %v2727_v29 = vsel %vm5971_vm7, %v4606_v55, %v2726_v49  ;;  %v2391_v31 = vpack.c.b16 %v2307_v30, %v2306_v15  ;;  %v2703_v21 = vshrl.u32 %v2376_v23, 16  ;;  %v2708_v50 = vshrl.u32 %v2381_v26, 16  ;;  %1675 = vst [vmem:[#allocation2 + $0x94] sm:$0x8] %v1674_v51  ;;  %v5093_v55 = vld [vmem:[%s6741_s4 + $0x208] sm:$0xff] }
 0x1c1   : > { %v2792_v59 = vsel %vm5971_vm7, %v4611_v6, %v2791_v37  ;;  %v3122_v62 = vunpack.c.l.b16 %v2727_v29  ;;  %v3123_v13 = vunpack.c.h.b16 %v2727_v29  ;;  %v2711_v44 = vshll.u32 %v2381_v26, 16  ;;  %5123 = vmatpush.bf16.msra.mxu1 %v5093_v55  ;;  %3894 = vmatpush.bf16.msrb.mxu0 %v5093_v55  ;;  %v1803_v51 = vld [vmem:[#allocation2 + $0x7c] sm:$0x1] }
 0x1c2   : > { %v3131_v18 = vunpack.c.l.b16 %v2792_v59  ;;  %v3132_v46 = vunpack.c.h.b16 %v2792_v59  ;;  %v4605_v25 = vrot.slane %v2703_v21, 11  ;;  %v2710_v7 = vrot.slane %v2708_v50, 7 }
 0x1c3   : > { %v2768_v60 = vshrl.u32 %v2386_v4, 16  ;;  %v2773_v1 = vshrl.u32 %v2391_v31, 16  ;;  %v2776_v20 = vshll.u32 %v2391_v31, 16  ;;  %v6436_v53 = vunpack.c.l.b16 %v1819_v63  ;;  %4024 = vmatpush.bf16.msra.mxu2 %v5100_v35  ;;  %5132 = vmatpush.bf16.msrb.mxu3 %v5100_v35 }
 0x1c4   : > { %v3176_v38 = vpack.c.b16 %v3131_v18, %v3122_v62  ;;  %v3177_v52 = vpack.c.b16 %v3132_v46, %v3123_v13  ;;  %v2713_v34 = vor.u32 %v2711_v44, %v2710_v7  ;;  %v6438_v58 = vunpack.c.l.b16 %v1821_v3  ;;  %v6468_v7 = vpop.f32.mrf.mxu1 }
 0x1c5   : > { %v4610_v41 = vrot.slane %v2768_v60, 11  ;;  %v2775_v40 = vrot.slane %v2773_v1, 7  ;;  %v2140_v9 = vpack.c.b16 %v6436_v53, %v6436_v53  ;;  %v1735_v12 = vsel %vm5731_vm2, 0, %v1734_v54  ;;  %5124 = vmatpush.bf16.msra.mxu1 %v5092_v5  ;;  %3895 = vmatpush.bf16.msrb.mxu0 %v5092_v5  ;;  %v1822_v5 = vld [vmem:[#allocation2 + $0x2c] sm:$0x1] }
 0x1c6   : > { %3848 = vmatmul.bf16.gmra.mxu3 %v3176_v38  ;;  %3877 = vmatmul.bf16.gmra.mxu0 %v3177_v52  ;;  %v2714_v28 = vsel %vm5971_vm7, %v4605_v25, %v2713_v34  ;;  %v2141_v39 = vpack.c.b16 %v6438_v58, %v6438_v58  ;;  %1736 = vst [vmem:[#allocation2 + $0x8c] sm:$0x1] %v1735_v12  ;;  %v2084_v25 = vunpack.c.l.b16 %v1803_v51  ;;  %v6470_v38 = vpop.f32.mrf.mxu0  ;;  %v6478_v51 = vpop.f32.mrf.mxu3 }
 0x1c7   : > { %v2004_v10 = vpack.c.b16 %v6219_v11, %v6219_v11  ;;  %v2778_v56 = vor.u32 %v2776_v20, %v2775_v40  ;;  %v3120_v48 = vunpack.c.l.b16 %v2714_v28  ;;  %v3121_v33 = vunpack.c.h.b16 %v2714_v28  ;;  %v1707_v27 = vld [vmem:[#allocation2 + $0x94] sm:$0x8] }
 0x1c8   : > { %v2191_v17 = vshrl.u32 %v2140_v9, 16  ;;  %v1708_v36 = vsel %vm5769_vm5, 0, %v1707_v27  ;;  %v2194_v14 = vshll.u32 %v2140_v9, 16  ;;  %v2199_v61 = vshrl.u32 %v2141_v39, 16 }
 0x1c9   : > { %v2202_v6 = vshll.u32 %v2141_v39, 16  ;;  %v2779_v45 = vsel %vm5971_vm7, %v4610_v41, %v2778_v56  ;;  %1709 = vst [vmem:[#allocation2 + $0x94] sm:$0x8] %v1708_v36  ;;  %v2005_v49 = vpack.c.b16 %v6221_v0, %v6221_v0  ;;  %v2055_v30 = vshrl.u32 %v2004_v10, 16 }
 0x1ca   : > { %v2193_v15 = vrot.slane %v2191_v17, 4  ;;  %v3129_v23 = vunpack.c.l.b16 %v2779_v45  ;;  %v3130_v26 = vunpack.c.h.b16 %v2779_v45  ;;  %v2196_v37 = vrot.slane %v2194_v14, 5 }
 0x1cb   : > { %v2201_v4 = vrot.slane %v2199_v61, 4  ;;  %v2204_v29 = vrot.slane %v2202_v6, 5  ;;  %v2057_v31 = vrot.slane %v2055_v30, 4  ;;  %v2058_v21 = vshll.u32 %v2004_v10, 16 }
 0x1cc   : > { %v2063_v50 = vshrl.u32 %v2005_v49, 16  ;;  %v3174_v63 = vpack.c.b16 %v3129_v23, %v3120_v48  ;;  %v3175_v59 = vpack.c.b16 %v3130_v26, %v3121_v33  ;;  %v2197_v62 = vor.u32 %v2196_v37, %v2193_v15 }
 0x1cd   : > { %v2066_v13 = vshll.u32 %v2005_v49, 16  ;;  %v2205_v44 = vor.u32 %v2204_v29, %v2201_v4  ;;  %v1804_v3 = vld [vmem:[#allocation2 + $0x8c] sm:$0x1]  ;;  %v2060_v18 = vrot.slane %v2058_v21, 5  ;;  %v2092_v40 = vpack.c.b16 %v2084_v25, %v6219_v11  ;;  %v3694_v29 = vpop.f32.mrf.mxu2 }
 0x1ce   : > { %v2065_v46 = vrot.slane %v2063_v50, 4  ;;  %3790 = vmatmul.bf16.gmra.mxu1 %v3174_v63  ;;  %3819 = vmatmul.bf16.gmra.mxu2 %v3175_v59  ;;  %v2314_v54 = vunpack.c.l.b16 %v2197_v62  ;;  %v2320_v60 = vunpack.c.h.b16 %v2197_v62  ;;  %v2085_v20 = vunpack.c.l.b16 %v1804_v3  ;;  %v6480_v59 = vpop.f32.mrf.mxu1 }
 0x1cf   : > { %v2068_v1 = vrot.slane %v2066_v13, 5  ;;  %v2326_v52 = vunpack.c.l.b16 %v2205_v44  ;;  %v2332_v34 = vunpack.c.h.b16 %v2205_v44  ;;  %v2061_v41 = vor.u32 %v2060_v18, %v2057_v31  ;;  %v6484_v18 = vpop.f32.mrf.mxu0 }
 0x1d0   : > { %v1820_v9 = vld [vmem:[#allocation2 + $0x94] sm:$0x8]  ;;  %v2397_v12 = vpack.c.b16 %v2314_v54, %v2130_v42  ;;  %v2402_v28 = vpack.c.b16 %v2320_v60, %v6436_v53  ;;  %v2093_v10 = vpack.c.b16 %v2085_v20, %v6221_v0  ;;  %v2100_v56 = vrot.slane %v2092_v40, 5 }
 0x1d1   : > { %v2069_v39 = vor.u32 %v2068_v1, %v2065_v46  ;;  %v2132_v32 = vunpack.c.l.b16 %v1820_v9  ;;  %v2412_v55 = vpack.c.b16 %v2332_v34, %v6438_v58  ;;  %v2312_v48 = vunpack.c.l.b16 %v2061_v41  ;;  %v1823_v1 = vld [vmem:[#allocation2 + $0x3c] sm:$0x1] }
 0x1d2   : > { %v2846_v33 = vshrl.u32 %v2397_v12, 16  ;;  %v2851_v27 = vshrl.u32 %v2402_v28, 16  ;;  %v2854_v17 = vshll.u32 %v2402_v28, 16  ;;  %v2101_v36 = vrot.slane %v2093_v10, 5 }
 0x1d3   : > { %v2407_v14 = vpack.c.b16 %v2326_v52, %v2132_v32  ;;  %v2916_v11 = vshrl.u32 %v2412_v55, 16  ;;  %v2919_v61 = vshll.u32 %v2412_v55, 16  ;;  %v2313_v6 = vunpack.c.l.b16 %v2100_v56 }
 0x1d4   : > { %v4616_v57 = vrot.slane %v2846_v33, 11  ;;  %v2853_v42 = vrot.slane %v2851_v27, 7  ;;  %v2318_v35 = vunpack.c.h.b16 %v2061_v41  ;;  %v2319_v45 = vunpack.c.h.b16 %v2100_v56  ;;  %v1824_v41 = vld [vmem:[#allocation2 + $0x4c] sm:$0x1] }
 0x1d5   : > { %v2911_v15 = vshrl.u32 %v2407_v14, 16  ;;  %v2918_v49 = vrot.slane %v2916_v11, 7  ;;  %v2324_v0 = vunpack.c.l.b16 %v2069_v39  ;;  %v2325_v30 = vunpack.c.l.b16 %v2101_v36 }
 0x1d6   : > { %v2856_v23 = vor.u32 %v2854_v17, %v2853_v42  ;;  %v2330_v26 = vunpack.c.h.b16 %v2069_v39  ;;  %v2331_v37 = vunpack.c.h.b16 %v2101_v36  ;;  %v2396_v4 = vpack.c.b16 %v2313_v6, %v2312_v48  ;;  %v1825_v39 = vld [vmem:[#allocation2 + $0x5c] sm:$0x1]  ;;  %v6490_v6 = vpop.f32.mrf.mxu3 }
 0x1d7   : > { %v4621_v31 = vrot.slane %v2911_v15, 11  ;;  %v2921_v21 = vor.u32 %v2919_v61, %v2918_v49  ;;  %v2401_v50 = vpack.c.b16 %v2319_v45, %v2318_v35  ;;  %v2406_v63 = vpack.c.b16 %v2325_v30, %v2324_v0 }
 0x1d8   : > { %v2857_v62 = vsel %vm5971_vm7, %v4616_v57, %v2856_v23  ;;  %v2411_v13 = vpack.c.b16 %v2331_v37, %v2330_v26  ;;  %v2833_v44 = vshrl.u32 %v2396_v4, 16  ;;  %v2214_v3 = vunpack.c.l.b16 %v1822_v5  ;;  %v6492_v57 = vpop.f32.mrf.mxu2 }
 0x1d9   : > { %v2922_v46 = vsel %vm5971_vm7, %v4621_v31, %v2921_v21  ;;  %v3140_v25 = vunpack.c.l.b16 %v2857_v62  ;;  %v3141_v54 = vunpack.c.h.b16 %v2857_v62  ;;  %v2838_v60 = vshrl.u32 %v2401_v50, 16 }
 0x1da   : > { %v3149_v20 = vunpack.c.l.b16 %v2922_v46  ;;  %v3150_v52 = vunpack.c.h.b16 %v2922_v46  ;;  %v4615_v34 = vrot.slane %v2833_v44, 11  ;;  %v2841_v9 = vshll.u32 %v2401_v50, 16  ;;  %v6504_v50 = vld [vmem:[%s5393_s26 + $0x19] ss:$2 sm:$0xff] }
 0x1db   : > { %v2840_v40 = vrot.slane %v2838_v60, 7  ;;  %v2898_v12 = vshrl.u32 %v2406_v63, 16  ;;  %v2903_v28 = vshrl.u32 %v2411_v13, 16  ;;  %v2215_v55 = vunpack.c.l.b16 %v1823_v1 }
 0x1dc   : > { %v3185_v10 = vpack.c.b16 %v3149_v20, %v3140_v25  ;;  %v3186_v32 = vpack.c.b16 %v3150_v52, %v3141_v54  ;;  %v2222_v56 = vpack.c.b16 %v2214_v3, %v6284_v2  ;;  %v2906_v27 = vshll.u32 %v2411_v13, 16  ;;  %v6498_v30 = vpop.f32.mrf.mxu1 }
 0x1dd   : > { %v2843_v48 = vor.u32 %v2841_v9, %v2840_v40  ;;  %v2905_v33 = vrot.slane %v2903_v28, 7  ;;  %v2216_v17 = vunpack.c.l.b16 %v1824_v41  ;;  %v4620_v36 = vrot.slane %v2898_v12, 11 }
 0x1de   : > { %3853 = vmatmul.bf16.gmra.mxu3 %v3185_v10  ;;  %3882 = vmatmul.bf16.gmra.mxu0 %v3186_v32  ;;  %v2223_v14 = vpack.c.b16 %v2215_v55, %v6299_v8  ;;  %v2230_v11 = vrot.slane %v2222_v56, 5  ;;  %v2217_v61 = vunpack.c.l.b16 %v1825_v39  ;;  %v3695_v45 = vadd.f32 %v3694_v29, %v6468_v7  ;;  %v6507_v7 = vld [vmem:[%s5393_s26 + $0x49] ss:$2 sm:$0xff]  ;;  %v6509_v29 = vpop.f32.mrf.mxu0  ;;  %v3728_v9 = vpop.f32.mrf.mxu3 }
 0x1df   : > { %v2844_v42 = vsel %vm5971_vm7, %v4615_v34, %v2843_v48  ;;  %v2908_v35 = vor.u32 %v2906_v27, %v2905_v33  ;;  %v2224_v2 = vpack.c.b16 %v2216_v17, %v6338_v19  ;;  %v3949_v20 = vpack.c.bf16 %v6507_v7, %v6504_v50 }
 0x1e0   : > { %v3138_v15 = vunpack.c.l.b16 %v2844_v42  ;;  %v3139_v49 = vunpack.c.h.b16 %v2844_v42  ;;  %v2231_v0 = vrot.slane %v2223_v14, 5  ;;  %v2243_v8 = vunpack.c.l.b16 %v2230_v11 }
 0x1e1   : > { %v2909_v5 = vsel %vm5971_vm7, %v4620_v36, %v2908_v35  ;;  %v2249_v23 = vunpack.c.h.b16 %v2230_v11  ;;  %v2225_v26 = vpack.c.b16 %v2217_v61, %v6347_v22  ;;  %v2232_v37 = vrot.slane %v2224_v2, 5  ;;  %v1826_v2 = vld [vmem:[#allocation2 + $0x6c] sm:$0x1] }
 0x1e2   : > { %v3147_v4 = vunpack.c.l.b16 %v2909_v5  ;;  %v3148_v31 = vunpack.c.h.b16 %v2909_v5  ;;  %v2255_v21 = vunpack.c.l.b16 %v2231_v0  ;;  %v2261_v19 = vunpack.c.h.b16 %v2231_v0  ;;  %v3699_v12 = vpop.f32.mrf.mxu2 }
 0x1e3   : > { %v2338_v63 = vpack.c.b16 %v2243_v8, %v2243_v8  ;;  %v2343_v62 = vpack.c.b16 %v2249_v23, %v2249_v23  ;;  %v2233_v13 = vrot.slane %v2225_v26, 5  ;;  %v2267_v44 = vunpack.c.l.b16 %v2232_v37  ;;  %v1827_v23 = vld [vmem:[#allocation2 + $0x7c] sm:$0x1] }
 0x1e4   : > { %v3183_v3 = vpack.c.b16 %v3147_v4, %v3138_v15  ;;  %v3184_v46 = vpack.c.b16 %v3148_v31, %v3139_v49  ;;  %v2348_v25 = vpack.c.b16 %v2255_v21, %v2255_v21  ;;  %v2353_v54 = vpack.c.b16 %v2261_v19, %v2261_v19  ;;  %v3672_v15 = vpop.f32.mrf.mxu1 }
 0x1e5   : > { %v2469_v22 = vshrl.u32 %v2338_v63, 16  ;;  %v2474_v60 = vshrl.u32 %v2343_v62, 16  ;;  %v2273_v1 = vunpack.c.h.b16 %v2232_v37  ;;  %v2477_v52 = vshll.u32 %v2343_v62, 16  ;;  %v4917_v62 = vld [vmem:[%s5393_s26 + $0x139] ss:$2 sm:$0xff] }
 0x1e6   : > { %3795 = vmatmul.bf16.gmra.mxu1 %v3183_v3  ;;  %3824 = vmatmul.bf16.gmra.mxu2 %v3184_v46  ;;  %v2534_v34 = vshrl.u32 %v2348_v25, 16  ;;  %v2539_v41 = vshrl.u32 %v2353_v54, 16  ;;  %v2279_v40 = vunpack.c.l.b16 %v2233_v13  ;;  %v2542_v39 = vshll.u32 %v2353_v54, 16  ;;  %v6520_v4 = vpop.f32.mrf.mxu0 }
 0x1e7   : > { %v2476_v28 = vrot.slane %v2474_v60, 7  ;;  %v2285_v10 = vunpack.c.h.b16 %v2233_v13  ;;  %v2358_v32 = vpack.c.b16 %v2267_v44, %v2267_v44  ;;  %v4587_v55 = vrot.slane %v2469_v22, 11  ;;  %v4918_v13 = vld [vmem:[%s5393_s26 + $0x169] ss:$2 sm:$0xff] }
 0x1e8   : > { %v2541_v56 = vrot.slane %v2539_v41, 7  ;;  %v2363_v48 = vpack.c.b16 %v2273_v1, %v2273_v1  ;;  %v2368_v33 = vpack.c.b16 %v2279_v40, %v2279_v40  ;;  %v6514_v14 = vadd.f32 %v6478_v51, %v3695_v45  ;;  %v1677_v41 = vld [vmem:[#allocation2 + $0x9c] sm:$0x1]  ;;  %v1828_v40 = vld [vmem:[#allocation2 + $0x8c] sm:$0x1] }
 0x1e9   : > { %v2479_v27 = vor.u32 %v2477_v52, %v2476_v28  ;;  %v2373_v17 = vpack.c.b16 %v2285_v10, %v2285_v10  ;;  %v2599_v36 = vshrl.u32 %v2358_v32, 16  ;;  %v4592_v11 = vrot.slane %v2534_v34, 11  ;;  %v3730_v34 = vpop.f32.mrf.mxu3 }
 0x1ea   : > { %v2544_v61 = vor.u32 %v2542_v39, %v2541_v56  ;;  %v2604_v42 = vshrl.u32 %v2363_v48, 16  ;;  %v2664_v35 = vshrl.u32 %v2368_v33, 16  ;;  %v2607_v8 = vshll.u32 %v2363_v48, 16  ;;  %v3701_v54 = vpop.f32.mrf.mxu2 }
 0x1eb   : > { %v2480_v49 = vsel %vm5971_vm7, %v4587_v55, %v2479_v27  ;;  %v4597_v0 = vrot.slane %v2599_v36, 11  ;;  %v2669_v5 = vshrl.u32 %v2373_v17, 16  ;;  %v2672_v37 = vshll.u32 %v2373_v17, 16 }
 0x1ec   : > { %v2545_v26 = vsel %vm5971_vm7, %v4592_v11, %v2544_v61  ;;  %v3088_v51 = vunpack.c.l.b16 %v2480_v49  ;;  %v2606_v45 = vrot.slane %v2604_v42, 7  ;;  %v3697_v19 = vadd.f32 %v6492_v57, %v6480_v59 }
 0x1ed   : > { %v3097_v31 = vunpack.c.l.b16 %v2545_v26  ;;  %v2671_v21 = vrot.slane %v2669_v5, 7  ;;  %v2218_v63 = vunpack.c.l.b16 %v1826_v2  ;;  %v4602_v3 = vrot.slane %v2664_v35, 11 }
 0x1ee   : > { %v2609_v44 = vor.u32 %v2607_v8, %v2606_v45  ;;  %v2219_v46 = vunpack.c.l.b16 %v1827_v23  ;;  %v3700_v25 = vadd.f32 %v3699_v12, %v6498_v30  ;;  %v6528_v1 = vadd.f32 %v6490_v6, %v3697_v19 }
 0x1ef   : > { %v3160_v22 = vpack.c.b16 %v3097_v31, %v3088_v51  ;;  %v2674_v60 = vor.u32 %v2672_v37, %v2671_v21  ;;  %v2226_v52 = vpack.c.b16 %v2218_v63, %v6386_v16  ;;  %v3952_v39 = vpack.c.bf16 %v4918_v13, %v4917_v62 }
 0x1f0   : > { %v2610_v59 = vsel %vm5971_vm7, %v4597_v0, %v2609_v44  ;;  %v2227_v57 = vpack.c.b16 %v2219_v46, %v6393_v24  ;;  %v6534_v28 = vadd.f32 %v3728_v9, %v3700_v25  ;;  %v3702_v10 = vadd.f32 %v3701_v54, %v3672_v15  ;;  %v6546_v15 = vpop.f32.mrf.mxu0  ;;  %v4913_v25 = vld [vmem:[%s5393_s26 + $0x79] ss:$2 sm:$0xff]  ;;  %v4914_v54 = vld [vmem:[%s5393_s26 + $0xa9] ss:$2 sm:$0xff] }
 0x1f1   : > { %3896 = vmatmul.bf16.vlgmr.msrb.gmra.mxu0 %v3160_v22  ;;  %v2675_v30 = vsel %vm5971_vm7, %v4602_v3, %v2674_v60  ;;  %v3106_v12 = vunpack.c.l.b16 %v2610_v59  ;;  %v2234_v6 = vrot.slane %v2226_v52, 5  ;;  %4040 = vmatmul.bf16.vlgmr.msrb.gmra.mxu3 %v3952_v39  ;;  %v1678_v55 = vsel %vm5731_vm2, 0, %v1677_v41  ;;  %v3733_v45 = vpop.f32.mrf.mxu3 }
 0x1f2   : > { %v3115_v32 = vunpack.c.l.b16 %v2675_v30  ;;  %v2235_v16 = vrot.slane %v2227_v57, 5  ;;  %v2220_v56 = vunpack.c.l.b16 %v1828_v40  ;;  %v6540_v24 = vadd.f32 %v3730_v34, %v3702_v10  ;;  %1679 = vst [vmem:[#allocation2 + $0x9c] sm:$0x1] %v1678_v55  ;;  %v3675_v36 = vpop.f32.mrf.mxu1 }
 0x1f3   : > { %v2291_v48 = vunpack.c.l.b16 %v2234_v6  ;;  %v2297_v33 = vunpack.c.h.b16 %v2234_v6  ;;  %v6550_v37 = vadd.f32 %v6470_v38, %v6514_v14  ;;  %v3950_v40 = vpack.c.bf16 %v4914_v54, %v4913_v25 }
 0x1f4   : > { %v3169_v9 = vpack.c.b16 %v3115_v32, %v3106_v12  ;;  %v2303_v27 = vunpack.c.l.b16 %v2235_v16  ;;  %v2309_v17 = vunpack.c.h.b16 %v2235_v16  ;;  %v2228_v11 = vpack.c.b16 %v2220_v56, %v6436_v53 }
 0x1f5   : > { %v2378_v61 = vpack.c.b16 %v2291_v48, %v2291_v48  ;;  %v2383_v42 = vpack.c.b16 %v2297_v33, %v2297_v33  ;;  %v6566_v32 = vadd.f32 %v6484_v18, %v6528_v1 }
 0x1f6   : > { %3901 = vmatmul.bf16.vlgmr.msra.gmra.mxu1 %v3169_v9  ;;  %4025 = vmatmul.bf16.vlgmr.msra.gmra.mxu2 %v3949_v20  ;;  %v2388_v35 = vpack.c.b16 %v2303_v27, %v2303_v27  ;;  %v2393_v2 = vpack.c.b16 %v2309_v17, %v2309_v17  ;;  %v2236_v5 = vrot.slane %v2228_v11, 5 }
 0x1f7   : > { %v2734_v49 = vshrl.u32 %v2383_v42, 16  ;;  %v2729_v23 = vshrl.u32 %v2378_v61, 16  ;;  %v2737_v51 = vshll.u32 %v2383_v42, 16 }
 0x1f8   : > { %v2794_v0 = vshrl.u32 %v2388_v35, 16  ;;  %v2799_v8 = vshrl.u32 %v2393_v2, 16  ;;  %v3704_v53 = vpop.f32.mrf.mxu2  ;;  %v2802_v7 = vshll.u32 %v2393_v2, 16  ;;  %v2321_v13 = vunpack.c.h.b16 %v2236_v5  ;;  %v6562_v60 = vpop.f32.mrf.mxu0 }
 0x1f9   : > { %v2736_v26 = vrot.slane %v2734_v49, 7  ;;  %v1737_v20 = vld [vmem:[#allocation2 + $0x9c] sm:$0x1]  ;;  %v3705_v19 = vadd.f32 %v3704_v53, %v3675_v36  ;;  %v4607_v44 = vrot.slane %v2729_v23, 11  ;;  %v3735_v52 = vpop.f32.mrf.mxu3  ;;  %v2315_v59 = vunpack.c.l.b16 %v2236_v5 }
 0x1fa   : > { %v2801_v50 = vrot.slane %v2799_v8, 7  ;;  %v1738_v21 = vsel %vm5731_vm2, 0, %v1737_v20  ;;  %v4612_v63 = vrot.slane %v2794_v0, 11  ;;  %v3677_v14 = vpop.f32.mrf.mxu1  ;;  %v2403_v43 = vpack.c.b16 %v2321_v13, %v2321_v13 }
 0x1fb   : > { %v2739_v31 = vor.u32 %v2737_v51, %v2736_v26  ;;  %1739 = vst [vmem:[#allocation2 + $0x9c] sm:$0x1] %v1738_v21  ;;  %v6554_v3 = vadd.f32 %v3733_v45, %v3705_v19  ;;  %v2398_v55 = vpack.c.b16 %v2315_v59, %v2315_v59  ;;  %v4915_v26 = vld [vmem:[%s5393_s26 + $0xd9] ss:$2 sm:$0xff]  ;;  %v4916_v51 = vld [vmem:[%s5393_s26 + $0x109] ss:$2 sm:$0xff] }
 0x1fc   : > { %v2804_v62 = vor.u32 %v2802_v7, %v2801_v50  ;;  %v2864_v6 = vshrl.u32 %v2403_v43, 16  ;;  %v2867_v36 = vshll.u32 %v2403_v43, 16  ;;  %v3951_v20 = vpack.c.bf16 %v4916_v51, %v4915_v26  ;;  %v6628_v51 = vld [vmem:[%s6745_s8] ss:$0 sm:$0xff]  ;;  %s5108_s26 = sshll.u32 %s5325_s17, 6  ;;  %s4107_s17 = sshll.u32 %s6651_s25, 4  ;;  %s4108_s17 = int_to_ptr.vmem [resolvable:$true] %s4107_s17 }
 0x1fd   : > { %v2740_v46 = vsel %vm5971_vm7, %v4607_v44, %v2739_v31  ;;  %v2859_v17 = vshrl.u32 %v2398_v55, 16  ;;  %v6585_v25 = vadd.f32 %v6546_v15, %v6554_v3  ;;  %s4106_s28 = scalar_lea.hbm %s6747_s10, %s5108_s26 }
 0x1fe   : > { %v2805_v38 = vsel %vm5971_vm7, %v4612_v63, %v2804_v62  ;;  %v3124_v41 = vunpack.c.l.b16 %v2740_v46  ;;  %v2866_v48 = vrot.slane %v2864_v6, 7  ;;  %s4109_s29 = sshll.u32 %s4106_s28, 4  ;;  %s4110_s29 = int_to_ptr.hbm [resolvable:$true] %s4109_s29 }
 0x1ff   : > { %v3133_v22 = vunpack.c.l.b16 %v2805_v38  ;;  %v4617_v0 = vrot.slane %v2859_v17, 11  ;;  %s5196_s11 = sshra.s32 %s4110_s29, 4  ;;  %s5197_s11 = int_to_ptr.hbm [resolvable:$true] %s5196_s11 }
 0x200   : > { %v3706_v34 = vpop.f32.mrf.mxu2  ;;  %v3767_v42 = vpop.f32.mrf.mxu0  ;;  %v2869_v2 = vor.u32 %v2867_v36, %v2866_v48  ;;  %s5198_s12 = scalar_lea.hbm %s5197_s11, 64  ;;  %p5203_p0 = scmp.lt.s32.totalorder %s5197_s11, %s6747_s10 }
 0x201   : > { %v3707_v57 = vadd.f32 %v3706_v34, %v3677_v14  ;;  %v3178_v30 = vpack.c.b16 %v3133_v22, %v3124_v41  ;;  %v6581_v14 = vadd.f32 %v6520_v4, %v6540_v24  ;;  %p5199_p11 = scmp.ne.s32.totalorder %s5197_s11, %s5198_s12  ;;  %p5204_p1 = scmp.lt.s32.totalorder %s5202_s18, %s5198_s12 }
 0x202   : > { %v1829_v39 = vld [vmem:[#allocation2 + $0x9c] sm:$0x1]  ;;  %v2870_v45 = vsel %vm5971_vm7, %v4617_v0, %v2869_v2 }
 0x203   : > { %v2221_v12 = vunpack.c.l.b16 %v1829_v39  ;;  %v3736_v10 = vadd.f32 %v3735_v52, %v3707_v57  ;;  %v3142_v19 = vunpack.c.l.b16 %v2870_v45  ;;  %p5200_p12 = pnand %p5199_p11, %p5342_p5  ;;  %p5205_p2 = por %p5204_p1, %p5203_p0 }
 0x204   : > { %v3680_v33 = vpop.f32.mrf.mxu1 }
 0x205   : > { %v2229_v16 = vpack.c.b16 %v2221_v12, %v6438_v58  ;;  %v3738_v11 = vpop.f32.mrf.mxu3  ;;  %v6571_v58 = vadd.f32 %v6509_v29, %v6534_v28  ;;  %v6590_v34 = vadd.f32 %v6562_v60, %v3736_v10  ;;  %p5201_p13 = pneg %p5200_p12 }
 0x206   : > { %3906 = vmatmul.bf16.gmra.mxu1 %v3178_v30  ;;  %4030 = vmatmul.bf16.gmra.mxu2 %v3950_v40 }
 0x207   : > { %v2237_v56 = vrot.slane %v2229_v16, 5  ;;  %p5206_p3 = pnand %p5205_p2, %p5201_p13 }
 0x208   : > { %v3769_v13 = vpop.f32.mrf.mxu0 }
 0x209   : > { %v2327_v9 = vunpack.c.l.b16 %v2237_v56  ;;  %v2333_v27 = vunpack.c.h.b16 %v2237_v56 }
 0x20a   : > { %v3709_v61 = vpop.f32.mrf.mxu2 }
 0x20b   : > { %v3710_v35 = vadd.f32 %v3709_v61, %v3680_v33  ;;  %v2408_v18 = vpack.c.b16 %v2327_v9, %v2327_v9  ;;  %v2413_v1 = vpack.c.b16 %v2333_v27, %v2333_v27 }
 0x20c   : > { %v3682_v31 = vpop.f32.mrf.mxu1 }
 0x20d   : > { %v3739_v49 = vadd.f32 %v3738_v11, %v3710_v35  ;;  %v2924_v8 = vshrl.u32 %v2408_v18, 16  ;;  %v2929_v5 = vshrl.u32 %v2413_v1, 16  ;;  %v2932_v23 = vshll.u32 %v2413_v1, 16  ;;  %v3740_v28 = vpop.f32.mrf.mxu3 }
 0x20f   : > { %v4622_v53 = vrot.slane %v2924_v8, 11  ;;  %v2931_v50 = vrot.slane %v2929_v5, 7  ;;  %v6592_v59 = vadd.f32 %v3767_v42, %v3739_v49 }
 0x211   : > { %v2934_v7 = vor.u32 %v2932_v23, %v2931_v50  ;;  %v6640_v50 = vld [vmem:[%s6746_s9] ss:$0 sm:$0xff] }
 0x212   : > { %v3711_v21 = vpop.f32.mrf.mxu2 }
 0x213   : > { %v3712_v63 = vadd.f32 %v3711_v21, %v3682_v31  ;;  %v2935_v29 = vsel %vm5971_vm7, %v4622_v53, %v2934_v7  ;;  %v6635_v53 = vld [vmem:[%s6743_s6] ss:$0 sm:$0xff] }
 0x214   : > { %v3151_v62 = vunpack.c.l.b16 %v2935_v29  ;;  %v3868_v46 = vpop.f32.mrf.mxu0 }
 0x215   : > { %v3741_v44 = vadd.f32 %v3740_v28, %v3712_v63 }
 0x216   : > { %4035 = vmatmul.bf16.gmra.mxu2 %v3951_v20  ;;  %v3187_v38 = vpack.c.b16 %v3151_v62, %v3142_v19 }
 0x217   : > { %v6598_v30 = vadd.f32 %v3769_v13, %v3741_v44 }
 0x218   : > { %3911 = vmatmul.bf16.gmra.mxu1 %v3187_v38 }
 0x21a   : > { %v3839_v57 = vpop.f32.mrf.mxu3 }
 0x21c   : > { %v3781_v54 = vpop.f32.mrf.mxu1  ;;  %v3870_v22 = vpop.f32.mrf.mxu0 }
 0x21d   : > { %v3782_v17 = vadd.f32 %v3781_v54, %v6550_v37  ;;  %v6621_v37 = vld [vmem:[%s6742_s5] ss:$0 sm:$0xff] }
 0x222   : > { %v3810_v47 = vpop.f32.mrf.mxu2  ;;  %v3841_v12 = vpop.f32.mrf.mxu3 }
 0x223   : > { %v3811_v11 = vadd.f32 %v3810_v47, %v3782_v17 }
 0x224   : > { %v3783_v43 = vpop.f32.mrf.mxu1 }
 0x225   : > { %v3840_v35 = vadd.f32 %v3839_v57, %v3811_v11  ;;  %v3784_v1 = vadd.f32 %v3783_v43, %v6566_v32 }
 0x227   : > { %v3869_v0 = vadd.f32 %v3868_v46, %v3840_v35 }
 0x22a   : > { %v3812_v41 = vpop.f32.mrf.mxu2 }
 0x22b   : > { %v3813_v49 = vadd.f32 %v3812_v41, %v3784_v1 }
 0x22c   : > { %v6587_v52 = vpop.f32.mrf.mxu0 }
 0x22d   : > { %v3842_v23 = vadd.f32 %v3841_v12, %v3813_v49 }
 0x22f   : > { %v3871_v21 = vadd.f32 %v3870_v22, %v3842_v23 }
 0x232   : > { %v3844_v10 = vpop.f32.mrf.mxu3 }
 0x234   : > { %v3786_v40 = vpop.f32.mrf.mxu1  ;;  %v6594_v4 = vpop.f32.mrf.mxu0 }
 0x235   : > { %v3787_v32 = vadd.f32 %v3786_v40, %v6571_v58 }
 0x23a   : > { %v3815_v24 = vpop.f32.mrf.mxu2  ;;  %v3846_v33 = vpop.f32.mrf.mxu3 }
 0x23b   : > { %v3816_v31 = vadd.f32 %v3815_v24, %v3787_v32 }
 0x23c   : > { %v3788_v39 = vpop.f32.mrf.mxu1 }
 0x23d   : > { %v3845_v62 = vadd.f32 %v3844_v10, %v3816_v31  ;;  %v3789_v44 = vadd.f32 %v3788_v39, %v6581_v14 }
 0x23f   : > { %v3874_v43 = vadd.f32 %v6587_v52, %v3845_v62 }
 0x242   : > { %v3817_v3 = vpop.f32.mrf.mxu2 }
 0x243   : > { %v6596_v15 = vpop.f32.mrf.mxu0  ;;  %v3818_v22 = vadd.f32 %v3817_v3, %v3789_v44 }
 0x245   : > { %v3847_v39 = vadd.f32 %v3846_v33, %v3818_v22 }
 0x249   : > { %v3849_v42 = vpop.f32.mrf.mxu3 }
 0x24b   : > { %v3791_v6 = vpop.f32.mrf.mxu1  ;;  %v6600_v16 = vpop.f32.mrf.mxu0 }
 0x24c   : > { %v3792_v10 = vadd.f32 %v3791_v6, %v6585_v25 }
 0x251   : > { %v3820_v60 = vpop.f32.mrf.mxu2  ;;  %v6623_v26 = vpop.f32.mrf.mxu3 }
 0x252   : > { %v3821_v11 = vadd.f32 %v3820_v60, %v3792_v10 }
 0x253   : > { %v6602_v55 = vpop.f32.mrf.mxu1 }
 0x254   : > { %v3794_v60 = vadd.f32 %v6602_v55, %v6590_v34 }
 0x259   : > { %v6606_v48 = vpop.f32.mrf.mxu2 }
 0x25b   : > { %v6604_v56 = vpop.f32.mrf.mxu0 }
 0x261   : > { %v3854_v38 = vpop.f32.mrf.mxu3 }
 0x263   : > { %v3796_v9 = vpop.f32.mrf.mxu1  ;;  %v6608_v27 = vpop.f32.mrf.mxu0 }
 0x264   : > { %v3797_v49 = vadd.f32 %v3796_v9, %v6592_v59  ;;  %v3823_v59 = vadd.f32 %v6606_v48, %v3794_v60 }
 0x269   : > { %v6611_v36 = vpop.f32.mrf.mxu2  ;;  %v3856_v35 = vpop.f32.mrf.mxu3 }
 0x26a   : > { %v3826_v6 = vadd.f32 %v6611_v36, %v3797_v49 }
 0x26b   : > { %v6613_v61 = vpop.f32.mrf.mxu1 }
 0x26c   : > { %v3799_v36 = vadd.f32 %v6613_v61, %v6598_v30 }
 0x26e   : > { %v3897_v18 = vpop.f32.mrf.mxu0 }
 0x26f   : > { %v3898_v5 = vadd.f32 %v3897_v18, %v3869_v0  ;;  %v3876_v18 = vadd.f32 %v6594_v4, %v3847_v39 }
 0x271   : > { %v6616_v2 = vpop.f32.mrf.mxu2  ;;  %v3921_v45 = vmul.f32 %v6621_v37, %v3898_v5  ;;  %v3850_v5 = vadd.f32 %v3849_v42, %v3821_v11 }
 0x272   : > { %v3828_v55 = vadd.f32 %v6616_v2, %v3799_v36 }
 0x273   : > { %v3902_v8 = vpop.f32.mrf.mxu1  ;;  %v3933_v63 = vadd.f32 %v6635_v53, %v3921_v45  ;;  %v3855_v45 = vadd.f32 %v3854_v38, %v3826_v6  ;;  %v3879_v9 = vadd.f32 %v6596_v15, %v3850_v5  ;;  %v3852_v15 = vadd.f32 %v6623_v26, %v3823_v59 }
 0x274   : > { %v3903_v24 = vadd.f32 %v3902_v8, %v3874_v43  ;;  %v4041_v31 = vpop.f32.mrf.mxu3  ;;  %v3857_v61 = vadd.f32 %v3856_v35, %v3828_v55 }
 0x275   : > { %v3884_v48 = vadd.f32 %v6604_v56, %v3855_v45  ;;  %v3881_v2 = vadd.f32 %v6600_v16, %v3852_v15 }
 0x276   : > { %v3899_v7 = vpop.f32.mrf.mxu0  ;;  %v3923_v3 = vmul.f32 %v6621_v37, %v3903_v24  ;;  %v3886_v43 = vadd.f32 %v6608_v27, %v3857_v61 }
 0x277   : > { %v3900_v29 = vadd.f32 %v3899_v7, %v3871_v21 }
 0x278   : > { %v3935_v0 = vadd.f32 %v6635_v53, %v3923_v3 }
 0x279   : > { %v4026_v20 = vpop.f32.mrf.mxu2  ;;  %v3922_v46 = vmul.f32 %v6621_v37, %v3900_v29 }
 0x27a   : > { %v4050_v19 = vmul.f32 %v6628_v51, %v4026_v20 }
 0x27b   : > { %v3904_v58 = vpop.f32.mrf.mxu1  ;;  %v3934_v57 = vadd.f32 %v6635_v53, %v3922_v46 }
 0x27c   : > { %v4062_v28 = vadd.f32 %v6640_v50, %v4050_v19  ;;  %v3905_v33 = vadd.f32 %v3904_v58, %v3876_v18  ;;  %v4056_v19 = vmul.f32 %v6628_v51, %v4041_v31 }
 0x27e   : > { %v4070_v13 = vadd.f32 %v4062_v28, %v3933_v63  ;;  %v3924_v4 = vmul.f32 %v6621_v37, %v3905_v33  ;;  %v4068_v62 = vadd.f32 %v6640_v50, %v4056_v19 }
 0x280   : > { %v4078_v54 = vmax.f32 %v4070_v13, 0.0  ;;  %v3936_v42 = vadd.f32 %v6635_v53, %v3924_v4 }
 0x281   : > { %v4028_v47 = vpop.f32.mrf.mxu2 }
 0x282   : > { %4086 = vst [vmem:[%s6651_s25] sm:$0xff] %v4078_v54  ;;  %v4051_v41 = vmul.f32 %v6628_v51, %v4028_v47  ;;  %v4043_v47 = vpop.f32.mrf.mxu3 }
 0x283   : > { %v3907_v40 = vpop.f32.mrf.mxu1  ;;  %v4057_v16 = vmul.f32 %v6628_v51, %v4043_v47 }
 0x284   : > { %v4063_v14 = vadd.f32 %v6640_v50, %v4051_v41  ;;  %v3908_v21 = vadd.f32 %v3907_v40, %v3879_v9 }
 0x285   : > { %v4069_v3 = vadd.f32 %v6640_v50, %v4057_v16 }
 0x286   : > { %v4071_v12 = vadd.f32 %v4063_v14, %v3934_v57  ;;  %v3925_v28 = vmul.f32 %v6621_v37, %v3908_v21 }
 0x288   : > { %v4079_v52 = vmax.f32 %v4071_v12, 0.0  ;;  %v3937_v38 = vadd.f32 %v6635_v53, %v3925_v28 }
 0x289   : > { %v4031_v17 = vpop.f32.mrf.mxu2 }
 0x28a   : > { %4087 = vst [vmem:[%s6651_s25 + $0x8] sm:$0xff] %v4079_v52  ;;  %v4052_v1 = vmul.f32 %v6628_v51, %v4031_v17 }
 0x28b   : > { %v3909_v25 = vpop.f32.mrf.mxu1 }
 0x28c   : > { %v4064_v8 = vadd.f32 %v6640_v50, %v4052_v1  ;;  %v3910_v46 = vadd.f32 %v3909_v25, %v3881_v2 }
 0x28e   : > { %v4072_v23 = vadd.f32 %v4064_v8, %v3935_v0  ;;  %v3926_v14 = vmul.f32 %v6621_v37, %v3910_v46 }
 0x290   : > { %v4080_v32 = vmax.f32 %v4072_v23, 0.0  ;;  %v3938_v17 = vadd.f32 %v6635_v53, %v3926_v14 }
 0x291   : > { %v4033_v7 = vpop.f32.mrf.mxu2 }
 0x292   : > { %4088 = vst [vmem:[%s6651_s25 + $0x10] sm:$0xff] %v4080_v32  ;;  %v4053_v20 = vmul.f32 %v6628_v51, %v4033_v7 }
 0x294   : > { %v4065_v34 = vadd.f32 %v6640_v50, %v4053_v20 }
 0x295   : > { %v3912_v63 = vpop.f32.mrf.mxu1 }
 0x296   : > { %v4073_v58 = vadd.f32 %v4065_v34, %v3936_v42  ;;  %v3913_v29 = vadd.f32 %v3912_v63, %v3884_v48 }
 0x298   : > { %v4081_v30 = vmax.f32 %v4073_v58, 0.0  ;;  %v3927_v13 = vmul.f32 %v6621_v37, %v3913_v29 }
 0x299   : > { %v4036_v44 = vpop.f32.mrf.mxu2 }
 0x29a   : > { %4089 = vst [vmem:[%s6651_s25 + $0x18] sm:$0xff] %v4081_v30  ;;  %v4054_v56 = vmul.f32 %v6628_v51, %v4036_v44  ;;  %v3939_v26 = vadd.f32 %v6635_v53, %v3927_v13 }
 0x29c   : > { %v4066_v54 = vadd.f32 %v6640_v50, %v4054_v56  ;;  %v4076_v22 = vadd.f32 %v4068_v62, %v3939_v26 }
 0x29d   : > { %v3914_v40 = vpop.f32.mrf.mxu1 }
 0x29e   : > { %v4074_v41 = vadd.f32 %v4066_v54, %v3937_v38  ;;  %v4084_v24 = vmax.f32 %v4076_v22, 0.0  ;;  %v3915_v57 = vadd.f32 %v3914_v40, %v3886_v43 }
 0x2a0   : > { %v4082_v39 = vmax.f32 %v4074_v41, 0.0  ;;  %4092 = vst [vmem:[%s6651_s25 + $0x30] sm:$0xff] %v4084_v24  ;;  %v3928_v12 = vmul.f32 %v6621_v37, %v3915_v57 }
 0x2a1   : > { %v4038_v10 = vpop.f32.mrf.mxu2 }
 0x2a2   : > { %4090 = vst [vmem:[%s6651_s25 + $0x20] sm:$0xff] %v4082_v39  ;;  %v4055_v27 = vmul.f32 %v6628_v51, %v4038_v10  ;;  %v3940_v52 = vadd.f32 %v6635_v53, %v3928_v12 }
 0x2a4   : > { %v4067_v11 = vadd.f32 %v6640_v50, %v4055_v27  ;;  %v4077_v37 = vadd.f32 %v4069_v3, %v3940_v52 }
 0x2a6   : > { %v4075_v35 = vadd.f32 %v4067_v11, %v3938_v17  ;;  %v4085_v18 = vmax.f32 %v4077_v37, 0.0 }
 0x2a8   : > { %v4083_v51 = vmax.f32 %v4075_v35, 0.0  ;;  %4093 = vst [vmem:[%s6651_s25 + $0x38] sm:$0xff] %v4085_v18 }
 0x2aa   : > { %4091 = vst [vmem:[%s6651_s25 + $0x28] sm:$0xff] %v4083_v51 }
 0x2ab   : > { %5209 = shalt.err (!%p5206_p3)
}
 0x2ac   : > { %s5247_s20 = smov 128   ;;  %s5248_s25 = smov 8  }
 0x2ad   : > { %5134 = dma.vmem_to_hbm [thread:$0]  (%p5342_p5), %s4108_s17, 1024, %s4110_s29, %s4095_s30, %s5247_s20, %s5247_s20, %s5248_s25  }
 0x2ae PF: > { %p5140_p4 = scmp.ge.s32.totalorder %s5244_s16, 2  ;;  %s4124_s21 = sand.u32 1, %s5232_s13  }
 0x2af   : > { %s4125_s26 = scalar_lea.sflag [#allocation4], %s4124_s21 }
 0x2b0   : > { %p5137_p7 = pnand %p5140_p4, %p5346_p6 }
 0x2b2   : > { %p5138_p8 = pneg %p5137_p7 }
 0x2b4   : > { %5227 = dma.done.wait (%p5138_p8), %s4125_s26, 1024  }
 0x2b5   : > { %5229 = vsyncadd (%p5138_p8), %s4125_s26, 4294966272  ;;  %p20_p9 = scmp.ge.s32.totalorder %s5329_s19, 4   ;;  %s6756_s13 = smov %s5236_s14 }
 0x2b6   : > { %s6757_s14 = smov %s5240_s15  ;;  %s6758_s15 = smov %s5340_s22 }
 0x2b7   : > { %s6759_s16 = smov %s5329_s19  ;;  %22 = sbr.rel (!%p20_p9) target bundleno = 3 (0x3), region = 169 }
 0x2bc   :  { %4131 = vsyncpa [#allocation4], 1 }
 0x2bd   :  { %4133 = vsyncpa [#allocation4 + $0x1], 1 }

</bundles_post_ra>
